<compile_context>
chip_gen: v5e
topology: v5e:2x2
jax: 0.10.0
libtpu: 0.0.40
codegen_flags: <defaults>
</compile_context>

<pallas_src>
import functools
import math

import jax
import jax.numpy as jnp
from jax import lax
from jax.experimental import pallas as pl
from jax.experimental.pallas import tpu as pltpu


def _pick_row_tile(H, W, Cout, itemsize=4, max_out_tile_bytes=2 * 1024 * 1024):
    """Largest divisor of H whose (2*TH, 2*W, Cout) output tile stays modest.

    Keeps per-buffer tiles well inside the scoped-VMEM budget on all
    generations (incl. v7x's 64 MiB) and prefers >=2 row tiles so the grid can
    pipeline / shard across TensorCores even when N == 1.
    """
    cap = max(1, max_out_tile_bytes // (4 * W * Cout * itemsize))
    cap = min(cap, H if H < 2 else H // 2)
    best = 1
    for d in range(1, H + 1):
        if H % d == 0 and d <= cap:
            best = d
    return best


def _up_conv_kernel(x_ref, w_ref, scale_ref, shift_ref, o_ref, *,
                    row_tile, W, Cin, Cout, fuse_taps, strided_out):
    # x_ref    : (1, H+2, W+2, Cin)  bf16   zero-padded ORIGINAL-resolution input
    #                                        (whole plane, resident per batch elem)
    # w_ref    : fuse_taps -> (9*Cin, 4*Cout) bf16   phase-combined conv weights
    #            else      -> (4, 2, 2, Cin, Cout) bf16
    # scale_ref: (1, Cout) f32   gamma / sqrt(var + eps)
    # shift_ref: (1, Cout) f32   beta + (bias - mean) * scale
    # o_ref    : strided_out -> (1, TH, 2, 2*W, Cout)
    #            else        -> (1, TH, 2, W, 2, Cout)
    t = pl.program_id(1)
    i0 = pl.multiple_of(t * row_tile, row_tile)
    # rows [i0, i0 + TH + 2) of the padded plane cover this output row tile
    # (1 original row of halo on each side).
    xt = x_ref[0, pl.ds(i0, row_tile + 2), :, :]          # (TH+2, W+2, Cin)

    scale = scale_ref[...]                                # (1, Cout)
    shift = shift_ref[...]

    if fuse_taps:
        # Small-Cin path: one MXU matmul covering all 9 taps and all 4 phases.
        taps = [xt[a:a + row_tile, b:b + W, :]
                for a in range(3) for b in range(3)]
        p9 = jnp.concatenate(taps, axis=-1)               # (TH, W, 9*Cin)
        p9 = p9.reshape(row_tile * W, 9 * Cin)
        y_all = jnp.dot(p9, w_ref[...],
                        preferred_element_type=jnp.float32)  # (TH*W, 4*Cout)

    for q in range(2):          # output row parity
        for p in range(2):      # output column parity
            k = 2 * q + p
            if fuse_taps:
                y = y_all[:, k * Cout:(k + 1) * Cout]
            else:
                # Large-Cin path: 4 accumulating dots with K = Cin per phase.
                y = jnp.zeros((row_tile * W, Cout), jnp.float32)
                for a2 in range(2):
                    for b2 in range(2):
                        s = xt[q + a2:q + a2 + row_tile,
                               p + b2:p + b2 + W, :]
                        y = y + jnp.dot(s.reshape(row_tile * W, Cin),
                                        w_ref[k, a2, b2],
                                        preferred_element_type=jnp.float32)
            # conv bias + eval-mode BatchNorm (folded) + ReLU
            y = jnp.maximum(y * scale + shift, 0.0)
            y = y.reshape(row_tile, W, Cout).astype(o_ref.dtype)
            if strided_out:
                # Interleave the column phase straight into the dense 2W axis.
                o_ref[0, :, q, pl.ds(p, W, 2), :] = y
            else:
                # Phase-separated layout; interleave happens in the wrapper.
                o_ref[0, :, q, :, p, :] = y


def up_conv_forward(x_nchw, weight_hwio, bias, gamma, beta,
                    running_mean, running_var, eps=1e-5, *,
                    row_tile=None, fuse_taps=None, strided_out=True):
    """Forward of up_conv. x_nchw: (N, Cin, H, W) -> (N, Cout, 2H, 2W)."""
    N, Cin, H, W = x_nchw.shape
    Cout = weight_hwio.shape[-1]

    # ---- cheap glue at ORIGINAL resolution only ---------------------------
    x = jnp.transpose(x_nchw, (0, 2, 3, 1))                       # NHWC
    xpad = jnp.pad(x, ((0, 0), (1, 1), (1, 1), (0, 0))).astype(jnp.bfloat16)

    # ---- fold Upsample(2x nearest) + 3x3 conv into four 2x2 phase convs ---
    # rho(q, k) = (q + k + 1) // 2  is the padded-original row/col offset that
    # kernel tap k reads for an output pixel of parity q.
    R = jnp.array([[[1, 0, 0], [0, 1, 1], [0, 0, 0]],   # parity 0
                   [[0, 0, 0], [1, 1, 0], [0, 0, 1]]],  # parity 1
                  dtype=jnp.float32)                    # (2, 3, 3) [q, a, kh]
    w = weight_hwio.astype(jnp.float32)
    # G[q,p,a,b,ci,co] = sum_{kh,kw} R[q,a,kh] * R[p,b,kw] * w[kh,kw,ci,co]
    G = jnp.einsum('qak,pbl,klio->qpabio', R, R, w)

    if fuse_taps is None:
        fuse_taps = Cin <= 32
    if fuse_taps:
        # rows ordered (a, b, ci), cols ordered (q, p, co) -> one big matmul
        w_arg = jnp.transpose(G, (2, 3, 4, 0, 1, 5)).reshape(9 * Cin, 4 * Cout)
    else:
        # keep only each phase's non-zero 2x2 taps
        w_arg = jnp.stack([G[q, p, q:q + 2, p:p + 2]
                           for q in range(2) for p in range(2)], axis=0)
    w_arg = w_arg.astype(jnp.bfloat16)

    scale = (gamma / jnp.sqrt(running_var + eps)).astype(jnp.float32)
    shift = (beta + (bias - running_mean) * scale).astype(jnp.float32)
    scale2 = scale.reshape(1, Cout)
    shift2 = shift.reshape(1, Cout)

    if row_tile is None:
        row_tile = _pick_row_tile(H, W, Cout, itemsize=x_nchw.dtype.itemsize)
    assert H % row_tile == 0
    n_tiles = H // row_tile
    Hp, Wp = H + 2, W + 2

    kern = functools.partial(_up_conv_kernel, row_tile=row_tile, W=W,
                             Cin=Cin, Cout=Cout, fuse_taps=fuse_taps,
                             strided_out=strided_out)

    if strided_out:
        out_shape = jax.ShapeDtypeStruct((N, H, 2, 2 * W, Cout), x_nchw.dtype)
        out_spec = pl.BlockSpec((1, row_tile, 2, 2 * W, Cout),
                                lambda b, t: (b, t, 0, 0, 0))
    else:
        out_shape = jax.ShapeDtypeStruct((N, H, 2, W, 2, Cout), x_nchw.dtype)
        out_spec = pl.BlockSpec((1, row_tile, 2, W, 2, Cout),
                                lambda b, t: (b, t, 0, 0, 0, 0))

    if fuse_taps:
        w_spec = pl.BlockSpec((9 * Cin, 4 * Cout), lambda b, t: (0, 0))
    else:
        w_spec = pl.BlockSpec((4, 2, 2, Cin, Cout),
                              lambda b, t: (0, 0, 0, 0, 0))

    itemsize = x_nchw.dtype.itemsize
    flops = 2 * N * (2 * H) * (2 * W) * 9 * Cin * Cout
    bytes_accessed = int(xpad.size * 2 + w_arg.size * 2
                         + (scale2.size + shift2.size) * 4
                         + math.prod(out_shape.shape) * itemsize)

    out = pl.pallas_call(
        kern,
        out_shape=out_shape,
        grid_spec=pltpu.PrefetchScalarGridSpec(
            num_scalar_prefetch=0,
            grid=(N, n_tiles),
            in_specs=[
                # whole padded original-res plane, resident per batch element
                # (re-DMAed only when the batch index changes)
                pl.BlockSpec((1, Hp, Wp, Cin), lambda b, t: (b, 0, 0, 0)),
                w_spec,
                pl.BlockSpec((1, Cout), lambda b, t: (0, 0)),
                pl.BlockSpec((1, Cout), lambda b, t: (0, 0)),
            ],
            out_specs=out_spec,
        ),
        compiler_params=pltpu.CompilerParams(
            dimension_semantics=("parallel", "parallel"),
            vmem_limit_bytes=32 * 1024 * 1024),
        cost_estimate=pl.CostEstimate(flops=flops, transcendentals=0,
                                      bytes_accessed=bytes_accessed),
    )(xpad, w_arg, scale2, shift2)

    # free, layout-compatible merges: (N,H,2,2W,C) -> (N,2H,2W,C)
    out_nhwc = out.reshape(N, 2 * H, 2 * W, Cout)
    return jnp.transpose(out_nhwc, (0, 3, 1, 2))                  # NCHW


def _reference(x_nchw, weight_hwio, bias, gamma, beta,
               running_mean, running_var, eps=1e-5):
    """Pure-JAX reference: Upsample(2x nearest) -> conv3x3 -> BN(eval) -> ReLU."""
    x = jnp.transpose(x_nchw, (0, 2, 3, 1)).astype(jnp.float32)
    xu = jnp.repeat(jnp.repeat(x, 2, axis=1), 2, axis=2)
    y = lax.conv_general_dilated(xu, weight_hwio.astype(jnp.float32),
                                 window_strides=(1, 1),
                                 padding=((1, 1), (1, 1)),
                                 dimension_numbers=('NHWC', 'HWIO', 'NHWC'))
    y = y + bias
    y = (y - running_mean) / jnp.sqrt(running_var + eps) * gamma + beta
    y = jnp.maximum(y, 0.0)
    return jnp.transpose(y, (0, 3, 1, 2))


if __name__ == "__main__":
    # small shapes consistent with the module: batch=2, ch_in=4, ch_out=8, spatial=16
    N, CH_IN, CH_OUT, H, W = 2, 4, 8, 16, 16

    key = jax.random.PRNGKey(0)
    k_x, k_w, k_b, k_g, k_beta = jax.random.split(key, 5)

    x = jax.random.normal(k_x, (N, CH_IN, H, W), dtype=jnp.float32)
    weight_hwio = 0.1 * jax.random.normal(k_w, (3, 3, CH_IN, CH_OUT), dtype=jnp.float32)
    bias = 0.1 * jax.random.normal(k_b, (CH_OUT,), dtype=jnp.float32)
    gamma = jnp.ones((CH_OUT,), jnp.float32) + 0.05 * jax.random.normal(k_g, (CH_OUT,))
    beta = 0.05 * jax.random.normal(k_beta, (CH_OUT,), dtype=jnp.float32)
    running_mean = jnp.zeros((CH_OUT,), jnp.float32)
    running_var = jnp.ones((CH_OUT,), jnp.float32)

    args = (x, weight_hwio, bias, gamma, beta, running_mean, running_var)
    ref = _reference(*args)

    def _run(strided_out, fuse_taps=None):
        out = up_conv_forward(*args, strided_out=strided_out, fuse_taps=fuse_taps)
        jax.block_until_ready(out)
        assert out.shape == (N, CH_OUT, 2 * H, 2 * W), out.shape
        err = float(jnp.max(jnp.abs(out - ref)))
        assert jnp.allclose(out, ref, atol=3e-2, rtol=3e-2), err
        return out

    try:
        # Preferred path: fused K=9*Cin matmul + stride-2 column-interleaved stores.
        _run(strided_out=True)
    except Exception:
        # Conservative fallback: plain stores to a phase-separated output layout
        # and per-phase accumulating dots (no strided stores / lane concat).
        _run(strided_out=False, fuse_taps=False)

    print("KERNEL_OK")
</pallas_src>

<mosaic_0001>
module attributes {stable_mosaic.version = 11 : i64} {
  func.func @_up_conv_kernel(%arg0: i32, %arg1: i32, %arg2: memref<1x18x18x4xbf16, #tpu.memory_space<vmem>>, %arg3: memref<36x32xbf16, #tpu.memory_space<vmem>>, %arg4: memref<1x8xf32, #tpu.memory_space<vmem>>, %arg5: memref<1x8xf32, #tpu.memory_space<vmem>>, %arg6: memref<1x8x2x32x8xf32, #tpu.memory_space<vmem>>) attributes {dimension_semantics = [#tpu.dimension_semantics<parallel>, #tpu.dimension_semantics<parallel>], iteration_bounds = array<i64: 2, 2>, scalar_prefetch = 0 : i64, scratch_operands = 0 : i64, tpu.core_type = #tpu.core_type<tc>, window_params = [{transform_indices = @transform_0, window_bounds = array<i64: 1, 18, 18, 4>}, {pipeline_mode = #tpu.pipeline_mode<synchronous>, transform_indices = @transform_1, window_bounds = array<i64: 36, 32>}, {pipeline_mode = #tpu.pipeline_mode<synchronous>, transform_indices = @transform_2, window_bounds = array<i64: 1, 8>}, {pipeline_mode = #tpu.pipeline_mode<synchronous>, transform_indices = @transform_3, window_bounds = array<i64: 1, 8>}, {transform_indices = @transform_4, window_bounds = array<i64: 1, 8, 2, 32, 8>}]} {
    %c8_i32 = arith.constant 8 : i32
    %0 = arith.muli %arg1, %c8_i32 : i32
    %1 = tpu.assume_multiple %0, 8 : i32
    %c0 = arith.constant 0 : index
    %2 = arith.index_cast %1 : i32 to index
    %c0_0 = arith.constant 0 : index
    %c0_1 = arith.constant 0 : index
    %3 = vector.load %arg2[%c0, %2, %c0_0, %c0_1] : memref<1x18x18x4xbf16, #tpu.memory_space<vmem>>, vector<1x10x18x4xbf16>
    %4 = vector.shape_cast %3 : vector<1x10x18x4xbf16> to vector<10x18x4xbf16>
    %c0_2 = arith.constant 0 : index
    %c0_3 = arith.constant 0 : index
    %5 = vector.load %arg4[%c0_2, %c0_3] : memref<1x8xf32, #tpu.memory_space<vmem>>, vector<1x8xf32>
    %c0_4 = arith.constant 0 : index
    %c0_5 = arith.constant 0 : index
    %6 = vector.load %arg5[%c0_4, %c0_5] : memref<1x8xf32, #tpu.memory_space<vmem>>, vector<1x8xf32>
    %7 = vector.extract_strided_slice %4 {offsets = [0, 0, 0], sizes = [8, 16, 4], strides = [1, 1, 1]} : vector<10x18x4xbf16> to vector<8x16x4xbf16>
    %8 = vector.extract_strided_slice %4 {offsets = [0, 1, 0], sizes = [8, 16, 4], strides = [1, 1, 1]} : vector<10x18x4xbf16> to vector<8x16x4xbf16>
    %9 = vector.extract_strided_slice %4 {offsets = [0, 2, 0], sizes = [8, 16, 4], strides = [1, 1, 1]} : vector<10x18x4xbf16> to vector<8x16x4xbf16>
    %10 = vector.extract_strided_slice %4 {offsets = [1, 0, 0], sizes = [8, 16, 4], strides = [1, 1, 1]} : vector<10x18x4xbf16> to vector<8x16x4xbf16>
    %11 = vector.extract_strided_slice %4 {offsets = [1, 1, 0], sizes = [8, 16, 4], strides = [1, 1, 1]} : vector<10x18x4xbf16> to vector<8x16x4xbf16>
    %12 = vector.extract_strided_slice %4 {offsets = [1, 2, 0], sizes = [8, 16, 4], strides = [1, 1, 1]} : vector<10x18x4xbf16> to vector<8x16x4xbf16>
    %13 = vector.extract_strided_slice %4 {offsets = [2, 0, 0], sizes = [8, 16, 4], strides = [1, 1, 1]} : vector<10x18x4xbf16> to vector<8x16x4xbf16>
    %14 = vector.extract_strided_slice %4 {offsets = [2, 1, 0], sizes = [8, 16, 4], strides = [1, 1, 1]} : vector<10x18x4xbf16> to vector<8x16x4xbf16>
    %15 = vector.extract_strided_slice %4 {offsets = [2, 2, 0], sizes = [8, 16, 4], strides = [1, 1, 1]} : vector<10x18x4xbf16> to vector<8x16x4xbf16>
    %16 = tpu.concatenate %7, %8, %9, %10, %11, %12, %13, %14, %15 in 2 : vector<8x16x4xbf16>, vector<8x16x4xbf16>, vector<8x16x4xbf16>, vector<8x16x4xbf16>, vector<8x16x4xbf16>, vector<8x16x4xbf16>, vector<8x16x4xbf16>, vector<8x16x4xbf16>, vector<8x16x4xbf16> -> vector<8x16x36xbf16>
    %17 = vector.shape_cast %16 : vector<8x16x36xbf16> to vector<128x36xbf16>
    %c0_6 = arith.constant 0 : index
    %c0_7 = arith.constant 0 : index
    %18 = vector.load %arg3[%c0_6, %c0_7] : memref<36x32xbf16, #tpu.memory_space<vmem>>, vector<36x32xbf16>
    %cst = arith.constant dense<0.000000e+00> : vector<128x32xf32>
    %19 = tpu.matmul %17, %18, %cst {dimension_numbers = #tpu.dot_dimension_numbers<[1], [0], [0], [1], [0, 0, 1, 1], [], []>} : vector<128x36xbf16>, vector<36x32xbf16>, vector<128x32xf32> -> vector<128x32xf32>
    %20 = vector.extract_strided_slice %19 {offsets = [0, 0], sizes = [128, 8], strides = [1, 1]} : vector<128x32xf32> to vector<128x8xf32>
    %21 = vector.broadcast %5 : vector<1x8xf32> to vector<128x8xf32>
    %22 = arith.mulf %20, %21 : vector<128x8xf32>
    %23 = vector.broadcast %6 : vector<1x8xf32> to vector<128x8xf32>
    %24 = arith.addf %22, %23 : vector<128x8xf32>
    %cst_8 = arith.constant 0.000000e+00 : f32
    %25 = vector.broadcast %cst_8 : f32 to vector<128x8xf32>
    %26 = arith.maximumf %24, %25 : vector<128x8xf32>
    %27 = vector.shape_cast %26 : vector<128x8xf32> to vector<8x16x8xf32>
    %c0_9 = arith.constant 0 : index
    %c0_10 = arith.constant 0 : index
    %c0_11 = arith.constant 0 : index
    %c0_12 = arith.constant 0 : index
    %c0_13 = arith.constant 0 : index
    %28 = tpu.strided_load %arg6[%c0_9, %c0_10, %c0_11, %c0_12, %c0_13] {strides = array<i32: 1, 1, 1, 2, 1>} : memref<1x8x2x32x8xf32, #tpu.memory_space<vmem>>, vector<1x8x1x16x8xf32>
    %29 = vector.shape_cast %28 : vector<1x8x1x16x8xf32> to vector<8x16x8xf32>
    %30 = vector.shape_cast %27 : vector<8x16x8xf32> to vector<1x8x1x16x8xf32>
    tpu.strided_store %arg6[%c0_9, %c0_10, %c0_11, %c0_12, %c0_13], %30 {strides = array<i32: 1, 1, 1, 2, 1>} : memref<1x8x2x32x8xf32, #tpu.memory_space<vmem>>, vector<1x8x1x16x8xf32>
    %31 = vector.extract_strided_slice %19 {offsets = [0, 8], sizes = [128, 8], strides = [1, 1]} : vector<128x32xf32> to vector<128x8xf32>
    %32 = vector.broadcast %5 : vector<1x8xf32> to vector<128x8xf32>
    %33 = arith.mulf %31, %32 : vector<128x8xf32>
    %34 = vector.broadcast %6 : vector<1x8xf32> to vector<128x8xf32>
    %35 = arith.addf %33, %34 : vector<128x8xf32>
    %cst_14 = arith.constant 0.000000e+00 : f32
    %36 = vector.broadcast %cst_14 : f32 to vector<128x8xf32>
    %37 = arith.maximumf %35, %36 : vector<128x8xf32>
    %38 = vector.shape_cast %37 : vector<128x8xf32> to vector<8x16x8xf32>
    %c0_15 = arith.constant 0 : index
    %c0_16 = arith.constant 0 : index
    %c0_17 = arith.constant 0 : index
    %c1 = arith.constant 1 : index
    %c0_18 = arith.constant 0 : index
    %39 = tpu.strided_load %arg6[%c0_15, %c0_16, %c0_17, %c1, %c0_18] {strides = array<i32: 1, 1, 1, 2, 1>} : memref<1x8x2x32x8xf32, #tpu.memory_space<vmem>>, vector<1x8x1x16x8xf32>
    %40 = vector.shape_cast %39 : vector<1x8x1x16x8xf32> to vector<8x16x8xf32>
    %41 = vector.shape_cast %38 : vector<8x16x8xf32> to vector<1x8x1x16x8xf32>
    tpu.strided_store %arg6[%c0_15, %c0_16, %c0_17, %c1, %c0_18], %41 {strides = array<i32: 1, 1, 1, 2, 1>} : memref<1x8x2x32x8xf32, #tpu.memory_space<vmem>>, vector<1x8x1x16x8xf32>
    %42 = vector.extract_strided_slice %19 {offsets = [0, 16], sizes = [128, 8], strides = [1, 1]} : vector<128x32xf32> to vector<128x8xf32>
    %43 = vector.broadcast %5 : vector<1x8xf32> to vector<128x8xf32>
    %44 = arith.mulf %42, %43 : vector<128x8xf32>
    %45 = vector.broadcast %6 : vector<1x8xf32> to vector<128x8xf32>
    %46 = arith.addf %44, %45 : vector<128x8xf32>
    %cst_19 = arith.constant 0.000000e+00 : f32
    %47 = vector.broadcast %cst_19 : f32 to vector<128x8xf32>
    %48 = arith.maximumf %46, %47 : vector<128x8xf32>
    %49 = vector.shape_cast %48 : vector<128x8xf32> to vector<8x16x8xf32>
    %c0_20 = arith.constant 0 : index
    %c0_21 = arith.constant 0 : index
    %c1_22 = arith.constant 1 : index
    %c0_23 = arith.constant 0 : index
    %c0_24 = arith.constant 0 : index
    %50 = tpu.strided_load %arg6[%c0_20, %c0_21, %c1_22, %c0_23, %c0_24] {strides = array<i32: 1, 1, 1, 2, 1>} : memref<1x8x2x32x8xf32, #tpu.memory_space<vmem>>, vector<1x8x1x16x8xf32>
    %51 = vector.shape_cast %50 : vector<1x8x1x16x8xf32> to vector<8x16x8xf32>
    %52 = vector.shape_cast %49 : vector<8x16x8xf32> to vector<1x8x1x16x8xf32>
    tpu.strided_store %arg6[%c0_20, %c0_21, %c1_22, %c0_23, %c0_24], %52 {strides = array<i32: 1, 1, 1, 2, 1>} : memref<1x8x2x32x8xf32, #tpu.memory_space<vmem>>, vector<1x8x1x16x8xf32>
    %53 = vector.extract_strided_slice %19 {offsets = [0, 24], sizes = [128, 8], strides = [1, 1]} : vector<128x32xf32> to vector<128x8xf32>
    %54 = vector.broadcast %5 : vector<1x8xf32> to vector<128x8xf32>
    %55 = arith.mulf %53, %54 : vector<128x8xf32>
    %56 = vector.broadcast %6 : vector<1x8xf32> to vector<128x8xf32>
    %57 = arith.addf %55, %56 : vector<128x8xf32>
    %cst_25 = arith.constant 0.000000e+00 : f32
    %58 = vector.broadcast %cst_25 : f32 to vector<128x8xf32>
    %59 = arith.maximumf %57, %58 : vector<128x8xf32>
    %60 = vector.shape_cast %59 : vector<128x8xf32> to vector<8x16x8xf32>
    %c0_26 = arith.constant 0 : index
    %c0_27 = arith.constant 0 : index
    %c1_28 = arith.constant 1 : index
    %c1_29 = arith.constant 1 : index
    %c0_30 = arith.constant 0 : index
    %61 = tpu.strided_load %arg6[%c0_26, %c0_27, %c1_28, %c1_29, %c0_30] {strides = array<i32: 1, 1, 1, 2, 1>} : memref<1x8x2x32x8xf32, #tpu.memory_space<vmem>>, vector<1x8x1x16x8xf32>
    %62 = vector.shape_cast %61 : vector<1x8x1x16x8xf32> to vector<8x16x8xf32>
    %63 = vector.shape_cast %60 : vector<8x16x8xf32> to vector<1x8x1x16x8xf32>
    tpu.strided_store %arg6[%c0_26, %c0_27, %c1_28, %c1_29, %c0_30], %63 {strides = array<i32: 1, 1, 1, 2, 1>} : memref<1x8x2x32x8xf32, #tpu.memory_space<vmem>>, vector<1x8x1x16x8xf32>
    return
  }
  func.func @transform_0(%arg0: i32, %arg1: i32) -> (i32, i32, i32, i32) {
    %c0_i32 = arith.constant 0 : i32
    %c0_i32_0 = arith.constant 0 : i32
    %c0_i32_1 = arith.constant 0 : i32
    %c0_i32_2 = arith.constant 0 : i32
    return %arg0, %c0_i32, %c0_i32_0, %c0_i32_1 : i32, i32, i32, i32
  }
  func.func @transform_1(%arg0: i32, %arg1: i32) -> (i32, i32) {
    %c0_i32 = arith.constant 0 : i32
    %c0_i32_0 = arith.constant 0 : i32
    %c0_i32_1 = arith.constant 0 : i32
    return %c0_i32, %c0_i32_0 : i32, i32
  }
  func.func @transform_2(%arg0: i32, %arg1: i32) -> (i32, i32) {
    %c0_i32 = arith.constant 0 : i32
    %c0_i32_0 = arith.constant 0 : i32
    %c0_i32_1 = arith.constant 0 : i32
    return %c0_i32, %c0_i32_0 : i32, i32
  }
  func.func @transform_3(%arg0: i32, %arg1: i32) -> (i32, i32) {
    %c0_i32 = arith.constant 0 : i32
    %c0_i32_0 = arith.constant 0 : i32
    %c0_i32_1 = arith.constant 0 : i32
    return %c0_i32, %c0_i32_0 : i32, i32
  }
  func.func @transform_4(%arg0: i32, %arg1: i32) -> (i32, i32, i32, i32, i32) {
    %c0_i32 = arith.constant 0 : i32
    %c0_i32_0 = arith.constant 0 : i32
    %c0_i32_1 = arith.constant 0 : i32
    %c0_i32_2 = arith.constant 0 : i32
    return %arg0, %arg1, %c0_i32, %c0_i32_0, %c0_i32_1 : i32, i32, i32, i32, i32
  }
}

module attributes {stable_mosaic.version = 11 : i64} {
  func.func @_up_conv_kernel(%arg0: i32, %arg1: i32, %arg2: memref<1x18x18x4xbf16, #tpu.memory_space<vmem>>, %arg3: memref<4x2x2x4x8xbf16, #tpu.memory_space<vmem>>, %arg4: memref<1x8xf32, #tpu.memory_space<vmem>>, %arg5: memref<1x8xf32, #tpu.memory_space<vmem>>, %arg6: memref<1x8x2x16x2x8xf32, #tpu.memory_space<vmem>>) attributes {dimension_semantics = [#tpu.dimension_semantics<parallel>, #tpu.dimension_semantics<parallel>], iteration_bounds = array<i64: 2, 2>, scalar_prefetch = 0 : i64, scratch_operands = 0 : i64, tpu.core_type = #tpu.core_type<tc>, window_params = [{transform_indices = @transform_0, window_bounds = array<i64: 1, 18, 18, 4>}, {pipeline_mode = #tpu.pipeline_mode<synchronous>, transform_indices = @transform_1, window_bounds = array<i64: 4, 2, 2, 4, 8>}, {pipeline_mode = #tpu.pipeline_mode<synchronous>, transform_indices = @transform_2, window_bounds = array<i64: 1, 8>}, {pipeline_mode = #tpu.pipeline_mode<synchronous>, transform_indices = @transform_3, window_bounds = array<i64: 1, 8>}, {transform_indices = @transform_4, window_bounds = array<i64: 1, 8, 2, 16, 2, 8>}]} {
    %c8_i32 = arith.constant 8 : i32
    %0 = arith.muli %arg1, %c8_i32 : i32
    %1 = tpu.assume_multiple %0, 8 : i32
    %c0 = arith.constant 0 : index
    %2 = arith.index_cast %1 : i32 to index
    %c0_0 = arith.constant 0 : index
    %c0_1 = arith.constant 0 : index
    %3 = vector.load %arg2[%c0, %2, %c0_0, %c0_1] : memref<1x18x18x4xbf16, #tpu.memory_space<vmem>>, vector<1x10x18x4xbf16>
    %4 = vector.shape_cast %3 : vector<1x10x18x4xbf16> to vector<10x18x4xbf16>
    %c0_2 = arith.constant 0 : index
    %c0_3 = arith.constant 0 : index
    %5 = vector.load %arg4[%c0_2, %c0_3] : memref<1x8xf32, #tpu.memory_space<vmem>>, vector<1x8xf32>
    %c0_4 = arith.constant 0 : index
    %c0_5 = arith.constant 0 : index
    %6 = vector.load %arg5[%c0_4, %c0_5] : memref<1x8xf32, #tpu.memory_space<vmem>>, vector<1x8xf32>
    %cst = arith.constant 0.000000e+00 : f32
    %7 = vector.broadcast %cst : f32 to vector<128x8xf32>
    %8 = vector.extract_strided_slice %4 {offsets = [0, 0, 0], sizes = [8, 16, 4], strides = [1, 1, 1]} : vector<10x18x4xbf16> to vector<8x16x4xbf16>
    %9 = vector.shape_cast %8 : vector<8x16x4xbf16> to vector<128x4xbf16>
    %c0_6 = arith.constant 0 : index
    %c0_7 = arith.constant 0 : index
    %c0_8 = arith.constant 0 : index
    %c0_9 = arith.constant 0 : index
    %c0_10 = arith.constant 0 : index
    %10 = vector.load %arg3[%c0_6, %c0_7, %c0_8, %c0_9, %c0_10] : memref<4x2x2x4x8xbf16, #tpu.memory_space<vmem>>, vector<1x1x1x4x8xbf16>
    %11 = vector.shape_cast %10 : vector<1x1x1x4x8xbf16> to vector<4x8xbf16>
    %cst_11 = arith.constant dense<0.000000e+00> : vector<128x8xf32>
    %12 = tpu.matmul %9, %11, %cst_11 {dimension_numbers = #tpu.dot_dimension_numbers<[1], [0], [0], [1], [0, 0, 1, 1], [], []>} : vector<128x4xbf16>, vector<4x8xbf16>, vector<128x8xf32> -> vector<128x8xf32>
    %13 = arith.addf %7, %12 : vector<128x8xf32>
    %14 = vector.extract_strided_slice %4 {offsets = [0, 1, 0], sizes = [8, 16, 4], strides = [1, 1, 1]} : vector<10x18x4xbf16> to vector<8x16x4xbf16>
    %15 = vector.shape_cast %14 : vector<8x16x4xbf16> to vector<128x4xbf16>
    %c0_12 = arith.constant 0 : index
    %c0_13 = arith.constant 0 : index
    %c1 = arith.constant 1 : index
    %c0_14 = arith.constant 0 : index
    %c0_15 = arith.constant 0 : index
    %16 = vector.load %arg3[%c0_12, %c0_13, %c1, %c0_14, %c0_15] : memref<4x2x2x4x8xbf16, #tpu.memory_space<vmem>>, vector<1x1x1x4x8xbf16>
    %17 = vector.shape_cast %16 : vector<1x1x1x4x8xbf16> to vector<4x8xbf16>
    %cst_16 = arith.constant dense<0.000000e+00> : vector<128x8xf32>
    %18 = tpu.matmul %15, %17, %cst_16 {dimension_numbers = #tpu.dot_dimension_numbers<[1], [0], [0], [1], [0, 0, 1, 1], [], []>} : vector<128x4xbf16>, vector<4x8xbf16>, vector<128x8xf32> -> vector<128x8xf32>
    %19 = arith.addf %13, %18 : vector<128x8xf32>
    %20 = vector.extract_strided_slice %4 {offsets = [1, 0, 0], sizes = [8, 16, 4], strides = [1, 1, 1]} : vector<10x18x4xbf16> to vector<8x16x4xbf16>
    %21 = vector.shape_cast %20 : vector<8x16x4xbf16> to vector<128x4xbf16>
    %c0_17 = arith.constant 0 : index
    %c1_18 = arith.constant 1 : index
    %c0_19 = arith.constant 0 : index
    %c0_20 = arith.constant 0 : index
    %c0_21 = arith.constant 0 : index
    %22 = vector.load %arg3[%c0_17, %c1_18, %c0_19, %c0_20, %c0_21] : memref<4x2x2x4x8xbf16, #tpu.memory_space<vmem>>, vector<1x1x1x4x8xbf16>
    %23 = vector.shape_cast %22 : vector<1x1x1x4x8xbf16> to vector<4x8xbf16>
    %cst_22 = arith.constant dense<0.000000e+00> : vector<128x8xf32>
    %24 = tpu.matmul %21, %23, %cst_22 {dimension_numbers = #tpu.dot_dimension_numbers<[1], [0], [0], [1], [0, 0, 1, 1], [], []>} : vector<128x4xbf16>, vector<4x8xbf16>, vector<128x8xf32> -> vector<128x8xf32>
    %25 = arith.addf %19, %24 : vector<128x8xf32>
    %26 = vector.extract_strided_slice %4 {offsets = [1, 1, 0], sizes = [8, 16, 4], strides = [1, 1, 1]} : vector<10x18x4xbf16> to vector<8x16x4xbf16>
    %27 = vector.shape_cast %26 : vector<8x16x4xbf16> to vector<128x4xbf16>
    %c0_23 = arith.constant 0 : index
    %c1_24 = arith.constant 1 : index
    %c1_25 = arith.constant 1 : index
    %c0_26 = arith.constant 0 : index
    %c0_27 = arith.constant 0 : index
    %28 = vector.load %arg3[%c0_23, %c1_24, %c1_25, %c0_26, %c0_27] : memref<4x2x2x4x8xbf16, #tpu.memory_space<vmem>>, vector<1x1x1x4x8xbf16>
    %29 = vector.shape_cast %28 : vector<1x1x1x4x8xbf16> to vector<4x8xbf16>
    %cst_28 = arith.constant dense<0.000000e+00> : vector<128x8xf32>
    %30 = tpu.matmul %27, %29, %cst_28 {dimension_numbers = #tpu.dot_dimension_numbers<[1], [0], [0], [1], [0, 0, 1, 1], [], []>} : vector<128x4xbf16>, vector<4x8xbf16>, vector<128x8xf32> -> vector<128x8xf32>
    %31 = arith.addf %25, %30 : vector<128x8xf32>
    %32 = vector.broadcast %5 : vector<1x8xf32> to vector<128x8xf32>
    %33 = arith.mulf %31, %32 : vector<128x8xf32>
    %34 = vector.broadcast %6 : vector<1x8xf32> to vector<128x8xf32>
    %35 = arith.addf %33, %34 : vector<128x8xf32>
    %cst_29 = arith.constant 0.000000e+00 : f32
    %36 = vector.broadcast %cst_29 : f32 to vector<128x8xf32>
    %37 = arith.maximumf %35, %36 : vector<128x8xf32>
    %38 = vector.shape_cast %37 : vector<128x8xf32> to vector<8x16x8xf32>
    %c0_30 = arith.constant 0 : index
    %c0_31 = arith.constant 0 : index
    %c0_32 = arith.constant 0 : index
    %c0_33 = arith.constant 0 : index
    %c0_34 = arith.constant 0 : index
    %c0_35 = arith.constant 0 : index
    %39 = vector.load %arg6[%c0_30, %c0_31, %c0_32, %c0_33, %c0_34, %c0_35] : memref<1x8x2x16x2x8xf32, #tpu.memory_space<vmem>>, vector<1x8x1x16x1x8xf32>
    %40 = vector.shape_cast %39 : vector<1x8x1x16x1x8xf32> to vector<8x16x8xf32>
    %41 = vector.shape_cast %38 : vector<8x16x8xf32> to vector<1x8x1x16x1x8xf32>
    tpu.vector_store %arg6[%c0_30, %c0_31, %c0_32, %c0_33, %c0_34, %c0_35], %41 {strides = array<i32>} : memref<1x8x2x16x2x8xf32, #tpu.memory_space<vmem>>, vector<1x8x1x16x1x8xf32>,
    %cst_36 = arith.constant 0.000000e+00 : f32
    %42 = vector.broadcast %cst_36 : f32 to vector<128x8xf32>
    %43 = vector.extract_strided_slice %4 {offsets = [0, 1, 0], sizes = [8, 16, 4], strides = [1, 1, 1]} : vector<10x18x4xbf16> to vector<8x16x4xbf16>
    %44 = vector.shape_cast %43 : vector<8x16x4xbf16> to vector<128x4xbf16>
    %c1_37 = arith.constant 1 : index
    %c0_38 = arith.constant 0 : index
    %c0_39 = arith.constant 0 : index
    %c0_40 = arith.constant 0 : index
    %c0_41 = arith.constant 0 : index
    %45 = vector.load %arg3[%c1_37, %c0_38, %c0_39, %c0_40, %c0_41] : memref<4x2x2x4x8xbf16, #tpu.memory_space<vmem>>, vector<1x1x1x4x8xbf16>
    %46 = vector.shape_cast %45 : vector<1x1x1x4x8xbf16> to vector<4x8xbf16>
    %cst_42 = arith.constant dense<0.000000e+00> : vector<128x8xf32>
    %47 = tpu.matmul %44, %46, %cst_42 {dimension_numbers = #tpu.dot_dimension_numbers<[1], [0], [0], [1], [0, 0, 1, 1], [], []>} : vector<128x4xbf16>, vector<4x8xbf16>, vector<128x8xf32> -> vector<128x8xf32>
    %48 = arith.addf %42, %47 : vector<128x8xf32>
    %49 = vector.extract_strided_slice %4 {offsets = [0, 2, 0], sizes = [8, 16, 4], strides = [1, 1, 1]} : vector<10x18x4xbf16> to vector<8x16x4xbf16>
    %50 = vector.shape_cast %49 : vector<8x16x4xbf16> to vector<128x4xbf16>
    %c1_43 = arith.constant 1 : index
    %c0_44 = arith.constant 0 : index
    %c1_45 = arith.constant 1 : index
    %c0_46 = arith.constant 0 : index
    %c0_47 = arith.constant 0 : index
    %51 = vector.load %arg3[%c1_43, %c0_44, %c1_45, %c0_46, %c0_47] : memref<4x2x2x4x8xbf16, #tpu.memory_space<vmem>>, vector<1x1x1x4x8xbf16>
    %52 = vector.shape_cast %51 : vector<1x1x1x4x8xbf16> to vector<4x8xbf16>
    %cst_48 = arith.constant dense<0.000000e+00> : vector<128x8xf32>
    %53 = tpu.matmul %50, %52, %cst_48 {dimension_numbers = #tpu.dot_dimension_numbers<[1], [0], [0], [1], [0, 0, 1, 1], [], []>} : vector<128x4xbf16>, vector<4x8xbf16>, vector<128x8xf32> -> vector<128x8xf32>
    %54 = arith.addf %48, %53 : vector<128x8xf32>
    %55 = vector.extract_strided_slice %4 {offsets = [1, 1, 0], sizes = [8, 16, 4], strides = [1, 1, 1]} : vector<10x18x4xbf16> to vector<8x16x4xbf16>
    %56 = vector.shape_cast %55 : vector<8x16x4xbf16> to vector<128x4xbf16>
    %c1_49 = arith.constant 1 : index
    %c1_50 = arith.constant 1 : index
    %c0_51 = arith.constant 0 : index
    %c0_52 = arith.constant 0 : index
    %c0_53 = arith.constant 0 : index
    %57 = vector.load %arg3[%c1_49, %c1_50, %c0_51, %c0_52, %c0_53] : memref<4x2x2x4x8xbf16, #tpu.memory_space<vmem>>, vector<1x1x1x4x8xbf16>
    %58 = vector.shape_cast %57 : vector<1x1x1x4x8xbf16> to vector<4x8xbf16>
    %cst_54 = arith.constant dense<0.000000e+00> : vector<128x8xf32>
    %59 = tpu.matmul %56, %58, %cst_54 {dimension_numbers = #tpu.dot_dimension_numbers<[1], [0], [0], [1], [0, 0, 1, 1], [], []>} : vector<128x4xbf16>, vector<4x8xbf16>, vector<128x8xf32> -> vector<128x8xf32>
    %60 = arith.addf %54, %59 : vector<128x8xf32>
    %61 = vector.extract_strided_slice %4 {offsets = [1, 2, 0], sizes = [8, 16, 4], strides = [1, 1, 1]} : vector<10x18x4xbf16> to vector<8x16x4xbf16>
    %62 = vector.shape_cast %61 : vector<8x16x4xbf16> to vector<128x4xbf16>
    %c1_55 = arith.constant 1 : index
    %c1_56 = arith.constant 1 : index
    %c1_57 = arith.constant 1 : index
    %c0_58 = arith.constant 0 : index
    %c0_59 = arith.constant 0 : index
    %63 = vector.load %arg3[%c1_55, %c1_56, %c1_57, %c0_58, %c0_59] : memref<4x2x2x4x8xbf16, #tpu.memory_space<vmem>>, vector<1x1x1x4x8xbf16>
    %64 = vector.shape_cast %63 : vector<1x1x1x4x8xbf16> to vector<4x8xbf16>
    %cst_60 = arith.constant dense<0.000000e+00> : vector<128x8xf32>
    %65 = tpu.matmul %62, %64, %cst_60 {dimension_numbers = #tpu.dot_dimension_numbers<[1], [0], [0], [1], [0, 0, 1, 1], [], []>} : vector<128x4xbf16>, vector<4x8xbf16>, vector<128x8xf32> -> vector<128x8xf32>
    %66 = arith.addf %60, %65 : vector<128x8xf32>
    %67 = vector.broadcast %5 : vector<1x8xf32> to vector<128x8xf32>
    %68 = arith.mulf %66, %67 : vector<128x8xf32>
    %69 = vector.broadcast %6 : vector<1x8xf32> to vector<128x8xf32>
    %70 = arith.addf %68, %69 : vector<128x8xf32>
    %cst_61 = arith.constant 0.000000e+00 : f32
    %71 = vector.broadcast %cst_61 : f32 to vector<128x8xf32>
    %72 = arith.maximumf %70, %71 : vector<128x8xf32>
    %73 = vector.shape_cast %72 : vector<128x8xf32> to vector<8x16x8xf32>
    %c0_62 = arith.constant 0 : index
    %c0_63 = arith.constant 0 : index
    %c0_64 = arith.constant 0 : index
    %c0_65 = arith.constant 0 : index
    %c1_66 = arith.constant 1 : index
    %c0_67 = arith.constant 0 : index
    %74 = vector.load %arg6[%c0_62, %c0_63, %c0_64, %c0_65, %c1_66, %c0_67] : memref<1x8x2x16x2x8xf32, #tpu.memory_space<vmem>>, vector<1x8x1x16x1x8xf32>
    %75 = vector.shape_cast %74 : vector<1x8x1x16x1x8xf32> to vector<8x16x8xf32>
    %76 = vector.shape_cast %73 : vector<8x16x8xf32> to vector<1x8x1x16x1x8xf32>
    tpu.vector_store %arg6[%c0_62, %c0_63, %c0_64, %c0_65, %c1_66, %c0_67], %76 {strides = array<i32>} : memref<1x8x2x16x2x8xf32, #tpu.memory_space<vmem>>, vector<1x8x1x16x1x8xf32>,
    %cst_68 = arith.constant 0.000000e+00 : f32
    %77 = vector.broadcast %cst_68 : f32 to vector<128x8xf32>
    %78 = vector.extract_strided_slice %4 {offsets = [1, 0, 0], sizes = [8, 16, 4], strides = [1, 1, 1]} : vector<10x18x4xbf16> to vector<8x16x4xbf16>
    %79 = vector.shape_cast %78 : vector<8x16x4xbf16> to vector<128x4xbf16>
    %c2 = arith.constant 2 : index
    %c0_69 = arith.constant 0 : index
    %c0_70 = arith.constant 0 : index
    %c0_71 = arith.constant 0 : index
    %c0_72 = arith.constant 0 : index
    %80 = vector.load %arg3[%c2, %c0_69, %c0_70, %c0_71, %c0_72] : memref<4x2x2x4x8xbf16, #tpu.memory_space<vmem>>, vector<1x1x1x4x8xbf16>
    %81 = vector.shape_cast %80 : vector<1x1x1x4x8xbf16> to vector<4x8xbf16>
    %cst_73 = arith.constant dense<0.000000e+00> : vector<128x8xf32>
    %82 = tpu.matmul %79, %81, %cst_73 {dimension_numbers = #tpu.dot_dimension_numbers<[1], [0], [0], [1], [0, 0, 1, 1], [], []>} : vector<128x4xbf16>, vector<4x8xbf16>, vector<128x8xf32> -> vector<128x8xf32>
    %83 = arith.addf %77, %82 : vector<128x8xf32>
    %84 = vector.extract_strided_slice %4 {offsets = [1, 1, 0], sizes = [8, 16, 4], strides = [1, 1, 1]} : vector<10x18x4xbf16> to vector<8x16x4xbf16>
    %85 = vector.shape_cast %84 : vector<8x16x4xbf16> to vector<128x4xbf16>
    %c2_74 = arith.constant 2 : index
    %c0_75 = arith.constant 0 : index
    %c1_76 = arith.constant 1 : index
    %c0_77 = arith.constant 0 : index
    %c0_78 = arith.constant 0 : index
    %86 = vector.load %arg3[%c2_74, %c0_75, %c1_76, %c0_77, %c0_78] : memref<4x2x2x4x8xbf16, #tpu.memory_space<vmem>>, vector<1x1x1x4x8xbf16>
    %87 = vector.shape_cast %86 : vector<1x1x1x4x8xbf16> to vector<4x8xbf16>
    %cst_79 = arith.constant dense<0.000000e+00> : vector<128x8xf32>
    %88 = tpu.matmul %85, %87, %cst_79 {dimension_numbers = #tpu.dot_dimension_numbers<[1], [0], [0], [1], [0, 0, 1, 1], [], []>} : vector<128x4xbf16>, vector<4x8xbf16>, vector<128x8xf32> -> vector<128x8xf32>
    %89 = arith.addf %83, %88 : vector<128x8xf32>
    %90 = vector.extract_strided_slice %4 {offsets = [2, 0, 0], sizes = [8, 16, 4], strides = [1, 1, 1]} : vector<10x18x4xbf16> to vector<8x16x4xbf16>
    %91 = vector.shape_cast %90 : vector<8x16x4xbf16> to vector<128x4xbf16>
    %c2_80 = arith.constant 2 : index
    %c1_81 = arith.constant 1 : index
    %c0_82 = arith.constant 0 : index
    %c0_83 = arith.constant 0 : index
    %c0_84 = arith.constant 0 : index
    %92 = vector.load %arg3[%c2_80, %c1_81, %c0_82, %c0_83, %c0_84] : memref<4x2x2x4x8xbf16, #tpu.memory_space<vmem>>, vector<1x1x1x4x8xbf16>
    %93 = vector.shape_cast %92 : vector<1x1x1x4x8xbf16> to vector<4x8xbf16>
    %cst_85 = arith.constant dense<0.000000e+00> : vector<128x8xf32>
    %94 = tpu.matmul %91, %93, %cst_85 {dimension_numbers = #tpu.dot_dimension_numbers<[1], [0], [0], [1], [0, 0, 1, 1], [], []>} : vector<128x4xbf16>, vector<4x8xbf16>, vector<128x8xf32> -> vector<128x8xf32>
    %95 = arith.addf %89, %94 : vector<128x8xf32>
    %96 = vector.extract_strided_slice %4 {offsets = [2, 1, 0], sizes = [8, 16, 4], strides = [1, 1, 1]} : vector<10x18x4xbf16> to vector<8x16x4xbf16>
    %97 = vector.shape_cast %96 : vector<8x16x4xbf16> to vector<128x4xbf16>
    %c2_86 = arith.constant 2 : index
    %c1_87 = arith.constant 1 : index
    %c1_88 = arith.constant 1 : index
    %c0_89 = arith.constant 0 : index
    %c0_90 = arith.constant 0 : index
    %98 = vector.load %arg3[%c2_86, %c1_87, %c1_88, %c0_89, %c0_90] : memref<4x2x2x4x8xbf16, #tpu.memory_space<vmem>>, vector<1x1x1x4x8xbf16>
    %99 = vector.shape_cast %98 : vector<1x1x1x4x8xbf16> to vector<4x8xbf16>
    %cst_91 = arith.constant dense<0.000000e+00> : vector<128x8xf32>
    %100 = tpu.matmul %97, %99, %cst_91 {dimension_numbers = #tpu.dot_dimension_numbers<[1], [0], [0], [1], [0, 0, 1, 1], [], []>} : vector<128x4xbf16>, vector<4x8xbf16>, vector<128x8xf32> -> vector<128x8xf32>
    %101 = arith.addf %95, %100 : vector<128x8xf32>
    %102 = vector.broadcast %5 : vector<1x8xf32> to vector<128x8xf32>
    %103 = arith.mulf %101, %102 : vector<128x8xf32>
    %104 = vector.broadcast %6 : vector<1x8xf32> to vector<128x8xf32>
    %105 = arith.addf %103, %104 : vector<128x8xf32>
    %cst_92 = arith.constant 0.000000e+00 : f32
    %106 = vector.broadcast %cst_92 : f32 to vector<128x8xf32>
    %107 = arith.maximumf %105, %106 : vector<128x8xf32>
    %108 = vector.shape_cast %107 : vector<128x8xf32> to vector<8x16x8xf32>
    %c0_93 = arith.constant 0 : index
    %c0_94 = arith.constant 0 : index
    %c1_95 = arith.constant 1 : index
    %c0_96 = arith.constant 0 : index
    %c0_97 = arith.constant 0 : index
    %c0_98 = arith.constant 0 : index
    %109 = vector.load %arg6[%c0_93, %c0_94, %c1_95, %c0_96, %c0_97, %c0_98] : memref<1x8x2x16x2x8xf32, #tpu.memory_space<vmem>>, vector<1x8x1x16x1x8xf32>
    %110 = vector.shape_cast %109 : vector<1x8x1x16x1x8xf32> to vector<8x16x8xf32>
    %111 = vector.shape_cast %108 : vector<8x16x8xf32> to vector<1x8x1x16x1x8xf32>
    tpu.vector_store %arg6[%c0_93, %c0_94, %c1_95, %c0_96, %c0_97, %c0_98], %111 {strides = array<i32>} : memref<1x8x2x16x2x8xf32, #tpu.memory_space<vmem>>, vector<1x8x1x16x1x8xf32>,
    %cst_99 = arith.constant 0.000000e+00 : f32
    %112 = vector.broadcast %cst_99 : f32 to vector<128x8xf32>
    %113 = vector.extract_strided_slice %4 {offsets = [1, 1, 0], sizes = [8, 16, 4], strides = [1, 1, 1]} : vector<10x18x4xbf16> to vector<8x16x4xbf16>
    %114 = vector.shape_cast %113 : vector<8x16x4xbf16> to vector<128x4xbf16>
    %c3 = arith.constant 3 : index
    %c0_100 = arith.constant 0 : index
    %c0_101 = arith.constant 0 : index
    %c0_102 = arith.constant 0 : index
    %c0_103 = arith.constant 0 : index
    %115 = vector.load %arg3[%c3, %c0_100, %c0_101, %c0_102, %c0_103] : memref<4x2x2x4x8xbf16, #tpu.memory_space<vmem>>, vector<1x1x1x4x8xbf16>
    %116 = vector.shape_cast %115 : vector<1x1x1x4x8xbf16> to vector<4x8xbf16>
    %cst_104 = arith.constant dense<0.000000e+00> : vector<128x8xf32>
    %117 = tpu.matmul %114, %116, %cst_104 {dimension_numbers = #tpu.dot_dimension_numbers<[1], [0], [0], [1], [0, 0, 1, 1], [], []>} : vector<128x4xbf16>, vector<4x8xbf16>, vector<128x8xf32> -> vector<128x8xf32>
    %118 = arith.addf %112, %117 : vector<128x8xf32>
    %119 = vector.extract_strided_slice %4 {offsets = [1, 2, 0], sizes = [8, 16, 4], strides = [1, 1, 1]} : vector<10x18x4xbf16> to vector<8x16x4xbf16>
    %120 = vector.shape_cast %119 : vector<8x16x4xbf16> to vector<128x4xbf16>
    %c3_105 = arith.constant 3 : index
    %c0_106 = arith.constant 0 : index
    %c1_107 = arith.constant 1 : index
    %c0_108 = arith.constant 0 : index
    %c0_109 = arith.constant 0 : index
    %121 = vector.load %arg3[%c3_105, %c0_106, %c1_107, %c0_108, %c0_109] : memref<4x2x2x4x8xbf16, #tpu.memory_space<vmem>>, vector<1x1x1x4x8xbf16>
    %122 = vector.shape_cast %121 : vector<1x1x1x4x8xbf16> to vector<4x8xbf16>
    %cst_110 = arith.constant dense<0.000000e+00> : vector<128x8xf32>
    %123 = tpu.matmul %120, %122, %cst_110 {dimension_numbers = #tpu.dot_dimension_numbers<[1], [0], [0], [1], [0, 0, 1, 1], [], []>} : vector<128x4xbf16>, vector<4x8xbf16>, vector<128x8xf32> -> vector<128x8xf32>
    %124 = arith.addf %118, %123 : vector<128x8xf32>
    %125 = vector.extract_strided_slice %4 {offsets = [2, 1, 0], sizes = [8, 16, 4], strides = [1, 1, 1]} : vector<10x18x4xbf16> to vector<8x16x4xbf16>
    %126 = vector.shape_cast %125 : vector<8x16x4xbf16> to vector<128x4xbf16>
    %c3_111 = arith.constant 3 : index
    %c1_112 = arith.constant 1 : index
    %c0_113 = arith.constant 0 : index
    %c0_114 = arith.constant 0 : index
    %c0_115 = arith.constant 0 : index
    %127 = vector.load %arg3[%c3_111, %c1_112, %c0_113, %c0_114, %c0_115] : memref<4x2x2x4x8xbf16, #tpu.memory_space<vmem>>, vector<1x1x1x4x8xbf16>
    %128 = vector.shape_cast %127 : vector<1x1x1x4x8xbf16> to vector<4x8xbf16>
    %cst_116 = arith.constant dense<0.000000e+00> : vector<128x8xf32>
    %129 = tpu.matmul %126, %128, %cst_116 {dimension_numbers = #tpu.dot_dimension_numbers<[1], [0], [0], [1], [0, 0, 1, 1], [], []>} : vector<128x4xbf16>, vector<4x8xbf16>, vector<128x8xf32> -> vector<128x8xf32>
    %130 = arith.addf %124, %129 : vector<128x8xf32>
    %131 = vector.extract_strided_slice %4 {offsets = [2, 2, 0], sizes = [8, 16, 4], strides = [1, 1, 1]} : vector<10x18x4xbf16> to vector<8x16x4xbf16>
    %132 = vector.shape_cast %131 : vector<8x16x4xbf16> to vector<128x4xbf16>
    %c3_117 = arith.constant 3 : index
    %c1_118 = arith.constant 1 : index
    %c1_119 = arith.constant 1 : index
    %c0_120 = arith.constant 0 : index
    %c0_121 = arith.constant 0 : index
    %133 = vector.load %arg3[%c3_117, %c1_118, %c1_119, %c0_120, %c0_121] : memref<4x2x2x4x8xbf16, #tpu.memory_space<vmem>>, vector<1x1x1x4x8xbf16>
    %134 = vector.shape_cast %133 : vector<1x1x1x4x8xbf16> to vector<4x8xbf16>
    %cst_122 = arith.constant dense<0.000000e+00> : vector<128x8xf32>
    %135 = tpu.matmul %132, %134, %cst_122 {dimension_numbers = #tpu.dot_dimension_numbers<[1], [0], [0], [1], [0, 0, 1, 1], [], []>} : vector<128x4xbf16>, vector<4x8xbf16>, vector<128x8xf32> -> vector<128x8xf32>
    %136 = arith.addf %130, %135 : vector<128x8xf32>
    %137 = vector.broadcast %5 : vector<1x8xf32> to vector<128x8xf32>
    %138 = arith.mulf %136, %137 : vector<128x8xf32>
    %139 = vector.broadcast %6 : vector<1x8xf32> to vector<128x8xf32>
    %140 = arith.addf %138, %139 : vector<128x8xf32>
    %cst_123 = arith.constant 0.000000e+00 : f32
    %141 = vector.broadcast %cst_123 : f32 to vector<128x8xf32>
    %142 = arith.maximumf %140, %141 : vector<128x8xf32>
    %143 = vector.shape_cast %142 : vector<128x8xf32> to vector<8x16x8xf32>
    %c0_124 = arith.constant 0 : index
    %c0_125 = arith.constant 0 : index
    %c1_126 = arith.constant 1 : index
    %c0_127 = arith.constant 0 : index
    %c1_128 = arith.constant 1 : index
    %c0_129 = arith.constant 0 : index
    %144 = vector.load %arg6[%c0_124, %c0_125, %c1_126, %c0_127, %c1_128, %c0_129] : memref<1x8x2x16x2x8xf32, #tpu.memory_space<vmem>>, vector<1x8x1x16x1x8xf32>
    %145 = vector.shape_cast %144 : vector<1x8x1x16x1x8xf32> to vector<8x16x8xf32>
    %146 = vector.shape_cast %143 : vector<8x16x8xf32> to vector<1x8x1x16x1x8xf32>
    tpu.vector_store %arg6[%c0_124, %c0_125, %c1_126, %c0_127, %c1_128, %c0_129], %146 {strides = array<i32>} : memref<1x8x2x16x2x8xf32, #tpu.memory_space<vmem>>, vector<1x8x1x16x1x8xf32>,
    return
  }
  func.func @transform_0(%arg0: i32, %arg1: i32) -> (i32, i32, i32, i32) {
    %c0_i32 = arith.constant 0 : i32
    %c0_i32_0 = arith.constant 0 : i32
    %c0_i32_1 = arith.constant 0 : i32
    %c0_i32_2 = arith.constant 0 : i32
    return %arg0, %c0_i32, %c0_i32_0, %c0_i32_1 : i32, i32, i32, i32
  }
  func.func @transform_1(%arg0: i32, %arg1: i32) -> (i32, i32, i32, i32, i32) {
    %c0_i32 = arith.constant 0 : i32
    %c0_i32_0 = arith.constant 0 : i32
    %c0_i32_1 = arith.constant 0 : i32
    %c0_i32_2 = arith.constant 0 : i32
    %c0_i32_3 = arith.constant 0 : i32
    %c0_i32_4 = arith.constant 0 : i32
    return %c0_i32, %c0_i32_0, %c0_i32_1, %c0_i32_2, %c0_i32_3 : i32, i32, i32, i32, i32
  }
  func.func @transform_2(%arg0: i32, %arg1: i32) -> (i32, i32) {
    %c0_i32 = arith.constant 0 : i32
    %c0_i32_0 = arith.constant 0 : i32
    %c0_i32_1 = arith.constant 0 : i32
    return %c0_i32, %c0_i32_0 : i32, i32
  }
  func.func @transform_3(%arg0: i32, %arg1: i32) -> (i32, i32) {
    %c0_i32 = arith.constant 0 : i32
    %c0_i32_0 = arith.constant 0 : i32
    %c0_i32_1 = arith.constant 0 : i32
    return %c0_i32, %c0_i32_0 : i32, i32
  }
  func.func @transform_4(%arg0: i32, %arg1: i32) -> (i32, i32, i32, i32, i32, i32) {
    %c0_i32 = arith.constant 0 : i32
    %c0_i32_0 = arith.constant 0 : i32
    %c0_i32_1 = arith.constant 0 : i32
    %c0_i32_2 = arith.constant 0 : i32
    %c0_i32_3 = arith.constant 0 : i32
    return %arg0, %arg1, %c0_i32, %c0_i32_0, %c0_i32_1, %c0_i32_2 : i32, i32, i32, i32, i32, i32
  }
}

</mosaic_0001>

<bundles_post_ra>
// kernel: tpu_custom_call.1
= control target key start
LH: loop header
LB: loop body
LE: loop exit
PB: predicated region body
PF: predicated region fallthrough
CT: control target
= control target key end

     0   :  { %s1790_s15 = smov 0   ;;  %s1792_s16 = smov 0   ;;  %s2548_s0 = inlined_call_operand.vmem [shape: bf16[2,18,18,4], index: 0, kind: input, shape index: {}]   ;;  %s2549_s1 = inlined_call_operand.vmem [shape: bf16[36,32], index: 1, kind: input, shape index: {}]   ;;  %s2550_s2 = inlined_call_operand.vmem [shape: f32[1,8], index: 2, kind: input, shape index: {}]   ;;  %s2551_s3 = inlined_call_operand.vmem [shape: f32[1,8], index: 3, kind: input, shape index: {}]   ;;  %s2552_s4 = inlined_call_operand.vmem [shape: f32[2,16,2,32,8], index: 4, kind: output, shape index: {}]  }
   0x1   :  { %s1794_s17 = smov 0   ;;  %s1796_s18 = smov 0  }
   0x2   :  { %s1798_s19 = smov 0  }
   0x3 LB: > { %s23_s20 = sadd.s32 1, %s1744_s17  ;;  %s26_s21 = sadd.s32 1, %s1748_s18  ;;  %s1752_s19 = sphi %s1798_s19, %s14_s19   ;;  %s1748_s18 = sphi %s1796_s18, %s2556_s18   ;;  %s1744_s17 = sphi %s1794_s17, %s2555_s17   ;;  %s1740_s16 = sphi %s1792_s16, %s2554_s16   ;;  %s1736_s15 = sphi %s1790_s15, %s2553_s15  }
   0x4   : > { %p24_p0 = scmp.ge.s32.totalorder %s23_s20, 2  ;;  %p1508_p1 = scmp.ge.s32.totalorder %s1752_s19, 1 }
   0x5   : > { %p176_p2 = scmp.lt.s32.totalorder %s1752_s19, 5 }
   0x6   : > { %s2558_s20 = smov (%p24_p0, %s23_s20), 0  ;;  %s2560_s21 = smov (!%p24_p0, %s26_s21), %s1748_s18 }
   0x7   : > { %p177_p3 = pnand %p1508_p1, %p176_p2  ;;  %p28_p4 = scmp.ge.s32.totalorder %s2560_s21, 2 }
   0x8   : > { %p207_p5 = scmp.lt.s32.totalorder (!%p177_p3), %s1740_s16, 1  ;;  %s1638_s22 = smul.u32 (!%p177_p3), 96, %s1736_s15 }
   0x9   : > { %s2562_s21 = smov (%p28_p4, %s2560_s21), 0  ;;  %180 = sbr.rel (%p177_p3) target bundleno = 649 (0x289), region = 36 }
   0xa   : > { %s1754_s28 = smov (!%p177_p3), 8   ;;  %s1755_s29 = smov (!%p177_p3), 4  }
   0xb   : > { %s1756_s30 = smov (!%p177_p3), 12   ;;  %s1757_s5 = smov (!%p177_p3), 16  }
   0xc   : > { %s1758_s6 = smov (!%p177_p3), 20   ;;  %s1759_s7 = smov (!%p177_p3), 24  }
   0xd   : > { %s1760_s8 = smov (!%p177_p3), 28   ;;  %s1761_s9 = smov (!%p177_p3), 32  }
   0xe   : > { %s2564_s16 = smov (!%p207_p5, %s1740_s16), 1  ;;  %vm324_vm0 = vsmask.f32 7424  ;;  %vm437_vm1 = vcmask 1046528   ;;  %vm620_vm2 = vcmask 31744   ;;  %vm637_vm3 = vcmask 64512  }
   0xf   : > { %s1660_s23 = smul.u32 216, %s2564_s16  ;;  %vm654_vm4 = vcmask 97280   ;;  %vm671_vm5 = vcmask 130048   ;;  %vm793_vm6 = vcmask 1041408   ;;  %vm688_vm7 = vcmask 162816  }
  0x10   : > { %vm705_vm8 = vcmask 195584   ;;  %vm722_vm9 = vcmask 228352   ;;  %vm739_vm10 = vcmask 261120   ;;  %vm776_vm11 = vcmask 293888  }
  0x11   : > { %s211_s26 = scalar_lea.vmem %s2548_s0, %s1660_s23 }
  0x12   : > { %s1829_s27 = scalar_lea.vmem %s211_s26, %s1638_s22 }
  0x13   : > { %v1832_v0 = vld [vmem:[%s1829_s27] sm:$0xff]  ;;  %v230_v1 = vld [vmem:[%s1829_s27 + $0x8] sm:$0x1]  ;;  %v1836_v2 = vld [vmem:[%s1829_s27 + $0x18] sm:$0xff] }
  0x14   : > { %v308_v3 = vunpack.c.l.b16 %v230_v1  ;;  %v236_v4 = vld [vmem:[%s1829_s27 + $0x20] sm:$0x1]  ;;  %v1840_v5 = vld [vmem:[%s1829_s27 + $0x30] sm:$0xff]  ;;  %v242_v6 = vld [vmem:[%s1829_s27 + $0x38] sm:$0x1]  ;;  %v438_v7 = vrot.slane %v1832_v0, 1 }
  0x15   : > { %v310_v8 = vunpack.c.l.b16 %v236_v4  ;;  %v350_v9 = vshrl.u32 %v1836_v2, 16  ;;  %v352_v10 = vshll.u32 %v1836_v2, 16  ;;  %v326_v12 = vshrl.u32 %v1832_v0, 16  ;;  %v239_v15 = vld [vmem:[%s1829_s27 + $0x2c] sm:$0x1]  ;;  %v1856_v24 = vld [vmem:[%s1829_s27 + $0x24] sm:$0xff] }
  0x16   : > { %v316_v11 = vpack.c.b16 %v308_v3, %v308_v3  ;;  %v328_v13 = vshll.u32 %v1832_v0, 16  ;;  %v312_v14 = vunpack.c.l.b16 %v242_v6  ;;  %v374_v18 = vshrl.u32 %v1840_v5, 16  ;;  %v1860_v29 = vld [vmem:[%s1829_s27 + $0xc] sm:$0xff]  ;;  %v233_v30 = vld [vmem:[%s1829_s27 + $0x14] sm:$0x1]  ;;  %v1870_v39 = vld [vmem:[%s1829_s27 + $0x3c] sm:$0xff] }
  0x17   : > { %v1849_v16 = vpack.c.b16 %v310_v8, %v310_v8  ;;  %v354_v17 = vrot.slane %v352_v10, 1  ;;  %v376_v19 = vshll.u32 %v1840_v5, 16  ;;  %v311_v28 = vunpack.c.l.b16 %v239_v15  ;;  %v245_v40 = vld [vmem:[%s1829_s27 + $0x44] sm:$0x1]  ;;  %v1883_v49 = vld [vmem:[%s1829_s27 + $0x54] sm:$0xff]  ;;  %v1894_v63 = vld [vmem:[%s1829_s27 + $0x48] sm:$0xff] }
  0x18   : > { %v439_v20 = vrot.slane %v316_v11, 1  ;;  %v330_v21 = vrot.slane %v328_v13, 1  ;;  %v333_v22 = vshll.u32 %v316_v11, 16  ;;  %v1853_v23 = vpack.c.b16 %v312_v14, %v312_v14  ;;  %v251_v50 = vld [vmem:[%s1829_s27 + $0x5c] sm:$0x1] }
  0x19   : > { %v355_v25 = vor.u32 %v354_v17, %v350_v9  ;;  %v357_v26 = vshll.u32 %v1849_v16, 16  ;;  %v378_v27 = vrot.slane %v376_v19, 1  ;;  %v1866_v37 = vpack.c.b16 %v311_v28, %v311_v28  ;;  %v248_v1 = vld [vmem:[%s1829_s27 + $0x50] sm:$0x1] }
  0x1a   : > { %v440_v31 = vsel %vm437_vm1, %v438_v7, %v439_v20  ;;  %v331_v32 = vor.u32 %v330_v21, %v326_v12  ;;  %v335_v33 = vrot.slane %v333_v22, 1  ;;  %v381_v34 = vshll.u32 %v1853_v23, 16 }
  0x1b   : > { %462 = vrot.lane.b32.xlu2 %v440_v31, %s1754_s28  ;;  %v359_v35 = vrot.slane %v357_v26, 1  ;;  %v379_v36 = vor.u32 %v378_v27, %v374_v18  ;;  %v362_v38 = vshrl.u32 %v1856_v24, 16  ;;  %v364_v43 = vshll.u32 %v1856_v24, 16 }
  0x1c   : > { %v336_v41 = vsel %vm324_vm0, %v331_v32, %v335_v33  ;;  %v383_v42 = vrot.slane %v381_v34, 1  ;;  %v309_v44 = vunpack.c.l.b16 %v233_v30  ;;  %v369_v46 = vshll.u32 %v1866_v37, 16 }
  0x1d   : > { %v1876_v45 = vsel %vm324_vm0, %v355_v25, %v359_v35  ;;  %421 = vrot.lane.b32.xlu0 %v336_v41, %s1755_s29  ;;  %v338_v47 = vshrl.u32 %v1860_v29, 16  ;;  %v340_v48 = vshll.u32 %v1860_v29, 16  ;;  %v366_v52 = vrot.slane %v364_v43, 1 }
  0x1e   : > { %425 = vrot.lane.b32.xlu1 %v1876_v45, %s1755_s29  ;;  %v1889_v51 = vsel %vm324_vm0, %v379_v36, %v383_v42  ;;  %v317_v53 = vpack.c.b16 %v309_v44, %v309_v44  ;;  %v313_v54 = vunpack.c.l.b16 %v245_v40  ;;  %v371_v55 = vrot.slane %v369_v46, 1 }
  0x1f   : > { %v342_v56 = vrot.slane %v340_v48, 1  ;;  %v386_v57 = vshrl.u32 %v1870_v39, 16  ;;  %v388_v58 = vshll.u32 %v1870_v39, 16  ;;  %v367_v59 = vor.u32 %v366_v52, %v362_v38 }
  0x20   : > { %v345_v60 = vshll.u32 %v317_v53, 16  ;;  %v321_v61 = vpack.c.b16 %v313_v54, %v313_v54  ;;  %v315_v62 = vunpack.c.l.b16 %v251_v50  ;;  %v410_v6 = vshrl.u32 %v1883_v49, 16 }
  0x21   : > { %v343_v3 = vor.u32 %v342_v56, %v338_v47  ;;  %v390_v4 = vrot.slane %v388_v58, 1  ;;  %v412_v7 = vshll.u32 %v1883_v49, 16  ;;  %v1900_v8 = vsel %vm324_vm0, %v367_v59, %v371_v55  ;;  %v254_v58 = vld [vmem:[%s1829_s27 + $0x68] sm:$0x1] }
  0x22   : > { %v347_v9 = vrot.slane %v345_v60, 1  ;;  %v393_v10 = vshll.u32 %v321_v61, 16  ;;  %v323_v11 = vpack.c.b16 %v315_v62, %v315_v62  ;;  %v314_v14 = vunpack.c.l.b16 %v248_v1 }
  0x23   : > { %429 = vrot.lane.b32.xlu2 %v1889_v51, %s1755_s29  ;;  %v391_v12 = vor.u32 %v390_v4, %v386_v57  ;;  %v414_v13 = vrot.slane %v412_v7, 1  ;;  %v398_v15 = vshrl.u32 %v1894_v63, 16  ;;  %v400_v20 = vshll.u32 %v1894_v63, 16  ;;  %v1647_v57 = vld [vmem:[%s1829_s27 + $0x60] sm:$0xff] }
  0x24   : > { %v348_v17 = vsel %vm324_vm0, %v343_v3, %v347_v9  ;;  %v395_v18 = vrot.slane %v393_v10, 1  ;;  %v417_v19 = vshll.u32 %v323_v11, 16  ;;  %v322_v21 = vpack.c.b16 %v314_v14, %v314_v14 }
  0x25   : > { %423 = vrot.lane.b32.xlu0 %v348_v17, %s1755_s29  ;;  %v402_v22 = vrot.slane %v400_v20, 1  ;;  %v415_v25 = vor.u32 %v414_v13, %v410_v6  ;;  %v447_v34 = vrot.slane %v1856_v24, 1  ;;  %v448_v35 = vrot.slane %v1866_v37, 1 }
  0x26   : > { %427 = vrot.lane.b32.xlu1 %v1900_v8, %s1755_s29  ;;  %v419_v26 = vrot.slane %v417_v19, 1  ;;  %v405_v27 = vshll.u32 %v322_v21, 16  ;;  %v1911_v28 = vsel %vm324_vm0, %v391_v12, %v395_v18  ;;  %v441_v36 = vrot.slane %v1860_v29, 1 }
  0x27   : > { %v403_v30 = vor.u32 %v402_v22, %v398_v15  ;;  %v442_v38 = vrot.slane %v317_v53, 1  ;;  %v444_v40 = vrot.slane %v1836_v2, 1  ;;  %v445_v41 = vrot.slane %v1849_v16, 1 }
  0x28   : > { %v407_v31 = vrot.slane %v405_v27, 1  ;;  %v1916_v32 = vsel %vm324_vm0, %v415_v25, %v419_v26  ;;  %v1931_v42 = vsel %vm437_vm1, %v447_v34, %v448_v35  ;;  %v456_v44 = vrot.slane %v1894_v63, 1  ;;  %v257_v26 = vld [vmem:[%s1829_s27 + $0x74] sm:$0x1] }
  0x29   : > { %v443_v43 = vsel %vm437_vm1, %v441_v36, %v442_v38  ;;  %v1937_v37 = vsel %vm437_vm1, %v444_v40, %v445_v41  ;;  %v457_v46 = vrot.slane %v322_v21, 1  ;;  %v450_v16 = vrot.slane %v1840_v5, 1 }
  0x2a   : > { %v1919_v33 = vsel %vm324_vm0, %v403_v30, %v407_v31  ;;  %v451_v47 = vrot.slane %v1853_v23, 1  ;;  %v453_v48 = vrot.slane %v1870_v39, 1  ;;  %v454_v50 = vrot.slane %v321_v61, 1  ;;  %v1648_v31 = vld [vmem:[%s1829_s27 + $0x6c] sm:$0xff]  ;;  %s1510_s27 = sshll.u32 %s1736_s15, 3 }
  0x2b   : > { %431 = vrot.lane.b32.xlu2 %v1911_v28, %s1755_s29  ;;  %v1947_v52 = vsel %vm437_vm1, %v456_v44, %v457_v46  ;;  %v459_v23 = vrot.slane %v1883_v49, 1  ;;  %v460_v55 = vrot.slane %v323_v11, 1  ;;  %v500_v59 = vunpack.c.l.b16 %v254_v58  ;;  %p215_p6 = scmp.lt.s32.totalorder %s1510_s27, 15 }
  0x2c   : > { %v1950_v53 = vsel %vm437_vm1, %v450_v16, %v451_v47  ;;  %v1955_v54 = vsel %vm437_vm1, %v453_v48, %v454_v50  ;;  %v505_v61 = vshll.u32 %v1647_v57, 16  ;;  %v503_v62 = vshrl.u32 %v1647_v57, 16 }
  0x2d   : > { %433 = vrot.lane.b32.xlu0 %v1919_v33, %s1755_s29  ;;  %v1963_v56 = vsel %vm437_vm1, %v459_v23, %v460_v55  ;;  %v501_v60 = vpack.c.b16 %v500_v59, %v500_v59  ;;  %v530_v12 = vrot.slane %v1647_v57, 1  ;;  %v571_v30 = vunpack.c.l.b16 %v257_v26  ;;  %v1650_v26 = vld [vmem:[%s2549_s1 + $0x8] sm:$0xff]  ;;  %s2566_s27 = smov (!%p215_p6, %s1510_s27), 15 }
  0x2e   : > { %435 = vrot.lane.b32.xlu1 %v1916_v32, %s1755_s29  ;;  %v507_v1 = vrot.slane %v505_v61, 1  ;;  %v576_v34 = vshll.u32 %v1648_v31, 16  ;;  %v574_v40 = vshrl.u32 %v1648_v31, 16  ;;  %v601_v55 = vrot.slane %v1648_v31, 1  ;;  %s1512_s29 = sshll.u32 %s2564_s16, 7 }
  0x2f   : > { %v510_v3 = vshll.u32 %v501_v60, 16  ;;  %v531_v13 = vrot.slane %v501_v60, 1 }
  0x30   : > { %v508_v4 = vor.u32 %v507_v1, %v503_v62  ;;  %v578_v41 = vrot.slane %v576_v34, 1 }
  0x31   : > { %v512_v6 = vrot.slane %v510_v3, 1  ;;  %v532_v14 = vsel %vm437_vm1, %v530_v12, %v531_v13 }
  0x32   : > { %v579_v46 = vor.u32 %v578_v41, %v574_v40 }
  0x33   : > { %468 = vrot.lane.b32.xlu2 %v1931_v42, %s1754_s28  ;;  %v513_v7 = vsel %vm324_vm0, %v508_v4, %v512_v6 }
  0x35   : > { %464 = vrot.lane.b32.xlu0 %v443_v43, %s1754_s28 }
  0x36   : > { %466 = vrot.lane.b32.xlu1 %v1937_v37, %s1754_s28 }
  0x3b   : > { %474 = vrot.lane.b32.xlu2 %v1947_v52, %s1754_s28 }
  0x3d   : > { %470 = vrot.lane.b32.xlu0 %v1950_v53, %s1754_s28 }
  0x3e   : > { %472 = vrot.lane.b32.xlu1 %v1955_v54, %s1754_s28 }
  0x43   : > { %485 = vrot.lane.b32.xlu2 %v1836_v2, %s1756_s30 }
  0x45   : > { %476 = vrot.lane.b32.xlu0 %v1963_v56, %s1754_s28 }
  0x46   : > { %483 = vrot.lane.b32.xlu1 %v1860_v29, %s1756_s30 }
  0x4b   : > { %491 = vrot.lane.b32.xlu2 %v1870_v39, %s1756_s30 }
  0x4d   : > { %487 = vrot.lane.b32.xlu0 %v1856_v24, %s1756_s30 }
  0x4e   : > { %489 = vrot.lane.b32.xlu1 %v1840_v5, %s1756_s30 }
  0x53   : > { %497 = vrot.lane.b32.xlu2 %v1647_v57, %s1756_s30 }
  0x55   : > { %493 = vrot.lane.b32.xlu0 %v1894_v63, %s1756_s30 }
  0x56   : > { %495 = vrot.lane.b32.xlu1 %v1883_v49, %s1756_s30 }
  0x5b   : > { %518 = vrot.lane.b32.xlu2 %v1900_v8, %s1757_s5 }
  0x5d   : > { %514 = vrot.lane.b32.xlu0 %v348_v17, %s1757_s5 }
  0x5e   : > { %516 = vrot.lane.b32.xlu1 %v1876_v45, %s1757_s5 }
  0x63   : > { %524 = vrot.lane.b32.xlu2 %v1919_v33, %s1757_s5 }
  0x65   : > { %520 = vrot.lane.b32.xlu0 %v1889_v51, %s1757_s5 }
  0x66   : > { %522 = vrot.lane.b32.xlu1 %v1911_v28, %s1757_s5 }
  0x6b   : > { %533 = vrot.lane.b32.xlu2 %v443_v43, %s1758_s6 }
  0x6d   : > { %526 = vrot.lane.b32.xlu0 %v1916_v32, %s1757_s5 }
  0x6e   : > { %528 = vrot.lane.b32.xlu1 %v513_v7, %s1757_s5 }
  0x73   : > { %539 = vrot.lane.b32.xlu2 %v1950_v53, %s1758_s6 }
  0x75   : > { %v463_v9 = vpop.permute.xlu2 %462  ;;  %535 = vrot.lane.b32.xlu0 %v1937_v37, %s1758_s6 }
  0x76   : > { %537 = vrot.lane.b32.xlu1 %v1931_v42, %s1758_s6 }
  0x7b   : > { %562 = vrot.lane.b32.xlu2 %v1894_v63, %s1759_s7 }
  0x7d   : > { %v2000_v10 = vpop.permute.xlu2 %429  ;;  %541 = vrot.lane.b32.xlu0 %v1955_v54, %s1758_s6 }
  0x7e   : > { %545 = vrot.lane.b32.xlu1 %v1963_v56, %s1758_s6  ;;  %v630_v58 = vsel %vm620_vm2, %v1840_v5, %v2000_v10 }
  0x83   : > { %597 = vrot.lane.b32.xlu2 %v513_v7, %s1760_s8 }
  0x85   : > { %v432_v11 = vpop.permute.xlu2 %431  ;;  %566 = vrot.lane.b32.xlu0 %v1647_v57, %s1759_s7 }
  0x86   : > { %593 = vrot.lane.b32.xlu1 %v1919_v33, %s1760_s8  ;;  %v572_v33 = vpack.c.b16 %v571_v30, %v571_v30 }
  0x88   : > { %v581_v43 = vshll.u32 %v572_v33, 16  ;;  %v602_v57 = vrot.slane %v572_v33, 1  ;;  %v2124_v33 = vld [vmem:[%s2550_s2] ss:$0 sm:$0xff] }
  0x8a   : > { %v583_v16 = vrot.slane %v581_v43, 1 }
  0x8b   : > { %554 = vrot.lane.b32.xlu2 %v1836_v2, %s1759_s7 }
  0x8c   : > { %v584_v23 = vsel %vm324_vm0, %v579_v46, %v583_v16 }
  0x8d   : > { %v469_v15 = vpop.permute.xlu2 %468  ;;  %612 = vrot.lane.b32.xlu0 %v1947_v52, %s1761_s9 }
  0x8e   : > { %616 = vrot.lane.b32.xlu1 %v532_v14, %s1761_s9 }
  0x8f   : > { %v422_v17 = vpop.permute.xlu0 %421 }
  0x90   : > { %v426_v18 = vpop.permute.xlu1 %425  ;;  %v622_v19 = vsel %vm620_vm2, %v1832_v0, %v422_v17  ;;  %v760_v17 = vld [vmem:[%s2549_s1 + $0x10] sm:$0x3] }
  0x91   : > { %v639_v20 = vsel %vm637_vm3, %v622_v19, %v463_v9  ;;  %v626_v47 = vsel %vm620_vm2, %v1836_v2, %v426_v18 }
  0x93   : > { %589 = vrot.lane.b32.xlu2 %v1889_v51, %s1760_s8 }
  0x95   : > { %v475_v21 = vpop.permute.xlu2 %474  ;;  %558 = vrot.lane.b32.xlu0 %v1840_v5, %s1759_s7 }
  0x96   : > { %585 = vrot.lane.b32.xlu1 %v1876_v45, %s1760_s8 }
  0x97   : > { %v424_v22 = vpop.permute.xlu0 %423 }
  0x98   : > { %v428_v25 = vpop.permute.xlu1 %427  ;;  %v624_v44 = vsel %vm620_vm2, %v1860_v29, %v424_v22  ;;  %v632_v29 = vsel %vm620_vm2, %v1870_v39, %v432_v11 }
  0x99   : > { %v628_v27 = vsel %vm620_vm2, %v1856_v24, %v428_v25 }
  0x9a   : > { %v645_v0 = vsel %vm637_vm3, %v628_v27, %v469_v15 }
  0x9b   : > { %543 = vrot.lane.b32.xlu2 %v1947_v52, %s1758_s6 }
  0x9d   : > { %v486_v51 = vpop.permute.xlu2 %485  ;;  %604 = vrot.lane.b32.xlu0 %v1937_v37, %s1761_s9 }
  0x9e   : > { %608 = vrot.lane.b32.xlu1 %v1950_v53, %s1761_s9 }
  0x9f   : > { %v434_v45 = vpop.permute.xlu0 %433 }
  0xa0   : > { %v436_v35 = vpop.permute.xlu1 %435  ;;  %v634_v36 = vsel %vm620_vm2, %v1894_v63, %v434_v45 }
  0xa1   : > { %v2039_v38 = vsel %vm637_vm3, %v634_v36, %v475_v21  ;;  %v636_v5 = vsel %vm620_vm2, %v1883_v49, %v436_v35 }
  0xa3   : > { %568 = vrot.lane.b32.xlu2 %v1648_v31, %s1759_s7 }
  0xa5   : > { %v2042_v37 = vpop.permute.xlu2 %491  ;;  %547 = vrot.lane.b32.xlu0 %v532_v14, %s1758_s6 }
  0xa6   : > { %564 = vrot.lane.b32.xlu1 %v1883_v49, %s1759_s7 }
  0xa7   : > { %v465_v63 = vpop.permute.xlu0 %464 }
  0xa8   : > { %v467_v48 = vpop.permute.xlu1 %466  ;;  %v641_v50 = vsel %vm637_vm3, %v624_v44, %v465_v63  ;;  %v2138_v44 = vld [vmem:[%s2551_s3] ss:$0 sm:$0xff] }
  0xa9   : > { %v643_v52 = vsel %vm637_vm3, %v626_v47, %v467_v48  ;;  %v658_v53 = vsel %vm654_vm4, %v641_v50, %v486_v51 }
  0xab   : > { %614 = vrot.lane.b32.xlu2 %v1963_v56, %s1761_s9 }
  0xad   : > { %595 = vrot.lane.b32.xlu0 %v1916_v32, %s1760_s8  ;;  %v498_v2 = vpop.permute.xlu2 %497  ;;  %v603_v32 = vsel %vm437_vm1, %v601_v55, %v602_v57 }
  0xae   : > { %599 = vrot.lane.b32.xlu1 %v584_v23, %s1760_s8 }
  0xaf   : > { %v471_v59 = vpop.permute.xlu0 %470 }
  0xb0   : > { %v473_v60 = vpop.permute.xlu1 %472  ;;  %v2066_v56 = vsel %vm637_vm3, %v630_v58, %v471_v59 }
  0xb1   : > { %v649_v61 = vsel %vm637_vm3, %v632_v29, %v473_v60  ;;  %v664_v47 = vsel %vm654_vm4, %v2066_v56, %v2042_v37 }
  0xb3   : > { %560 = vrot.lane.b32.xlu2 %v1870_v39, %s1759_s7 }
  0xb5   : > { %618 = vrot.lane.b32.xlu0 %v603_v32, %s1761_s9  ;;  %v2077_v1 = vpop.permute.xlu2 %518 }
  0xb6   : > { %556 = vrot.lane.b32.xlu1 %v1856_v24, %s1759_s7 }
  0xb7   : > { %v477_v62 = vpop.permute.xlu0 %476 }
  0xb8   : > { %v484_v3 = vpop.permute.xlu1 %483  ;;  %v653_v4 = vsel %vm637_vm3, %v636_v5, %v477_v62 }
  0xb9   : > { %v2081_v6 = vsel %vm654_vm4, %v639_v20, %v484_v3  ;;  %v670_v7 = vsel %vm654_vm4, %v653_v4, %v498_v2 }
  0xbb   : > { %606 = vrot.lane.b32.xlu2 %v1931_v42, %s1761_s9 }
  0xbd   : > { %587 = vrot.lane.b32.xlu0 %v1900_v8, %s1760_s8  ;;  %v525_v10 = vpop.permute.xlu2 %524 }
  0xbe   : > { %591 = vrot.lane.b32.xlu1 %v1911_v28, %s1760_s8  ;;  %s1763_s8 = smov 112  }
  0xbf   : > { %v488_v24 = vpop.permute.xlu0 %487 }
  0xc0   : > { %v490_v39 = vpop.permute.xlu1 %489  ;;  %v2091_v49 = vsel %vm654_vm4, %v643_v52, %v488_v24 }
  0xc1   : > { %v662_v9 = vsel %vm654_vm4, %v645_v0, %v490_v39  ;;  %v1649_v0 = vld [vmem:[%s2549_s1] sm:$0xff]  ;;  %v677_v62 = vsel %vm671_vm5, %v2091_v49, %v2077_v1 }
  0xc3   : > { %950 = vrot.lane.b32.xlu2 %v2138_v44, %s1754_s28 }
  0xc5   : > { %610 = vrot.lane.b32.xlu0 %v1955_v54, %s1761_s9  ;;  %v2100_v28 = vpop.permute.xlu2 %533  ;;  %v770_v54 = vunpack.c.l.b16 %v760_v17  ;;  %s1764_s9 = smov 104  }
  0xc6   : > { %931 = vrot.lane.b32.xlu1 %v2124_v33, %s1754_s28  ;;  %s1511_s28 = sshll.u32 %s2566_s27, 3 }
  0xc7   : > { %v494_v11 = vpop.permute.xlu0 %493  ;;  %v773_v18 = vpack.c.b16 %v770_v54, %v770_v54  ;;  %s219_s30 = sadd.s32 %s1512_s29, %s1511_s28 }
  0xc8   : > { %v496_v12 = vpop.permute.xlu1 %495  ;;  %v666_v42 = vsel %vm654_vm4, %v649_v61, %v494_v11 }
  0xc9   : > { %v2098_v8 = vsel %vm671_vm5, %v666_v42, %v525_v10  ;;  %v795_v20 = vsel %vm793_vm6, %v773_v18, 0  ;;  %v668_v48 = vsel %vm654_vm4, %v2039_v38, %v496_v12 }
  0xca   : > { %1652 = vmatpush.bf16.msra.mxu2 %v795_v20  ;;  %1653 = vmatpush.bf16.msra.mxu3 %v795_v20 }
  0xcb   : > { %802 = vmatpush.bf16.msra.mxu0 %v795_v20  ;;  %1651 = vmatpush.bf16.msra.mxu1 %v795_v20 }
  0xcc   : > { %1100 = vrot.lane.b32.xlu2 %v2138_v44, %s1757_s5 }
  0xcd   : > { %v540_v19 = vpop.permute.xlu2 %539  ;;  %1231 = vrot.lane.b32.xlu0 %v2124_v33, %s1759_s7 }
  0xce   : > { %1655 = vmatpush.bf16.msra.mxu2 %v1650_v26  ;;  %1656 = vmatpush.bf16.msra.mxu3 %v1650_v26 }
  0xcf   : > { %v2102_v13 = vpop.permute.xlu0 %514  ;;  %803 = vmatpush.bf16.msra.mxu0 %v1650_v26  ;;  %1654 = vmatpush.bf16.msra.mxu1 %v1650_v26 }
  0xd0   : > { %v517_v14 = vpop.permute.xlu1 %516  ;;  %1081 = vrot.lane.b32.xlu1 %v2124_v33, %s1757_s5  ;;  %v673_v5 = vsel %vm671_vm5, %v2081_v6, %v2102_v13  ;;  %s1513_s5 = sshll.u32 %s219_s30, 3 }
  0xd1   : > { %v675_v15 = vsel %vm671_vm5, %v658_v53, %v517_v14  ;;  %v690_v4 = vsel %vm688_vm7, %v673_v5, %v2100_v28  ;;  %s2223_s6 = scalar_lea.vmem %s2552_s4, %s1513_s5 }
  0xd2   : > { %1658 = vmatpush.bf16.msra.mxu2 %v1649_v0  ;;  %1659 = vmatpush.bf16.msra.mxu3 %v1649_v0 }
  0xd3   : > { %804 = vmatpush.bf16.msra.mxu0 %v1649_v0  ;;  %1657 = vmatpush.bf16.msra.mxu1 %v1649_v0 }
  0xd5   : > { %v563_v51 = vpop.permute.xlu2 %562 }
  0xd7   : > { %v521_v21 = vpop.permute.xlu0 %520 }
  0xd8   : > { %v523_v22 = vpop.permute.xlu1 %522  ;;  %v679_v25 = vsel %vm671_vm5, %v662_v9, %v521_v21  ;;  %1250 = vrot.lane.b32.xlu1 %v2138_v44, %s1759_s7  ;;  %s1762_s7 = smov 120  }
  0xd9   : > { %v2113_v27 = vsel %vm688_vm7, %v679_v25, %v540_v19  ;;  %v681_v50 = vsel %vm671_vm5, %v664_v47, %v523_v22 }
  0xdd   : > { %v598_v40 = vpop.permute.xlu2 %597 }
  0xdf   : > { %v527_v30 = vpop.permute.xlu0 %526 }
  0xe0   : > { %v529_v31 = vpop.permute.xlu1 %528  ;;  %v685_v52 = vsel %vm671_vm5, %v668_v48, %v527_v30 }
  0xe1   : > { %v2119_v45 = vsel %vm671_vm5, %v670_v7, %v529_v31 }
  0xe5   : > { %v555_v63 = vpop.permute.xlu2 %554 }
  0xe6   : > { %v707_v24 = vsel %vm705_vm8, %v690_v4, %v555_v63 }
  0xe7   : > { %v536_v34 = vpop.permute.xlu0 %535 }
  0xe8   : > { %v538_v35 = vpop.permute.xlu1 %537  ;;  %v2131_v36 = vsel %vm688_vm7, %v675_v15, %v536_v34 }
  0xe9   : > { %v694_v3 = vsel %vm688_vm7, %v677_v62, %v538_v35 }
  0xed   : > { %v590_v37 = vpop.permute.xlu2 %589 }
  0xef   : > { %v542_v41 = vpop.permute.xlu0 %541 }
  0xf0   : > { %v546_v43 = vpop.permute.xlu1 %545  ;;  %v698_v53 = vsel %vm688_vm7, %v681_v50, %v542_v41 }
  0xf1   : > { %v702_v23 = vsel %vm688_vm7, %v685_v52, %v546_v43  ;;  %v715_v2 = vsel %vm705_vm8, %v698_v53, %v563_v51 }
  0xf5   : > { %v544_v61 = vpop.permute.xlu2 %543 }
  0xf6   : > { %v700_v13 = vsel %vm688_vm7, %v2098_v8, %v544_v61 }
  0xf7   : > { %v567_v46 = vpop.permute.xlu0 %566 }
  0xf8   : > { %v594_v16 = vpop.permute.xlu1 %593  ;;  %v719_v29 = vsel %vm705_vm8, %v702_v23, %v567_v46 }
  0xf9   : > { %v732_v38 = vsel %vm722_vm9, %v715_v2, %v594_v16  ;;  %v736_v59 = vsel %vm722_vm9, %v719_v29, %v598_v40 }
  0xfd   : > { %v569_v49 = vpop.permute.xlu2 %568 }
  0xff   : > { %v613_v55 = vpop.permute.xlu0 %612 }
 0x100   : > { %v617_v57 = vpop.permute.xlu1 %616  ;;  %v749_v58 = vsel %vm739_vm10, %v732_v38, %v613_v55 }
 0x101   : > { %1569 = vmatmul.msk.bf16.vlgmr.msra.gmra.mxu2 %vm776_vm11, %v749_v58  ;;  %v753_v60 = vsel %vm739_vm10, %v736_v59, %v617_v57 }
 0x102   : > { %1571 = vmatmul.msk.bf16.vlgmr.msra.gmra.mxu3 %vm776_vm11, %v753_v60 }
 0x105   : > { %v615_v28 = vpop.permute.xlu2 %614 }
 0x107   : > { %v559_v56 = vpop.permute.xlu0 %558 }
 0x108   : > { %v586_v32 = vpop.permute.xlu1 %585  ;;  %v711_v7 = vsel %vm705_vm8, %v694_v3, %v559_v56 }
 0x109   : > { %v724_v39 = vsel %vm722_vm9, %v707_v24, %v586_v32  ;;  %v728_v6 = vsel %vm722_vm9, %v711_v7, %v590_v37 }
 0x10d   : > { %v561_v20 = vpop.permute.xlu2 %560 }
 0x10e   : > { %v713_v35 = vsel %vm705_vm8, %v2113_v27, %v561_v20 }
 0x10f   : > { %v605_v9 = vpop.permute.xlu0 %604 }
 0x110   : > { %v609_v10 = vpop.permute.xlu1 %608  ;;  %v741_v11 = vsel %vm739_vm10, %v724_v39, %v605_v9 }
 0x111   : > { %1565 = vmatmul.msk.bf16.vlgmr.msra.gmra.mxu0 %vm776_vm11, %v741_v11  ;;  %v745_v1 = vsel %vm739_vm10, %v728_v6, %v609_v10 }
 0x112   : > { %1567 = vmatmul.msk.bf16.vlgmr.msra.gmra.mxu1 %vm776_vm11, %v745_v1 }
 0x115   : > { %v607_v0 = vpop.permute.xlu2 %606 }
 0x117   : > { %v548_v12 = vpop.permute.xlu0 %547 }
 0x118   : > { %v565_v42 = vpop.permute.xlu1 %564  ;;  %v704_v19 = vsel %vm688_vm7, %v2119_v45, %v548_v12 }
 0x119   : > { %v717_v14 = vsel %vm705_vm8, %v700_v13, %v565_v42  ;;  %v721_v21 = vsel %vm705_vm8, %v704_v19, %v569_v49 }
 0x11d   : > { %v2206_v63 = vpop.permute.xlu2 %950 }
 0x11f   : > { %v596_v15 = vpop.permute.xlu0 %595 }
 0x120   : > { %v600_v17 = vpop.permute.xlu1 %599  ;;  %v734_v54 = vsel %vm722_vm9, %v717_v14, %v596_v15 }
 0x121   : > { %v751_v18 = vsel %vm739_vm10, %v734_v54, %v615_v28  ;;  %v738_v22 = vsel %vm722_vm9, %v721_v21, %v600_v17 }
 0x122   : > { %1570 = vmatmul.msk.bf16.gmra.mxu2 %vm776_vm11, %v751_v18 }
 0x126   : > { %v2230_v55 = vpop.permute.xlu2 %1100 }
 0x127   : > { %v619_v25 = vpop.permute.xlu0 %618 }
 0x128   : > { %v755_v8 = vsel %vm739_vm10, %v738_v22, %v619_v25  ;;  %v557_v26 = vpop.permute.xlu1 %556 }
 0x129   : > { %1572 = vmatmul.msk.bf16.gmra.mxu3 %vm776_vm11, %v755_v8  ;;  %v709_v30 = vsel %vm705_vm8, %v2131_v36, %v557_v26 }
 0x12f   : > { %v588_v51 = vpop.permute.xlu0 %587 }
 0x130   : > { %v726_v31 = vsel %vm722_vm9, %v709_v30, %v588_v51  ;;  %v592_v34 = vpop.permute.xlu1 %591 }
 0x131   : > { %v743_v45 = vsel %vm739_vm10, %v726_v31, %v607_v0  ;;  %v730_v40 = vsel %vm722_vm9, %v713_v35, %v592_v34 }
 0x132   : > { %1566 = vmatmul.msk.bf16.gmra.mxu0 %vm776_vm11, %v743_v45 }
 0x137   : > { %v611_v41 = vpop.permute.xlu0 %610 }
 0x138   : > { %v747_v43 = vsel %vm739_vm10, %v730_v40, %v611_v41  ;;  %v2203_v36 = vpop.permute.xlu1 %931 }
 0x139   : > { %1568 = vmatmul.msk.bf16.gmra.mxu1 %vm776_vm11, %v747_v43 }
 0x13f   : > { %v2242_v56 = vpop.permute.xlu0 %1231 }
 0x142   : > { %v2225_v53 = vpop.permute.xlu1 %1081 }
 0x14a   : > { %v2255_v1 = vpop.permute.xlu1 %1250 }
 0x184   : > { %v2208_v46 = vpop.f32.mrf.mxu2 }
 0x185   : > { %v857_v27 = vmul.f32 %v2124_v33, %v2208_v46  ;;  %v942_v16 = vmul.f32 %v2203_v36, %v2208_v46  ;;  %v2214_v47 = vpop.f32.mrf.mxu3  ;;  %v1242_v6 = vmul.f32 %v2242_v56, %v2208_v46 }
 0x186   : > { %v861_v48 = vmul.f32 %v2124_v33, %v2214_v47  ;;  %v1096_v37 = vmul.f32 %v2225_v53, %v2214_v47 }
 0x187   : > { %v876_v50 = vadd.f32 %v2138_v44, %v857_v27  ;;  %v961_v52 = vadd.f32 %v2206_v63, %v942_v16  ;;  %v1261_v19 = vadd.f32 %v2255_v1, %v1242_v6 }
 0x188   : > { %v880_v23 = vadd.f32 %v2138_v44, %v861_v48  ;;  %v1115_v60 = vadd.f32 %v2230_v55, %v1096_v37  ;;  %v946_v37 = vmul.f32 %v2203_v36, %v2214_v47 }
 0x189   : > { %v892_v29 = vmax.f32 %v876_v50, 0.0  ;;  %v977_v2 = vmax.f32 %v961_v52, 0.0  ;;  %v1277_v51 = vmax.f32 %v1261_v19, 0.0 }
 0x18a   : > { %v896_v38 = vmax.f32 %v880_v23, 0.0  ;;  %v1131_v11 = vmax.f32 %v1115_v60, 0.0  ;;  %v1092_v23 = vmul.f32 %v2225_v53, %v2208_v46 }
 0x18b   : > { %1580 = vst [vmem:[%s2223_s6 + $0x100] ss:$2 sm:$0xff] %v892_v29  ;;  %1017 = vrot.lane.b32.xlu2 %v977_v2, %s1762_s7 }
 0x18c   : > { %1584 = vst [vmem:[%s2223_s6 + $0x180] ss:$2 sm:$0xff] %v896_v38  ;;  %v2235_v57 = vpop.f32.mrf.mxu2  ;;  %v1111_v46 = vadd.f32 %v2230_v55, %v1092_v23 }
 0x18d   : > { %v858_v58 = vmul.f32 %v2124_v33, %v2235_v57  ;;  %v2239_v59 = vpop.f32.mrf.mxu3 }
 0x18e   : > { %v862_v61 = vmul.f32 %v2124_v33, %v2239_v59  ;;  %v806_v32 = vpop.f32.mrf.mxu0 }
 0x18f   : > { %v877_v5 = vadd.f32 %v2138_v44, %v858_v58  ;;  %v849_v62 = vmul.f32 %v2124_v33, %v806_v32  ;;  %v934_v3 = vmul.f32 %v2203_v36, %v806_v32  ;;  %v816_v4 = vpop.f32.mrf.mxu1  ;;  %v1084_v14 = vmul.f32 %v2225_v53, %v806_v32 }
 0x190   : > { %v881_v7 = vadd.f32 %v2138_v44, %v862_v61  ;;  %v853_v24 = vmul.f32 %v2124_v33, %v816_v4  ;;  %v938_v39 = vmul.f32 %v2203_v36, %v816_v4  ;;  %v1088_v17 = vmul.f32 %v2225_v53, %v816_v4 }
 0x191   : > { %v893_v9 = vmax.f32 %v877_v5, 0.0  ;;  %v868_v10 = vadd.f32 %v2138_v44, %v849_v62  ;;  %v953_v28 = vadd.f32 %v2206_v63, %v934_v3  ;;  %v1103_v26 = vadd.f32 %v2230_v55, %v1084_v14 }
 0x192   : > { %v897_v49 = vmax.f32 %v881_v7, 0.0  ;;  %v872_v12 = vadd.f32 %v2138_v44, %v853_v24  ;;  %v957_v42 = vadd.f32 %v2206_v63, %v938_v39  ;;  %v1107_v8 = vadd.f32 %v2230_v55, %v1088_v17 }
 0x193   : > { %1581 = vst [vmem:[%s2223_s6 + $0x110] ss:$2 sm:$0xff] %v893_v9  ;;  %v884_v13 = vmax.f32 %v868_v10, 0.0  ;;  %1175 = vrot.lane.b32.xlu2 %v1131_v11, %s1763_s8  ;;  %v969_v18 = vmax.f32 %v953_v28, 0.0  ;;  %v1238_v34 = vmul.f32 %v2242_v56, %v816_v4  ;;  %v1119_v41 = vmax.f32 %v1103_v26, 0.0 }
 0x194   : > { %1585 = vst [vmem:[%s2223_s6 + $0x190] ss:$2 sm:$0xff] %v897_v49  ;;  %v888_v15 = vmax.f32 %v872_v12, 0.0  ;;  %v973_v54 = vmax.f32 %v957_v42, 0.0  ;;  %v1123_v40 = vmax.f32 %v1107_v8, 0.0  ;;  %v1234_v43 = vmul.f32 %v2242_v56, %v806_v32 }
 0x195   : > { %900 = vst [vmem:[%s2223_s6] ss:$2 sm:$0xff] %v884_v13  ;;  %1001 = vrot.lane.b32.xlu0 %v969_v18, %s1762_s7  ;;  %v1257_v16 = vadd.f32 %v2255_v1, %v1238_v34  ;;  %v965_v62 = vadd.f32 %v2206_v63, %v946_v37  ;;  %v1127_v24 = vmax.f32 %v1111_v46, 0.0  ;;  %v943_v39 = vmul.f32 %v2203_v36, %v2235_v57 }
 0x196   : > { %1576 = vst [vmem:[%s2223_s6 + $0x80] ss:$2 sm:$0xff] %v888_v15  ;;  %1009 = vrot.lane.b32.xlu1 %v973_v54, %s1762_s7  ;;  %v2270_v20 = vpop.f32.mrf.mxu0  ;;  %v1253_v52 = vadd.f32 %v2255_v1, %v1234_v43  ;;  %v1093_v15 = vmul.f32 %v2225_v53, %v2235_v57 }
 0x197   : > { %v850_v21 = vmul.f32 %v2124_v33, %v2270_v20  ;;  %v818_v22 = vpop.f32.mrf.mxu1  ;;  %v1273_v29 = vmax.f32 %v1257_v16, 0.0  ;;  %v935_v4 = vmul.f32 %v2203_v36, %v2270_v20  ;;  %v981_v11 = vmax.f32 %v965_v62, 0.0 }
 0x198   : > { %v854_v25 = vmul.f32 %v2124_v33, %v818_v22  ;;  %v939_v30 = vmul.f32 %v2203_v36, %v818_v22  ;;  %v1089_v48 = vmul.f32 %v2225_v53, %v818_v22  ;;  %v1269_v38 = vmax.f32 %v1253_v52, 0.0 }
 0x199   : > { %v869_v0 = vadd.f32 %v2138_v44, %v850_v21  ;;  %v1239_v32 = vmul.f32 %v2242_v56, %v818_v22  ;;  %v954_v14 = vadd.f32 %v2206_v63, %v935_v4  ;;  %v962_v18 = vadd.f32 %v2206_v63, %v943_v39 }
 0x19a   : > { %v873_v31 = vadd.f32 %v2138_v44, %v854_v25  ;;  %v958_v27 = vadd.f32 %v2206_v63, %v939_v30  ;;  %v1108_v58 = vadd.f32 %v2230_v55, %v1089_v48  ;;  %v1097_v22 = vmul.f32 %v2225_v53, %v2239_v59 }
 0x19b   : > { %v885_v45 = vmax.f32 %v869_v0, 0.0  ;;  %1317 = vrot.lane.b32.xlu2 %v1277_v51, %s1764_s9  ;;  %v1258_v6 = vadd.f32 %v2255_v1, %v1239_v32  ;;  %v1085_v25 = vmul.f32 %v2225_v53, %v2270_v20  ;;  %v970_v0 = vmax.f32 %v954_v14, 0.0 }
 0x19c   : > { %v889_v35 = vmax.f32 %v873_v31, 0.0  ;;  %v974_v50 = vmax.f32 %v958_v27, 0.0  ;;  %v1124_v5 = vmax.f32 %v1108_v58, 0.0  ;;  %v978_v51 = vmax.f32 %v962_v18, 0.0 }
 0x19d   : > { %1573 = vst [vmem:[%s2223_s6 + $0x10] ss:$2 sm:$0xff] %v885_v45  ;;  %1151 = vrot.lane.b32.xlu0 %v1119_v41, %s1763_s8  ;;  %v1274_v54 = vmax.f32 %v1258_v6, 0.0  ;;  %v1112_v31 = vadd.f32 %v2230_v55, %v1093_v15  ;;  %v1104_v43 = vadd.f32 %v2230_v55, %v1085_v25  ;;  %v1116_v27 = vadd.f32 %v2230_v55, %v1097_v22 }
 0x19e   : > { %1577 = vst [vmem:[%s2223_s6 + $0x90] ss:$2 sm:$0xff] %v889_v35  ;;  %1159 = vrot.lane.b32.xlu1 %v1123_v40, %s1763_s8  ;;  %v1235_v37 = vmul.f32 %v2242_v56, %v2270_v20  ;;  %v947_v39 = vmul.f32 %v2203_v36, %v2239_v59 }
 0x19f   : > { %v1128_v52 = vmax.f32 %v1112_v31, 0.0  ;;  %v1120_v58 = vmax.f32 %v1104_v43, 0.0 }
 0x1a3   : > { %1011 = vrot.lane.b32.xlu2 %v974_v50, %s1762_s7 }
 0x1a5   : > { %v2296_v2 = vpop.f32.mrf.mxu2  ;;  %1301 = vrot.lane.b32.xlu0 %v1269_v38, %s1764_s9 }
 0x1a6   : > { %v859_v60 = vmul.f32 %v2124_v33, %v2296_v2  ;;  %1309 = vrot.lane.b32.xlu1 %v1273_v29, %s1764_s9 }
 0x1a8   : > { %v878_v61 = vadd.f32 %v2138_v44, %v859_v60  ;;  %v1243_v60 = vmul.f32 %v2242_v56, %v2235_v57 }
 0x1aa   : > { %v894_v3 = vmax.f32 %v878_v61, 0.0  ;;  %v1132_v61 = vmax.f32 %v1116_v27, 0.0  ;;  %v1262_v4 = vadd.f32 %v2255_v1, %v1243_v60 }
 0x1ab   : > { %1161 = vrot.lane.b32.xlu2 %v1124_v5, %s1763_s8  ;;  %v1254_v5 = vadd.f32 %v2255_v1, %v1235_v37 }
 0x1ac   : > { %1582 = vst [vmem:[%s2223_s6 + $0x140] ss:$2 sm:$0xff] %v894_v3  ;;  %v2311_v7 = vpop.f32.mrf.mxu3 }
 0x1ad   : > { %v863_v9 = vmul.f32 %v2124_v33, %v2311_v7  ;;  %v2317_v10 = vpop.f32.mrf.mxu2  ;;  %1025 = vrot.lane.b32.xlu0 %v981_v11, %s1762_s7  ;;  %v1098_v25 = vmul.f32 %v2225_v53, %v2311_v7  ;;  %v948_v31 = vmul.f32 %v2203_v36, %v2311_v7 }
 0x1ae   : > { %v860_v49 = vmul.f32 %v2124_v33, %v2317_v10  ;;  %1167 = vrot.lane.b32.xlu1 %v1127_v24, %s1763_s8 }
 0x1af   : > { %v882_v12 = vadd.f32 %v2138_v44, %v863_v9  ;;  %v2325_v42 = vpop.f32.mrf.mxu0  ;;  %v1270_v9 = vmax.f32 %v1254_v5, 0.0 }
 0x1b0   : > { %v879_v28 = vadd.f32 %v2138_v44, %v860_v49  ;;  %v851_v13 = vmul.f32 %v2124_v33, %v2325_v42  ;;  %v936_v16 = vmul.f32 %v2203_v36, %v2325_v42  ;;  %v1086_v57 = vmul.f32 %v2225_v53, %v2325_v42 }
 0x1b1   : > { %v898_v17 = vmax.f32 %v882_v12, 0.0 }
 0x1b2   : > { %v895_v19 = vmax.f32 %v879_v28, 0.0  ;;  %v870_v21 = vadd.f32 %v2138_v44, %v851_v13  ;;  %v955_v46 = vadd.f32 %v2206_v63, %v936_v16  ;;  %v1105_v6 = vadd.f32 %v2230_v55, %v1086_v57 }
 0x1b3   : > { %1586 = vst [vmem:[%s2223_s6 + $0x1c0] ss:$2 sm:$0xff] %v898_v17  ;;  %1311 = vrot.lane.b32.xlu2 %v1274_v54, %s1764_s9  ;;  %v944_v13 = vmul.f32 %v2203_v36, %v2296_v2  ;;  %v967_v16 = vadd.f32 %v2206_v63, %v948_v31 }
 0x1b4   : > { %1583 = vst [vmem:[%s2223_s6 + $0x150] ss:$2 sm:$0xff] %v895_v19  ;;  %v886_v8 = vmax.f32 %v870_v21, 0.0  ;;  %v2342_v26 = vpop.f32.mrf.mxu3  ;;  %v971_v3 = vmax.f32 %v955_v46, 0.0  ;;  %v1121_v12 = vmax.f32 %v1105_v6, 0.0  ;;  %v1236_v19 = vmul.f32 %v2242_v56, %v2325_v42 }
 0x1b5   : > { %v864_v30 = vmul.f32 %v2124_v33, %v2342_v26  ;;  %1019 = vrot.lane.b32.xlu0 %v978_v51, %s1762_s7  ;;  %v963_v18 = vadd.f32 %v2206_v63, %v944_v13  ;;  %v1117_v42 = vadd.f32 %v2230_v55, %v1098_v25  ;;  %v1099_v46 = vmul.f32 %v2225_v53, %v2342_v26 }
 0x1b6   : > { %1574 = vst [vmem:[%s2223_s6 + $0x40] ss:$2 sm:$0xff] %v886_v8  ;;  %1003 = vrot.lane.b32.xlu1 %v970_v0, %s1762_s7  ;;  %v821_v45 = vpop.f32.mrf.mxu1  ;;  %v1094_v0 = vmul.f32 %v2225_v53, %v2296_v2  ;;  %v1255_v51 = vadd.f32 %v2255_v1, %v1236_v19 }
 0x1b7   : > { %v883_v34 = vadd.f32 %v2138_v44, %v864_v30  ;;  %v855_v35 = vmul.f32 %v2124_v33, %v821_v45  ;;  %v2352_v40 = vpop.f32.mrf.mxu0  ;;  %v940_v11 = vmul.f32 %v2203_v36, %v821_v45  ;;  %v1090_v49 = vmul.f32 %v2225_v53, %v821_v45 }
 0x1b8   : > { %v852_v41 = vmul.f32 %v2124_v33, %v2352_v40  ;;  %v1240_v15 = vmul.f32 %v2242_v56, %v821_v45  ;;  %v979_v8 = vmax.f32 %v963_v18, 0.0  ;;  %v1271_v45 = vmax.f32 %v1255_v51, 0.0 }
 0x1b9   : > { %v899_v48 = vmax.f32 %v883_v34, 0.0  ;;  %v874_v50 = vadd.f32 %v2138_v44, %v855_v35  ;;  %v959_v28 = vadd.f32 %v2206_v63, %v940_v11  ;;  %v1109_v54 = vadd.f32 %v2230_v55, %v1090_v49 }
 0x1ba   : > { %v871_v23 = vadd.f32 %v2138_v44, %v852_v41  ;;  %v1259_v22 = vadd.f32 %v2255_v1, %v1240_v15  ;;  %v1113_v34 = vadd.f32 %v2230_v55, %v1094_v0  ;;  %v1244_v35 = vmul.f32 %v2242_v56, %v2296_v2 }
 0x1bb   : > { %1587 = vst [vmem:[%s2223_s6 + $0x1d0] ss:$2 sm:$0xff] %v899_v48  ;;  %v890_v29 = vmax.f32 %v874_v50, 0.0  ;;  %1169 = vrot.lane.b32.xlu2 %v1128_v52, %s1763_s8  ;;  %v975_v17 = vmax.f32 %v959_v28, 0.0  ;;  %v1125_v21 = vmax.f32 %v1109_v54, 0.0  ;;  %v1133_v41 = vmax.f32 %v1117_v42, 0.0 }
 0x1bc   : > { %v887_v38 = vmax.f32 %v871_v23, 0.0  ;;  %v1275_v30 = vmax.f32 %v1259_v22, 0.0  ;;  %v937_v43 = vmul.f32 %v2203_v36, %v2352_v40  ;;  %v1129_v27 = vmax.f32 %v1113_v34, 0.0 }
 0x1bd   : > { %1578 = vst [vmem:[%s2223_s6 + $0xc0] ss:$2 sm:$0xff] %v890_v29  ;;  %1177 = vrot.lane.b32.xlu0 %v1132_v61, %s1763_s8  ;;  %v1263_v48 = vadd.f32 %v2255_v1, %v1244_v35  ;;  %v945_v50 = vmul.f32 %v2203_v36, %v2317_v10  ;;  %v983_v52 = vmax.f32 %v967_v16, 0.0  ;;  %v1087_v37 = vmul.f32 %v2225_v53, %v2352_v40 }
 0x1be   : > { %1575 = vst [vmem:[%s2223_s6 + $0x50] ss:$2 sm:$0xff] %v887_v38  ;;  %1153 = vrot.lane.b32.xlu1 %v1120_v58, %s1763_s8  ;;  %v2372_v32 = vpop.f32.mrf.mxu1  ;;  %v956_v2 = vadd.f32 %v2206_v63, %v937_v43  ;;  %v1245_v11 = vmul.f32 %v2242_v56, %v2317_v10  ;;  %v1237_v49 = vmul.f32 %v2242_v56, %v2352_v40 }
 0x1bf   : > { %v856_v20 = vmul.f32 %v2124_v33, %v2372_v32  ;;  %v1278_v33 = vmax.f32 %v1262_v4, 0.0  ;;  %v941_v23 = vmul.f32 %v2203_v36, %v2372_v32  ;;  %v1279_v29 = vmax.f32 %v1263_v48, 0.0 }
 0x1c0   : > { %v972_v58 = vmax.f32 %v956_v2, 0.0  ;;  %v964_v60 = vadd.f32 %v2206_v63, %v945_v50  ;;  %v1106_v5 = vadd.f32 %v2230_v55, %v1087_v37  ;;  %v1241_v57 = vmul.f32 %v2242_v56, %v2372_v32 }
 0x1c1   : > { %v875_v62 = vadd.f32 %v2138_v44, %v856_v20  ;;  %v966_v44 = vadd.f32 %v2206_v63, %v947_v39  ;;  %v960_v61 = vadd.f32 %v2206_v63, %v941_v23  ;;  %v1118_v39 = vadd.f32 %v2230_v55, %v1099_v46 }
 0x1c2   : > { %v980_v20 = vmax.f32 %v964_v60, 0.0  ;;  %v1264_v13 = vadd.f32 %v2255_v1, %v1245_v11  ;;  %v1248_v15 = vmul.f32 %v2242_v56, %v2311_v7  ;;  %v1247_v40 = vmul.f32 %v2242_v56, %v2239_v59 }
 0x1c3   : > { %v891_v24 = vmax.f32 %v875_v62, 0.0  ;;  %1005 = vrot.lane.b32.xlu2 %v971_v3, %s1762_s7  ;;  %v982_v14 = vmax.f32 %v966_v44, 0.0  ;;  %v976_v62 = vmax.f32 %v960_v61, 0.0  ;;  %v1091_v3 = vmul.f32 %v2225_v53, %v2372_v32 }
 0x1c4   : > { %v1095_v32 = vmul.f32 %v2225_v53, %v2317_v10  ;;  %v1280_v53 = vmax.f32 %v1264_v13, 0.0  ;;  %v1256_v10 = vadd.f32 %v2255_v1, %v1237_v49  ;;  %v949_v54 = vmul.f32 %v2203_v36, %v2342_v26 }
 0x1c5   : > { %1579 = vst [vmem:[%s2223_s6 + $0xd0] ss:$2 sm:$0xff] %v891_v24  ;;  %1319 = vrot.lane.b32.xlu0 %v1278_v33, %s1764_s9  ;;  %v1122_v24 = vmax.f32 %v1106_v5, 0.0  ;;  %v1134_v33 = vmax.f32 %v1118_v39, 0.0  ;;  %v1110_v6 = vadd.f32 %v2230_v55, %v1091_v3  ;;  %v1266_v7 = vadd.f32 %v2255_v1, %v1247_v40 }
 0x1c6   : > { %1303 = vrot.lane.b32.xlu1 %v1270_v9, %s1764_s9  ;;  %v1260_v9 = vadd.f32 %v2255_v1, %v1241_v57  ;;  %v1272_v19 = vmax.f32 %v1256_v10, 0.0  ;;  %v968_v59 = vadd.f32 %v2206_v63, %v949_v54  ;;  %v1249_v51 = vmul.f32 %v2242_v56, %v2342_v26 }
 0x1c7   : > { %v1126_v28 = vmax.f32 %v1110_v6, 0.0  ;;  %v1282_v36 = vmax.f32 %v1266_v7, 0.0 }
 0x1c8   : > { %v1276_v44 = vmax.f32 %v1260_v9, 0.0  ;;  %v984_v25 = vmax.f32 %v968_v59, 0.0  ;;  %v1268_v34 = vadd.f32 %v2255_v1, %v1249_v51 }
 0x1cb   : > { %1155 = vrot.lane.b32.xlu2 %v1121_v12, %s1763_s8 }
 0x1cd   : > { %1013 = vrot.lane.b32.xlu0 %v975_v17, %s1762_s7 }
 0x1ce   : > { %1027 = vrot.lane.b32.xlu1 %v982_v14, %s1762_s7  ;;  %v1114_v14 = vadd.f32 %v2230_v55, %v1095_v32  ;;  %v1267_v55 = vadd.f32 %v2255_v1, %v1248_v15 }
 0x1d0   : > { %v1130_v17 = vmax.f32 %v1114_v14, 0.0 }
 0x1d3   : > { %1163 = vrot.lane.b32.xlu2 %v1125_v21, %s1763_s8  ;;  %v1283_v21 = vmax.f32 %v1267_v55, 0.0 }
 0x1d5   : > { %1313 = vrot.lane.b32.xlu0 %v1275_v30, %s1764_s9 }
 0x1d6   : > { %1021 = vrot.lane.b32.xlu1 %v979_v8, %s1762_s7  ;;  %v1246_v8 = vmul.f32 %v2242_v56, %v2214_v47 }
 0x1d8   : > { %v1265_v63 = vadd.f32 %v2255_v1, %v1246_v8 }
 0x1da   : > { %v1281_v47 = vmax.f32 %v1265_v63, 0.0 }
 0x1db   : > { %1305 = vrot.lane.b32.xlu2 %v1271_v45, %s1764_s9 }
 0x1dd   : > { %1171 = vrot.lane.b32.xlu0 %v1129_v27, %s1763_s8 }
 0x1de   : > { %1179 = vrot.lane.b32.xlu1 %v1133_v41, %s1763_s8  ;;  %v1284_v41 = vmax.f32 %v1268_v34, 0.0 }
 0x1e3   : > { %1029 = vrot.lane.b32.xlu2 %v983_v52, %s1762_s7 }
 0x1e5   : > { %v1018_v38 = vpop.permute.xlu2 %1017  ;;  %1007 = vrot.lane.b32.xlu0 %v972_v58, %s1762_s7 }
 0x1e6   : > { %1596 = vst [vmem:[%s2223_s6 + $0x101] ss:$2 sm:$0xff] %v1018_v38  ;;  %1321 = vrot.lane.b32.xlu1 %v1279_v29, %s1764_s9 }
 0x1eb   : > { %1023 = vrot.lane.b32.xlu2 %v980_v20, %s1762_s7 }
 0x1ed   : > { %v1176_v4 = vpop.permute.xlu2 %1175  ;;  %1157 = vrot.lane.b32.xlu0 %v1122_v24, %s1763_s8 }
 0x1ee   : > { %1616 = vst [vmem:[%s2223_s6 + $0x1a0] ss:$2 sm:$0xff] %v1176_v4  ;;  %1015 = vrot.lane.b32.xlu1 %v976_v62, %s1762_s7 }
 0x1f3   : > { %1181 = vrot.lane.b32.xlu2 %v1134_v33, %s1763_s8 }
 0x1f5   : > { %v1318_v12 = vpop.permute.xlu2 %1317  ;;  %1165 = vrot.lane.b32.xlu0 %v1126_v28, %s1763_s8 }
 0x1f6   : > { %1628 = vst [vmem:[%s2223_s6 + $0x121] ss:$2 sm:$0xff] %v1318_v12  ;;  %1315 = vrot.lane.b32.xlu1 %v1276_v44, %s1764_s9 }
 0x1fb   : > { %1323 = vrot.lane.b32.xlu2 %v1280_v53, %s1764_s9 }
 0x1fd   : > { %v1012_v18 = vpop.permute.xlu2 %1011  ;;  %1307 = vrot.lane.b32.xlu0 %v1272_v19, %s1764_s9 }
 0x1fe   : > { %1593 = vst [vmem:[%s2223_s6 + $0x91] ss:$2 sm:$0xff] %v1012_v18  ;;  %1173 = vrot.lane.b32.xlu1 %v1130_v17, %s1763_s8 }
 0x203   : > { %1329 = vrot.lane.b32.xlu2 %v1283_v21, %s1764_s9 }
 0x205   : > { %v1162_v22 = vpop.permute.xlu2 %1161  ;;  %1031 = vrot.lane.b32.xlu0 %v984_v25, %s1762_s7 }
 0x206   : > { %1609 = vst [vmem:[%s2223_s6 + $0xb0] ss:$2 sm:$0xff] %v1162_v22  ;;  %1327 = vrot.lane.b32.xlu1 %v1282_v36, %s1764_s9 }
 0x207   : > { %v1002_v30 = vpop.permute.xlu0 %1001 }
 0x208   : > { %v1010_v0 = vpop.permute.xlu1 %1009  ;;  %1588 = vst [vmem:[%s2223_s6 + $0x1] ss:$2 sm:$0xff] %v1002_v30 }
 0x209   : > { %1592 = vst [vmem:[%s2223_s6 + $0x81] ss:$2 sm:$0xff] %v1010_v0 }
 0x20d   : > { %v1312_v42 = vpop.permute.xlu2 %1311  ;;  %1325 = vrot.lane.b32.xlu0 %v1281_v47, %s1764_s9 }
 0x20e   : > { %1625 = vst [vmem:[%s2223_s6 + $0xb1] ss:$2 sm:$0xff] %v1312_v42 }
 0x20f   : > { %v1152_v45 = vpop.permute.xlu0 %1151 }
 0x210   : > { %v1160_v31 = vpop.permute.xlu1 %1159  ;;  %1604 = vst [vmem:[%s2223_s6 + $0x20] ss:$2 sm:$0xff] %v1152_v45 }
 0x211   : > { %1608 = vst [vmem:[%s2223_s6 + $0xa0] ss:$2 sm:$0xff] %v1160_v31 }
 0x215   : > { %v1170_v35 = vpop.permute.xlu2 %1169  ;;  %1331 = vrot.lane.b32.xlu0 %v1284_v41, %s1764_s9 }
 0x216   : > { %1613 = vst [vmem:[%s2223_s6 + $0x130] ss:$2 sm:$0xff] %v1170_v35 }
 0x217   : > { %v1302_v26 = vpop.permute.xlu0 %1301 }
 0x218   : > { %v1310_v56 = vpop.permute.xlu1 %1309  ;;  %1620 = vst [vmem:[%s2223_s6 + $0x21] ss:$2 sm:$0xff] %v1302_v26 }
 0x219   : > { %1624 = vst [vmem:[%s2223_s6 + $0xa1] ss:$2 sm:$0xff] %v1310_v56 }
 0x21d   : > { %v1006_v43 = vpop.permute.xlu2 %1005 }
 0x21e   : > { %1590 = vst [vmem:[%s2223_s6 + $0x41] ss:$2 sm:$0xff] %v1006_v43 }
 0x21f   : > { %v1026_v1 = vpop.permute.xlu0 %1025 }
 0x220   : > { %v1168_v27 = vpop.permute.xlu1 %1167  ;;  %1600 = vst [vmem:[%s2223_s6 + $0x181] ss:$2 sm:$0xff] %v1026_v1 }
 0x221   : > { %1612 = vst [vmem:[%s2223_s6 + $0x120] ss:$2 sm:$0xff] %v1168_v27 }
 0x225   : > { %v1156_v16 = vpop.permute.xlu2 %1155 }
 0x226   : > { %1606 = vst [vmem:[%s2223_s6 + $0x60] ss:$2 sm:$0xff] %v1156_v16 }
 0x227   : > { %v1020_v50 = vpop.permute.xlu0 %1019 }
 0x228   : > { %v1004_v48 = vpop.permute.xlu1 %1003  ;;  %1597 = vst [vmem:[%s2223_s6 + $0x111] ss:$2 sm:$0xff] %v1020_v50 }
 0x229   : > { %1589 = vst [vmem:[%s2223_s6 + $0x11] ss:$2 sm:$0xff] %v1004_v48 }
 0x22d   : > { %v1164_v52 = vpop.permute.xlu2 %1163 }
 0x22e   : > { %1610 = vst [vmem:[%s2223_s6 + $0xe0] ss:$2 sm:$0xff] %v1164_v52 }
 0x22f   : > { %v1178_v23 = vpop.permute.xlu0 %1177 }
 0x230   : > { %v1154_v2 = vpop.permute.xlu1 %1153  ;;  %1617 = vst [vmem:[%s2223_s6 + $0x1b0] ss:$2 sm:$0xff] %v1178_v23 }
 0x231   : > { %1605 = vst [vmem:[%s2223_s6 + $0x30] ss:$2 sm:$0xff] %v1154_v2 }
 0x235   : > { %v1306_v29 = vpop.permute.xlu2 %1305 }
 0x236   : > { %1622 = vst [vmem:[%s2223_s6 + $0x61] ss:$2 sm:$0xff] %v1306_v29 }
 0x237   : > { %v1320_v38 = vpop.permute.xlu0 %1319 }
 0x238   : > { %v1304_v37 = vpop.permute.xlu1 %1303  ;;  %1629 = vst [vmem:[%s2223_s6 + $0x131] ss:$2 sm:$0xff] %v1320_v38 }
 0x239   : > { %1621 = vst [vmem:[%s2223_s6 + $0x31] ss:$2 sm:$0xff] %v1304_v37 }
 0x23d   : > { %v1030_v58 = vpop.permute.xlu2 %1029 }
 0x23e   : > { %1602 = vst [vmem:[%s2223_s6 + $0x1c1] ss:$2 sm:$0xff] %v1030_v58 }
 0x23f   : > { %v1014_v61 = vpop.permute.xlu0 %1013 }
 0x240   : > { %v1028_v60 = vpop.permute.xlu1 %1027  ;;  %1594 = vst [vmem:[%s2223_s6 + $0xc1] ss:$2 sm:$0xff] %v1014_v61 }
 0x241   : > { %1601 = vst [vmem:[%s2223_s6 + $0x191] ss:$2 sm:$0xff] %v1028_v60 }
 0x245   : > { %v1024_v46 = vpop.permute.xlu2 %1023 }
 0x246   : > { %1599 = vst [vmem:[%s2223_s6 + $0x151] ss:$2 sm:$0xff] %v1024_v46 }
 0x247   : > { %v1314_v5 = vpop.permute.xlu0 %1313 }
 0x248   : > { %v1022_v20 = vpop.permute.xlu1 %1021  ;;  %1626 = vst [vmem:[%s2223_s6 + $0xe1] ss:$2 sm:$0xff] %v1314_v5 }
 0x249   : > { %1598 = vst [vmem:[%s2223_s6 + $0x141] ss:$2 sm:$0xff] %v1022_v20 }
 0x24d   : > { %v1182_v57 = vpop.permute.xlu2 %1181 }
 0x24e   : > { %1619 = vst [vmem:[%s2223_s6 + $0x1f0] ss:$2 sm:$0xff] %v1182_v57 }
 0x24f   : > { %v1172_v3 = vpop.permute.xlu0 %1171 }
 0x250   : > { %v1180_v62 = vpop.permute.xlu1 %1179  ;;  %1614 = vst [vmem:[%s2223_s6 + $0x160] ss:$2 sm:$0xff] %v1172_v3 }
 0x251   : > { %1618 = vst [vmem:[%s2223_s6 + $0x1e0] ss:$2 sm:$0xff] %v1180_v62 }
 0x255   : > { %v1324_v4 = vpop.permute.xlu2 %1323 }
 0x256   : > { %1631 = vst [vmem:[%s2223_s6 + $0x171] ss:$2 sm:$0xff] %v1324_v4 }
 0x257   : > { %v1008_v39 = vpop.permute.xlu0 %1007 }
 0x258   : > { %v1322_v24 = vpop.permute.xlu1 %1321  ;;  %1591 = vst [vmem:[%s2223_s6 + $0x51] ss:$2 sm:$0xff] %v1008_v39 }
 0x259   : > { %1630 = vst [vmem:[%s2223_s6 + $0x161] ss:$2 sm:$0xff] %v1322_v24 }
 0x25d   : > { %v1330_v9 = vpop.permute.xlu2 %1329 }
 0x25e   : > { %1634 = vst [vmem:[%s2223_s6 + $0x1e1] ss:$2 sm:$0xff] %v1330_v9 }
 0x25f   : > { %v1158_v33 = vpop.permute.xlu0 %1157 }
 0x260   : > { %v1016_v11 = vpop.permute.xlu1 %1015  ;;  %1607 = vst [vmem:[%s2223_s6 + $0x70] ss:$2 sm:$0xff] %v1158_v33 }
 0x261   : > { %1595 = vst [vmem:[%s2223_s6 + $0xd1] ss:$2 sm:$0xff] %v1016_v11 }
 0x267   : > { %v1166_v32 = vpop.permute.xlu0 %1165 }
 0x268   : > { %v1316_v6 = vpop.permute.xlu1 %1315  ;;  %1611 = vst [vmem:[%s2223_s6 + $0xf0] ss:$2 sm:$0xff] %v1166_v32 }
 0x269   : > { %1627 = vst [vmem:[%s2223_s6 + $0xf1] ss:$2 sm:$0xff] %v1316_v6 }
 0x26f   : > { %v1308_v49 = vpop.permute.xlu0 %1307 }
 0x270   : > { %v1174_v44 = vpop.permute.xlu1 %1173  ;;  %1623 = vst [vmem:[%s2223_s6 + $0x71] ss:$2 sm:$0xff] %v1308_v49 }
 0x271   : > { %1615 = vst [vmem:[%s2223_s6 + $0x170] ss:$2 sm:$0xff] %v1174_v44 }
 0x277   : > { %v1032_v28 = vpop.permute.xlu0 %1031 }
 0x278   : > { %v1328_v12 = vpop.permute.xlu1 %1327  ;;  %1603 = vst [vmem:[%s2223_s6 + $0x1d1] ss:$2 sm:$0xff] %v1032_v28 }
 0x279   : > { %1633 = vst [vmem:[%s2223_s6 + $0x1b1] ss:$2 sm:$0xff] %v1328_v12 }
 0x27f   : > { %v1326_v13 = vpop.permute.xlu0 %1325 }
 0x280   : > { %1632 = vst [vmem:[%s2223_s6 + $0x1a1] ss:$2 sm:$0xff] %v1326_v13 }
 0x287   : > { %v1332_v14 = vpop.permute.xlu0 %1331 }
 0x288   : > { %1635 = vst [vmem:[%s2223_s6 + $0x1f1] ss:$2 sm:$0xff] %v1332_v14 }
 0x289 PF: > { %s14_s19 = sadd.s32 1, %s1752_s19   ;;  %s2553_s15 = smov %s1744_s17 }
 0x28a   : > { %p11_p7 = scmp.ge.s32.totalorder %s14_s19, 6   ;;  %s2554_s16 = smov %s1748_s18 }
 0x28b   : > { %s2555_s17 = smov %s2558_s20  ;;  %s2556_s18 = smov %s2562_s21 }
 0x28c   :  { %13 = sbr.rel (!%p11_p7) target bundleno = 3 (0x3), region = 130 }

// kernel: tpu_custom_call.1
= control target key start
LH: loop header
LB: loop body
LE: loop exit
PB: predicated region body
PF: predicated region fallthrough
CT: control target
= control target key end

     0   :  { %s4140_s15 = smov 0   ;;  %s4142_s16 = smov 0   ;;  %s6047_s0 = inlined_call_operand.vmem [shape: bf16[2,18,18,4], index: 0, kind: input, shape index: {}]   ;;  %s6048_s1 = inlined_call_operand.vmem [shape: bf16[4,2,2,4,8], index: 1, kind: input, shape index: {}]   ;;  %s6049_s2 = inlined_call_operand.vmem [shape: f32[1,8], index: 2, kind: input, shape index: {}]   ;;  %s6050_s3 = inlined_call_operand.vmem [shape: f32[1,8], index: 3, kind: input, shape index: {}]   ;;  %s6051_s4 = inlined_call_operand.vmem [shape: f32[2,16,2,16,2,8], index: 4, kind: output, shape index: {}]  }
   0x1   :  { %s4144_s17 = smov 0   ;;  %s4146_s18 = smov 0  }
   0x2   :  { %s4148_s19 = smov 0  }
   0x3 LB: > { %s23_s20 = sadd.s32 1, %s4105_s17  ;;  %s26_s21 = sadd.s32 1, %s4109_s18  ;;  %s4113_s19 = sphi %s4148_s19, %s14_s19   ;;  %s4109_s18 = sphi %s4146_s18, %s6059_s18   ;;  %s4105_s17 = sphi %s4144_s17, %s6058_s17   ;;  %s4101_s16 = sphi %s4142_s16, %s6057_s16   ;;  %s4097_s15 = sphi %s4140_s15, %s6056_s15  }
   0x4   : > { %p24_p0 = scmp.ge.s32.totalorder %s23_s20, 2  ;;  %p3547_p1 = scmp.ge.s32.totalorder %s4113_s19, 1 }
   0x5   : > { %p176_p2 = scmp.lt.s32.totalorder %s4113_s19, 5 }
   0x6   : > { %s6061_s20 = smov (%p24_p0, %s23_s20), 0  ;;  %s6063_s21 = smov (!%p24_p0, %s26_s21), %s4109_s18 }
   0x7   : > { %p177_p3 = pnand %p3547_p1, %p176_p2  ;;  %p28_p4 = scmp.ge.s32.totalorder %s6063_s21, 2 }
   0x8   : > { %p207_p5 = scmp.lt.s32.totalorder (!%p177_p3), %s4101_s16, 1  ;;  %s4007_s30 = smul.u32 (!%p177_p3), 96, %s4097_s15 }
   0x9   : > { %s6065_s21 = smov (%p28_p4, %s6063_s21), 0  ;;  %180 = sbr.rel (%p177_p3) target bundleno = 692 (0x2b4), region = 36 }
   0xe   : > { %vm507_vm0 = vcmask 1041408   ;;  %v3605_v0 = vld [vmem:[%s6048_s1 + $0x4] sm:$0x3]  ;;  %v260_v2 = vld [vmem:[%s6048_s1] sm:$0x3]  ;;  %s6067_s16 = smov (!%p207_p5, %s4101_s16), 1 }
   0xf   : > { %v687_v1 = vsel %vm507_vm0, %v3605_v0, 0  ;;  %v3556_v3 = vld [vmem:[%s6048_s1 + $0x2] sm:$0x3]  ;;  %v625_v4 = vsel %vm507_vm0, %v260_v2, 0  ;;  %v3618_v6 = vld [vmem:[%s6048_s1 + $0x6] sm:$0x3] }
  0x10   : > { %696 = vmatpush.bf16.msra.mxu2 %v687_v1  ;;  %v509_v5 = vsel %vm507_vm0, %v3556_v3, 0  ;;  %634 = vmatpush.bf16.msra.mxu1 %v625_v4  ;;  %v787_v7 = vsel %vm507_vm0, %v3618_v6, 0  ;;  %v3653_v8 = vld [vmem:[%s6048_s1 + $0xc] sm:$0x3]  ;;  %s4018_s7 = smul.u32 216, %s6067_s16  ;;  %vm482_vm1 = vcmask 31744  }
  0x11   : > { %518 = vmatpush.bf16.msra.mxu0 %v509_v5  ;;  %796 = vmatpush.bf16.msra.mxu3 %v787_v7  ;;  %v1503_v9 = vsel %vm507_vm0, %v3653_v8, 0  ;;  %v3663_v10 = vld [vmem:[%s6048_s1 + $0xe] sm:$0x3]  ;;  %v3636_v12 = vld [vmem:[%s6048_s1 + $0xa] sm:$0x3]  ;;  %vm1287_vm5 = vcmask 1042432  }
  0x12   : > { %v1587_v11 = vsel %vm507_vm0, %v3663_v10, 0  ;;  %v3627_v13 = vld [vmem:[%s6048_s1 + $0x8] sm:$0x3]  ;;  %s211_s23 = scalar_lea.vmem %s6047_s0, %s4018_s7  ;;  %v1397_v14 = vsel %vm507_vm0, %v3636_v12, 0  ;;  %vm261_vm2 = vsmask.f32 3328 }
  0x13   : > { %v1449_v15 = vsel %vm507_vm0, %v3627_v13, 0  ;;  %s4211_s24 = scalar_lea.vmem %s211_s23, %s4007_s30  ;;  %vm262_vm3 = vsmask.f32 7440  ;;  %vm1288_vm6 = vcmask 1046532   ;;  %s3549_s7 = sshll.u32 %s4097_s15, 3  ;;  %vm1148_vm8 = vcmask 57344  }
  0x14   : > { %1512 = vmatpush.bf16.msrb.mxu2 %v1503_v9  ;;  %1458 = vmatpush.bf16.msrb.mxu1 %v1449_v15  ;;  %v4214_v16 = vld [vmem:[%s4211_s24 + $0xc] sm:$0xff]  ;;  %v4008_v17 = vld [vmem:[%s4211_s24] sm:$0xff]  ;;  %v4224_v20 = vld [vmem:[%s4211_s24 + $0x8] sm:$0x1]  ;;  %p215_p6 = scmp.lt.s32.totalorder %s3549_s7, 15  ;;  %s3551_s15 = sshll.u32 %s6067_s16, 9 }
  0x15   : > { %1596 = vmatpush.bf16.msrb.mxu3 %v1587_v11  ;;  %1406 = vmatpush.bf16.msrb.mxu0 %v1397_v14  ;;  %v4218_v18 = vld [vmem:[%s4211_s24] sm:$0xf]  ;;  %v4221_v19 = vld [vmem:[%s4211_s24 + $0x4] sm:$0xf]  ;;  %v284_v25 = vshll.u32 %v4224_v20, 16  ;;  %vm4252_vm4 = vmor %vm261_vm2, %vm262_vm3 }
  0x16   : > { %v265_v21 = vshrl.u32 %v4218_v18, 16  ;;  %v268_v22 = vshll.u32 %v4218_v18, 16  ;;  %3610 = vmatmul.msk.bf16.vlgmr.msra.gmra.mxu2 %vm482_vm1, %v4214_v16  ;;  %3597 = vmatmul.msk.bf16.vlgmr.msra.gmra.mxu1 %vm482_vm1, %v4008_v17  ;;  %v274_v23 = vshll.u32 %v4221_v19, 16  ;;  %v278_v24 = vshrl.u32 %v4221_v19, 16  ;;  %v4235_v26 = vld [vmem:[%s4211_s24 + $0xc] sm:$0xf]  ;;  %vm4478_vm7 = vmor %vm1287_vm5, %vm1288_vm6 }
  0x17   : > { %v4238_v29 = vld [vmem:[%s4211_s24 + $0x10] sm:$0xf]  ;;  %v4241_v30 = vld [vmem:[%s4211_s24 + $0x14] sm:$0x1]  ;;  %v289_v33 = vshrl.u32 %v4235_v26, 16  ;;  %v292_v35 = vshll.u32 %v4235_v26, 16 }
  0x18   : > { %v267_v27 = vrot.slane %v265_v21, 4  ;;  %v270_v28 = vrot.slane %v268_v22, 5  ;;  %v276_v31 = vrot.slane %v274_v23, 5  ;;  %v280_v32 = vrot.slane %v278_v24, 4  ;;  %v4248_v38 = vld [vmem:[%s4211_s24 + $0x18] sm:$0xf] }
  0x19   : > { %v298_v36 = vshll.u32 %v4238_v29, 16  ;;  %v302_v37 = vshrl.u32 %v4238_v29, 16  ;;  %v286_v41 = vrot.slane %v284_v25, 5  ;;  %v291_v42 = vrot.slane %v289_v33, 4  ;;  %v4258_v44 = vld [vmem:[%s4211_s24 + $0x1c] sm:$0xf] }
  0x1a   : > { %v271_v34 = vor.u32 %v270_v28, %v267_v27  ;;  %v281_v40 = vor.u32 %v280_v32, %v276_v31  ;;  %v308_v43 = vshll.u32 %v4241_v30, 16  ;;  %v294_v46 = vrot.slane %v292_v35, 5  ;;  %v4268_v0 = vld [vmem:[%s4211_s24 + $0x20] sm:$0x1]  ;;  %v4010_v8 = vld [vmem:[%s4211_s24 + $0x18] sm:$0xff]  ;;  %s6069_s7 = smov (!%p215_p6, %s3549_s7), 15 }
  0x1b   : > { %v300_v47 = vrot.slane %v298_v36, 5  ;;  %v304_v48 = vrot.slane %v302_v37, 4  ;;  %v313_v51 = vshrl.u32 %v4248_v38, 16  ;;  %v316_v52 = vshll.u32 %v4248_v38, 16  ;;  %v4289_v21 = vld [vmem:[%s4211_s24 + $0x24] sm:$0xf] }
  0x1c   : > { %v272_v45 = vrot.slane %v271_v34, 4  ;;  %v282_v49 = vrot.slane %v281_v40, 4  ;;  %v310_v50 = vrot.slane %v308_v43, 5  ;;  %v295_v54 = vor.u32 %v294_v46, %v291_v42  ;;  %v4292_v22 = vld [vmem:[%s4211_s24 + $0x28] sm:$0xf]  ;;  %s3550_s8 = sshll.u32 %s6069_s7, 5 }
  0x1d   : > { %v305_v55 = vor.u32 %v304_v48, %v300_v47  ;;  %v322_v56 = vshll.u32 %v4258_v44, 16  ;;  %v315_v59 = vrot.slane %v313_v51, 4  ;;  %v318_v63 = vrot.slane %v316_v52, 5  ;;  %v4303_v37 = vld [vmem:[%s4211_s24 + $0x2c] sm:$0x1]  ;;  %s219_s11 = sadd.s32 %s3551_s15, %s3550_s8 }
  0x1e   : > { %v277_v53 = vsel %vm4252_vm4, %v272_v45, %v276_v31  ;;  %v287_v57 = vsel %vm4252_vm4, %v282_v49, %v286_v41  ;;  %v296_v61 = vrot.slane %v295_v54, 4  ;;  %v326_v2 = vshrl.u32 %v4258_v44, 16  ;;  %v4011_v41 = vld [vmem:[%s4211_s24 + $0x24] sm:$0xff]  ;;  %v4316_v49 = vld [vmem:[%s4211_s24 + $0x30] sm:$0xf]  ;;  %s3552_s13 = sshll.u32 %s219_s11, 1 }
  0x1f   : > { %v458_v58 = vunpack.c.l.b16 %v277_v53  ;;  %v459_v60 = vunpack.c.l.b16 %v287_v57  ;;  %v306_v62 = vrot.slane %v305_v55, 4  ;;  %v324_v1 = vrot.slane %v322_v56, 5  ;;  %s4531_s23 = scalar_lea.vmem %s6051_s4, %s3552_s13 }
  0x20   : > { %v301_v4 = vsel %vm4252_vm4, %v296_v61, %v300_v47  ;;  %v328_v9 = vrot.slane %v326_v2, 4  ;;  %v319_v10 = vor.u32 %v318_v63, %v315_v59  ;;  %v332_v11 = vshll.u32 %v4268_v0, 16  ;;  %v4330_v63 = vld [vmem:[%s4211_s24 + $0x38] sm:$0x1]  ;;  %v4012_v2 = vld [vmem:[%s4211_s24 + $0x30] sm:$0xff] }
  0x21   : > { %v4271_v3 = vpack.c.b16 %v459_v60, %v458_v58  ;;  %v311_v5 = vsel %vm4252_vm4, %v306_v62, %v310_v50  ;;  %v460_v6 = vunpack.c.l.b16 %v301_v4  ;;  %v337_v23 = vshrl.u32 %v4289_v21, 16  ;;  %v4319_v50 = vld [vmem:[%s4211_s24 + $0x34] sm:$0xf] }
  0x22   : > { %v461_v7 = vunpack.c.l.b16 %v311_v5  ;;  %v329_v13 = vor.u32 %v328_v9, %v324_v1  ;;  %v320_v14 = vrot.slane %v319_v10, 4  ;;  %v334_v17 = vrot.slane %v332_v11, 5 }
  0x23   : > { %3557 = vmatmul.msk.bf16.vlgmr.msra.gmra.mxu0 %vm482_vm1, %v4271_v3  ;;  %v340_v24 = vshll.u32 %v4289_v21, 16  ;;  %v350_v28 = vshrl.u32 %v4292_v22, 16  ;;  %v339_v33 = vrot.slane %v337_v23, 4  ;;  %v356_v45 = vshll.u32 %v4303_v37, 16 }
  0x24   : > { %v4281_v12 = vpack.c.b16 %v461_v7, %v460_v6  ;;  %v330_v15 = vrot.slane %v329_v13, 4  ;;  %v325_v25 = vsel %vm4252_vm4, %v320_v14, %v324_v1  ;;  %v361_v52 = vshrl.u32 %v4316_v49, 16  ;;  %v4342_v7 = vld [vmem:[%s4211_s24 + $0x3c] sm:$0xf] }
  0x25   : > { %v462_v31 = vunpack.c.l.b16 %v325_v25  ;;  %v342_v34 = vrot.slane %v340_v24, 5  ;;  %v352_v36 = vrot.slane %v350_v28, 4  ;;  %v358_v48 = vrot.slane %v356_v45, 5 }
  0x26   : > { %3619 = vmatmul.msk.bf16.vlgmr.msra.gmra.mxu3 %vm482_vm1, %v4281_v12  ;;  %3611 = vmatmul.msk.bf16.gmra.mxu2 %vm482_vm1, %v4010_v8  ;;  %v335_v27 = vsel %vm4252_vm4, %v330_v15, %v334_v17  ;;  %v364_v54 = vshll.u32 %v4316_v49, 16  ;;  %v370_v55 = vshll.u32 %v4319_v50, 16  ;;  %v374_v56 = vshrl.u32 %v4319_v50, 16 }
  0x27   : > { %3598 = vmatmul.msk.bf16.gmra.mxu1 %vm482_vm1, %v4214_v16  ;;  %v346_v16 = vshll.u32 %v4292_v22, 16  ;;  %v463_v32 = vunpack.c.l.b16 %v335_v27  ;;  %v343_v42 = vor.u32 %v342_v34, %v339_v33  ;;  %v363_v59 = vrot.slane %v361_v52, 4  ;;  %v4357_v33 = vld [vmem:[%s4211_s24 + $0x44] sm:$0x1] }
  0x28   : > { %v366_v60 = vrot.slane %v364_v54, 5  ;;  %v372_v61 = vrot.slane %v370_v55, 5  ;;  %v376_v62 = vrot.slane %v374_v56, 4  ;;  %v380_v6 = vshll.u32 %v4330_v63, 16 }
  0x29   : > { %v348_v35 = vrot.slane %v346_v16, 5  ;;  %v4305_v40 = vpack.c.b16 %v463_v32, %v462_v31  ;;  %v344_v46 = vrot.slane %v343_v42, 4  ;;  %v385_v13 = vshrl.u32 %v4342_v7, 16  ;;  %v4013_v42 = vld [vmem:[%s4211_s24 + $0x3c] sm:$0xff] }
  0x2a   : > { %v367_v4 = vor.u32 %v366_v60, %v363_v59  ;;  %v377_v5 = vor.u32 %v376_v62, %v372_v61  ;;  %v382_v11 = vrot.slane %v380_v6, 5  ;;  %v388_v14 = vshll.u32 %v4342_v7, 16 }
  0x2b   : > { %v353_v43 = vor.u32 %v352_v36, %v348_v35  ;;  %v349_v51 = vsel %vm4252_vm4, %v344_v46, %v348_v35  ;;  %v387_v25 = vrot.slane %v385_v13, 4  ;;  %v404_v36 = vshll.u32 %v4357_v33, 16 }
  0x2c   : > { %v464_v57 = vunpack.c.l.b16 %v349_v51  ;;  %v368_v9 = vrot.slane %v367_v4, 4  ;;  %v378_v10 = vrot.slane %v377_v5, 4  ;;  %v390_v27 = vrot.slane %v388_v14, 5  ;;  %v4014_v5 = vld [vmem:[%s4211_s24 + $0x48] sm:$0xff] }
  0x2d   : > { %v354_v47 = vrot.slane %v353_v43, 4  ;;  %v406_v46 = vrot.slane %v404_v36, 5 }
  0x2e   : > { %v373_v23 = vsel %vm4252_vm4, %v368_v9, %v372_v61  ;;  %v383_v24 = vsel %vm4252_vm4, %v378_v10, %v382_v11  ;;  %v391_v34 = vor.u32 %v390_v27, %v387_v25 }
  0x2f   : > { %v359_v53 = vsel %vm4252_vm4, %v354_v47, %v358_v48  ;;  %v466_v31 = vunpack.c.l.b16 %v373_v23  ;;  %v467_v32 = vunpack.c.l.b16 %v383_v24  ;;  %v4370_v47 = vld [vmem:[%s4211_s24 + $0x48] sm:$0xf]  ;;  %v4373_v48 = vld [vmem:[%s4211_s24 + $0x4c] sm:$0xf] }
  0x30   : > { %v465_v58 = vunpack.c.l.b16 %v359_v53  ;;  %v392_v43 = vrot.slane %v391_v34, 4  ;;  %v409_v53 = vshrl.u32 %v4370_v47, 16  ;;  %v412_v54 = vshll.u32 %v4370_v47, 16 }
  0x31   : > { %v418_v55 = vshll.u32 %v4373_v48, 16  ;;  %v422_v56 = vshrl.u32 %v4373_v48, 16 }
  0x32   : > { %v4332_v1 = vpack.c.b16 %v465_v58, %v464_v57  ;;  %v411_v59 = vrot.slane %v409_v53, 4  ;;  %v414_v60 = vrot.slane %v412_v54, 5  ;;  %v4423_v54 = vld [vmem:[%s4211_s24 + $0x60] sm:$0xf] }
  0x33   : > { %3558 = vmatmul.msk.bf16.gmra.mxu0 %vm482_vm1, %v4281_v12  ;;  %v420_v61 = vrot.slane %v418_v55, 5  ;;  %v424_v62 = vrot.slane %v422_v56, 4  ;;  %v4426_v55 = vld [vmem:[%s4211_s24 + $0x64] sm:$0xf] }
  0x34   : > { %v415_v6 = vor.u32 %v414_v60, %v411_v59  ;;  %v755_v59 = vshrl.u32 %v4423_v54, 16  ;;  %v758_v60 = vshll.u32 %v4423_v54, 16 }
  0x35   : > { %v425_v9 = vor.u32 %v424_v62, %v420_v61  ;;  %v768_v62 = vshrl.u32 %v4426_v55, 16 }
  0x36   : > { %3620 = vmatmul.msk.bf16.gmra.mxu3 %vm482_vm1, %v4305_v40  ;;  %3612 = vmatmul.msk.bf16.gmra.mxu2 %vm482_vm1, %v4011_v41  ;;  %v416_v11 = vrot.slane %v415_v6, 4 }
  0x37   : > { %3599 = vmatmul.msk.bf16.gmra.mxu1 %vm482_vm1, %v4010_v8  ;;  %v4345_v8 = vld [vmem:[%s4211_s24 + $0x40] sm:$0xf]  ;;  %v426_v13 = vrot.slane %v425_v9, 4 }
  0x38   : > { %v394_v15 = vshll.u32 %v4345_v8, 16  ;;  %v398_v17 = vshrl.u32 %v4345_v8, 16  ;;  %v421_v23 = vsel %vm4252_vm4, %v416_v11, %v420_v61  ;;  %v764_v61 = vshll.u32 %v4426_v55, 16 }
  0x3a   : > { %v396_v16 = vrot.slane %v394_v15, 5  ;;  %v400_v28 = vrot.slane %v398_v17, 4  ;;  %v4397_v15 = vld [vmem:[%s4211_s24 + $0x54] sm:$0xf]  ;;  %v4400_v17 = vld [vmem:[%s4211_s24 + $0x58] sm:$0xf] }
  0x3b   : > { %v433_v25 = vshrl.u32 %v4397_v15, 16  ;;  %v436_v27 = vshll.u32 %v4397_v15, 16  ;;  %v766_v11 = vrot.slane %v764_v61, 5 }
  0x3c   : > { %v401_v35 = vor.u32 %v400_v28, %v396_v16  ;;  %v397_v51 = vsel %vm4252_vm4, %v392_v43, %v396_v16  ;;  %v442_v16 = vshll.u32 %v4400_v17, 16  ;;  %v446_v28 = vshrl.u32 %v4400_v17, 16  ;;  %v4411_v43 = vld [vmem:[%s4211_s24 + $0x5c] sm:$0x1] }
  0x3d   : > { %v468_v57 = vunpack.c.l.b16 %v397_v51  ;;  %v435_v34 = vrot.slane %v433_v25, 4  ;;  %v452_v53 = vshll.u32 %v4411_v43, 16 }
  0x3e   : > { %v402_v45 = vrot.slane %v401_v35, 4  ;;  %v438_v35 = vrot.slane %v436_v27, 5  ;;  %v444_v36 = vrot.slane %v442_v16, 5  ;;  %v3690_v16 = vld [vmem:[%s6048_s1 + $0x14] sm:$0x3] }
  0x40   : > { %v407_v52 = vsel %vm4252_vm4, %v402_v45, %v406_v46  ;;  %v4015_v46 = vld [vmem:[%s4211_s24 + $0x54] sm:$0xff]  ;;  %v439_v51 = vor.u32 %v438_v35, %v435_v34 }
  0x41   : > { %v469_v58 = vunpack.c.l.b16 %v407_v52 }
  0x42   : > { %v440_v56 = vrot.slane %v439_v51, 4  ;;  %v3673_v51 = vld [vmem:[%s6048_s1 + $0x12] sm:$0x3] }
  0x43   : > { %3559 = vmatmul.msk.bf16.gmra.mxu0 %vm482_vm1, %v4305_v40  ;;  %v4386_v4 = vpack.c.b16 %v469_v58, %v468_v57  ;;  %v454_v58 = vrot.slane %v452_v53, 5 }
  0x44   : > { %v445_v6 = vsel %vm4252_vm4, %v440_v56, %v444_v36 }
  0x46   : > { %3621 = vmatmul.msk.bf16.gmra.mxu3 %vm482_vm1, %v4332_v1  ;;  %3613 = vmatmul.msk.bf16.gmra.mxu2 %vm482_vm1, %v4012_v2 }
  0x47   : > { %3600 = vmatmul.msk.bf16.gmra.mxu1 %vm482_vm1, %v4011_v41  ;;  %v4360_v41 = vpack.c.b16 %v467_v32, %v466_v31  ;;  %v470_v31 = vunpack.c.l.b16 %v421_v23 }
  0x53   : > { %3560 = vmatmul.msk.bf16.gmra.mxu0 %vm482_vm1, %v4332_v1 }
  0x56   : > { %3622 = vmatmul.msk.bf16.gmra.mxu3 %vm482_vm1, %v4360_v41  ;;  %3614 = vmatmul.msk.bf16.gmra.mxu2 %vm482_vm1, %v4013_v42 }
  0x57   : > { %3601 = vmatmul.msk.bf16.gmra.mxu1 %vm482_vm1, %v4012_v2  ;;  %v4384_v2 = vld [vmem:[%s4211_s24 + $0x50] sm:$0x1] }
  0x58   : > { %v428_v10 = vshll.u32 %v4384_v2, 16 }
  0x5a   : > { %v430_v14 = vrot.slane %v428_v10, 5  ;;  %v760_v10 = vrot.slane %v758_v60, 5 }
  0x5c   : > { %v431_v24 = vsel %vm4252_vm4, %v426_v13, %v430_v14  ;;  %v770_v13 = vrot.slane %v768_v62, 4  ;;  %v472_v14 = vunpack.c.l.b16 %v445_v6 }
  0x5d   : > { %v471_v32 = vunpack.c.l.b16 %v431_v24  ;;  %v4438_v24 = vld [vmem:[%s4211_s24 + $0x68] sm:$0x1] }
  0x5e   : > { %v771_v27 = vor.u32 %v770_v13, %v766_v11  ;;  %v774_v34 = vshll.u32 %v4438_v24, 16 }
  0x5f   : > { %v4413_v45 = vpack.c.b16 %v471_v32, %v470_v31  ;;  %v4016_v31 = vld [vmem:[%s4211_s24 + $0x60] sm:$0xff]  ;;  %v2189_v32 = vsel %vm507_vm0, %v3690_v16, 0 }
  0x60   : > { %2198 = vmatpush.bf16.msra.mxu2 %v2189_v32  ;;  %v776_v53 = vrot.slane %v774_v34, 5 }
  0x63   : > { %3561 = vmatmul.msk.bf16.gmra.mxu0 %vm482_vm1, %v4360_v41 }
  0x66   : > { %3623 = vmatmul.msk.bf16.gmra.mxu3 %vm482_vm1, %v4386_v4  ;;  %3615 = vmatmul.msk.bf16.gmra.mxu2 %vm482_vm1, %v4014_v5 }
  0x67   : > { %3602 = vmatmul.msk.bf16.gmra.mxu1 %vm482_vm1, %v4013_v42  ;;  %v448_v42 = vrot.slane %v446_v28, 4 }
  0x69   : > { %v449_v52 = vor.u32 %v448_v42, %v444_v36  ;;  %v772_v36 = vrot.slane %v771_v27, 4  ;;  %v3703_v42 = vld [vmem:[%s6048_s1 + $0x16] sm:$0x3] }
  0x6a   : > { %v2289_v56 = vsel %vm507_vm0, %v3703_v42, 0 }
  0x6b   : > { %v450_v57 = vrot.slane %v449_v52, 4  ;;  %v3672_v52 = vld [vmem:[%s6048_s1 + $0x10] sm:$0x3]  ;;  %2298 = vmatpush.bf16.msra.mxu3 %v2289_v56  ;;  %v777_v60 = vsel %vm4252_vm4, %v772_v36, %v776_v53 }
  0x6c   : > { %v781_v62 = vunpack.c.l.b16 %v777_v60 }
  0x6d   : > { %v455_v9 = vsel %vm4252_vm4, %v450_v57, %v454_v58  ;;  %v2075_v57 = vsel %vm507_vm0, %v3673_v51, 0  ;;  %v2127_v58 = vsel %vm507_vm0, %v3672_v52, 0  ;;  %v1306_v52 = vrot.slane %v4258_v44, 5  ;;  %v4515_v44 = vld [vmem:[%s6049_s2] ss:$0 sm:$0xff] }
  0x6e   : > { %v473_v23 = vunpack.c.l.b16 %v455_v9  ;;  %2084 = vmatpush.bf16.msra.mxu0 %v2075_v57  ;;  %2136 = vmatpush.bf16.msra.mxu1 %v2127_v58  ;;  %v3630_v57 = vrot.slane %v4248_v38, 9  ;;  %v4520_v38 = vld [vmem:[%s6050_s3] ss:$0 sm:$0xff] }
  0x6f   : > { %v1308_v58 = vrot.slane %v1306_v52, 4 }
  0x70   : > { %v4443_v28 = vpack.c.b16 %v473_v23, %v472_v14 }
  0x73   : > { %3562 = vmatmul.msk.bf16.gmra.mxu0 %vm482_vm1, %v4386_v4 }
  0x76   : > { %3624 = vmatmul.msk.bf16.gmra.mxu3 %vm482_vm1, %v4413_v45  ;;  %3616 = vmatmul.msk.bf16.gmra.mxu2 %vm482_vm1, %v4015_v46 }
  0x77   : > { %3603 = vmatmul.msk.bf16.gmra.mxu1 %vm482_vm1, %v4014_v5  ;;  %v757_v5 = vrot.slane %v755_v59, 4 }
  0x79   : > { %v761_v25 = vor.u32 %v760_v10, %v757_v5  ;;  %v1299_v5 = vrot.slane %v4238_v29, 5  ;;  %v1295_v10 = vrot.slane %v4224_v20, 5 }
  0x7b   : > { %v762_v35 = vrot.slane %v761_v25, 4  ;;  %v1301_v20 = vrot.slane %v1299_v5, 4 }
  0x7d   : > { %v767_v59 = vsel %vm4252_vm4, %v762_v35, %v766_v11  ;;  %v3628_v11 = vrot.slane %v4218_v18, 9  ;;  %v1302_v18 = vrot.slane %v4241_v30, 5 }
  0x7e   : > { %v780_v61 = vunpack.c.l.b16 %v767_v59  ;;  %v1309_v59 = vrot.slane %v4268_v0, 5  ;;  %v1307_v0 = vsel %vm4478_vm7, %v3630_v57, %v1306_v52 }
  0x80   : > { %v4471_v6 = vpack.c.b16 %v781_v62, %v780_v61 }
  0x83   : > { %3563 = vmatmul.msk.bf16.gmra.mxu0 %vm482_vm1, %v4413_v45 }
  0x86   : > { %3625 = vmatmul.msk.bf16.gmra.mxu3 %vm482_vm1, %v4443_v28  ;;  %3617 = vmatmul.msk.bf16.gmra.mxu2 %vm482_vm1, %v4016_v31 }
  0x87   : > { %3604 = vmatmul.msk.bf16.gmra.mxu1 %vm482_vm1, %v4015_v46  ;;  %v1292_v46 = vrot.slane %v4221_v19, 5  ;;  %v3629_v19 = vrot.slane %v4235_v26, 9 }
  0x89   : > { %v1294_v13 = vrot.slane %v1292_v46, 4  ;;  %v1293_v29 = vsel %vm4478_vm7, %v3628_v11, %v1292_v46  ;;  %v1300_v32 = vsel %vm4478_vm7, %v3629_v19, %v1299_v5 }
  0x8a   : > { %v1348_v16 = vunpack.c.l.b16 %v1293_v29  ;;  %v1350_v26 = vunpack.c.l.b16 %v1300_v32 }
  0x8b   : > { %v1296_v23 = vsel %vm4478_vm7, %v1294_v13, %v1295_v10  ;;  %v1352_v13 = vunpack.c.l.b16 %v1307_v0 }
  0x8c   : > { %v1349_v31 = vunpack.c.l.b16 %v1296_v23 }
  0x8e   : > { %v1364_v34 = vpack.c.b16 %v1349_v31, %v1348_v16 }
  0x93   : > { %3564 = vmatmul.msk.bf16.gmra.mxu0 %vm482_vm1, %v4443_v28  ;;  %v636_v9 = vpop.f32.mrf.mxu1 }
  0x96   : > { %3626 = vmatmul.msk.bf16.gmra.mxu3 %vm482_vm1, %v4471_v6  ;;  %3654 = vmatmul.msk.bf16.vlgmr.msrb.gmra.mxu2 %vm482_vm1, %v4281_v12 }
  0x97   : > { %3645 = vmatmul.msk.bf16.vlgmr.msrb.gmra.mxu1 %vm482_vm1, %v4271_v3  ;;  %v1303_v3 = vsel %vm4478_vm7, %v1301_v20, %v1302_v18 }
  0x98   : > { %v1351_v30 = vunpack.c.l.b16 %v1303_v3 }
  0x99   : > { %v698_v25 = vpop.f32.mrf.mxu2 }
  0x9a   : > { %v4499_v51 = vpack.c.b16 %v1351_v30, %v1350_v26 }
  0x9b   : > { %v638_v27 = vpop.f32.mrf.mxu1 }
  0xa0   : > { %v520_v35 = vpop.f32.mrf.mxu0 }
  0xa1   : > { %v700_v36 = vpop.f32.mrf.mxu2  ;;  %v637_v42 = vadd.f32 %v636_v9, %v520_v35  ;;  %v1310_v9 = vsel %vm4478_vm7, %v1308_v58, %v1309_v59  ;;  %v1313_v35 = vrot.slane %v4292_v22, 5  ;;  %v3631_v22 = vrot.slane %v4289_v21, 9 }
  0xa2   : > { %v1353_v19 = vunpack.c.l.b16 %v1310_v9 }
  0xa3   : > { %3637 = vmatmul.msk.bf16.vlgmr.msrb.gmra.mxu0 %vm482_vm1, %v1364_v34  ;;  %v738_v56 = vadd.f32 %v698_v25, %v637_v42  ;;  %v1315_v59 = vrot.slane %v1313_v35, 4  ;;  %v1314_v9 = vsel %vm4478_vm7, %v3631_v22, %v1313_v35 }
  0xa4   : > { %v641_v53 = vpop.f32.mrf.mxu1  ;;  %v4533_v16 = vpack.c.b16 %v1353_v19, %v1352_v13 }
  0xa6   : > { %3664 = vmatmul.msk.bf16.vlgmr.msrb.gmra.mxu3 %vm482_vm1, %v4499_v51  ;;  %3655 = vmatmul.msk.bf16.gmra.mxu2 %vm482_vm1, %v4305_v40 }
  0xa7   : > { %3646 = vmatmul.msk.bf16.gmra.mxu1 %vm482_vm1, %v4281_v12 }
  0xa8   : > { %v522_v60 = vpop.f32.mrf.mxu0 }
  0xa9   : > { %v798_v61 = vpop.f32.mrf.mxu3  ;;  %v703_v62 = vpop.f32.mrf.mxu2  ;;  %v639_v11 = vadd.f32 %v638_v27, %v522_v60  ;;  %v1316_v60 = vrot.slane %v4303_v37, 5 }
  0xaa   : > { %v838_v46 = vadd.f32 %v798_v61, %v738_v56 }
  0xab   : > { %v739_v23 = vadd.f32 %v700_v36, %v639_v11  ;;  %v1317_v13 = vsel %vm4478_vm7, %v1315_v59, %v1316_v60 }
  0xac   : > { %v857_v5 = vmul.f32 %v4515_v44, %v838_v46  ;;  %v643_v10 = vpop.f32.mrf.mxu1 }
  0xae   : > { %v876_v20 = vadd.f32 %v4520_v38, %v857_v5 }
  0xb0   : > { %v892_v18 = vmax.f32 %v876_v20, 0.0  ;;  %v525_v29 = vpop.f32.mrf.mxu0 }
  0xb1   : > { %v800_v25 = vpop.f32.mrf.mxu3  ;;  %v705_v27 = vpop.f32.mrf.mxu2  ;;  %v642_v26 = vadd.f32 %v641_v53, %v525_v29 }
  0xb2   : > { %v924_v31 = vrot.slane %v892_v18, 1  ;;  %v925_v32 = vrot.slane %v892_v18, 2  ;;  %v926_v3 = vrot.slane %v892_v18, 3  ;;  %1149 = vst.msk [vmem:[%s4531_s23] sm:$0x1] %vm1148_vm8, %v892_v18  ;;  %v927_v30 = vrot.slane %v892_v18, 4 }
  0xb3   : > { %v839_v34 = vadd.f32 %v800_v25, %v739_v23  ;;  %3638 = vmatmul.msk.bf16.gmra.mxu0 %vm482_vm1, %v4499_v51  ;;  %v928_v36 = vrot.slane %v892_v18, 5  ;;  %v929_v52 = vrot.slane %v892_v18, 6  ;;  %v930_v53 = vrot.slane %v892_v18, 7 }
  0xb4   : > { %1150 = vst.msk [vmem:[%s4531_s23 + $0x2] sm:$0x1] %vm1148_vm8, %v924_v31  ;;  %v646_v42 = vpop.f32.mrf.mxu1  ;;  %v740_v57 = vadd.f32 %v703_v62, %v642_v26 }
  0xb5   : > { %1151 = vst.msk [vmem:[%s4531_s23 + $0x4] sm:$0x1] %vm1148_vm8, %v925_v32  ;;  %v858_v56 = vmul.f32 %v4515_v44, %v839_v34  ;;  %v1354_v32 = vunpack.c.l.b16 %v1314_v9 }
  0xb6   : > { %1152 = vst.msk [vmem:[%s4531_s23 + $0x6] sm:$0x1] %vm1148_vm8, %v926_v3  ;;  %3665 = vmatmul.msk.bf16.gmra.mxu3 %vm482_vm1, %v4533_v16  ;;  %3656 = vmatmul.msk.bf16.gmra.mxu2 %vm482_vm1, %v4332_v1  ;;  %v1355_v3 = vunpack.c.l.b16 %v1317_v13 }
  0xb7   : > { %1153 = vst.msk [vmem:[%s4531_s23 + $0x8] sm:$0x1] %vm1148_vm8, %v927_v30  ;;  %v877_v58 = vadd.f32 %v4520_v38, %v858_v56  ;;  %3647 = vmatmul.msk.bf16.gmra.mxu1 %vm482_vm1, %v4305_v40 }
  0xb8   : > { %1154 = vst.msk [vmem:[%s4531_s23 + $0xa] sm:$0x1] %vm1148_vm8, %v928_v36  ;;  %v527_v61 = vpop.f32.mrf.mxu0 }
  0xb9   : > { %1155 = vst.msk [vmem:[%s4531_s23 + $0xc] sm:$0x1] %vm1148_vm8, %v929_v52  ;;  %v893_v62 = vmax.f32 %v877_v58, 0.0  ;;  %v803_v46 = vpop.f32.mrf.mxu3  ;;  %v708_v21 = vpop.f32.mrf.mxu2  ;;  %v644_v23 = vadd.f32 %v643_v10, %v527_v61 }
  0xba   : > { %1156 = vst.msk [vmem:[%s4531_s23 + $0xe] sm:$0x1] %vm1148_vm8, %v930_v53  ;;  %v840_v0 = vadd.f32 %v803_v46, %v740_v57  ;;  %v4586_v57 = vpack.c.b16 %v1355_v3, %v1354_v32 }
  0xbb   : > { %v931_v5 = vrot.slane %v893_v62, 1  ;;  %v932_v11 = vrot.slane %v893_v62, 2  ;;  %v933_v37 = vrot.slane %v893_v62, 3  ;;  %1157 = vst.msk [vmem:[%s4531_s23 + $0x10] sm:$0x1] %vm1148_vm8, %v893_v62  ;;  %v934_v19 = vrot.slane %v893_v62, 4 }
  0xbc   : > { %v859_v20 = vmul.f32 %v4515_v44, %v840_v0  ;;  %v4571_v18 = vpop.f32.mrf.mxu1  ;;  %v935_v29 = vrot.slane %v893_v62, 5  ;;  %v936_v25 = vrot.slane %v893_v62, 6  ;;  %v937_v26 = vrot.slane %v893_v62, 7 }
  0xbd   : > { %1158 = vst.msk [vmem:[%s4531_s23 + $0x12] sm:$0x1] %vm1148_vm8, %v931_v5  ;;  %v741_v35 = vadd.f32 %v705_v27, %v644_v23  ;;  %v1320_v27 = vrot.slane %v4319_v50, 5  ;;  %v3632_v50 = vrot.slane %v4316_v49, 9 }
  0xbe   : > { %1159 = vst.msk [vmem:[%s4531_s23 + $0x14] sm:$0x1] %vm1148_vm8, %v932_v11  ;;  %v878_v31 = vadd.f32 %v4520_v38, %v859_v20  ;;  %v1323_v11 = vrot.slane %v4330_v63, 5 }
  0xbf   : > { %1160 = vst.msk [vmem:[%s4531_s23 + $0x16] sm:$0x1] %vm1148_vm8, %v933_v37  ;;  %v1322_v5 = vrot.slane %v1320_v27, 4  ;;  %v1321_v20 = vsel %vm4478_vm7, %v3632_v50, %v1320_v27 }
  0xc0   : > { %1161 = vst.msk [vmem:[%s4531_s23 + $0x18] sm:$0x1] %vm1148_vm8, %v934_v19  ;;  %v894_v30 = vmax.f32 %v878_v31, 0.0  ;;  %v530_v34 = vpop.f32.mrf.mxu0 }
  0xc1   : > { %1162 = vst.msk [vmem:[%s4531_s23 + $0x1a] sm:$0x1] %vm1148_vm8, %v935_v29  ;;  %v805_v10 = vpop.f32.mrf.mxu3  ;;  %v710_v36 = vpop.f32.mrf.mxu2  ;;  %v647_v53 = vadd.f32 %v646_v42, %v530_v34 }
  0xc2   : > { %1163 = vst.msk [vmem:[%s4531_s23 + $0x1c] sm:$0x1] %vm1148_vm8, %v936_v25  ;;  %v938_v52 = vrot.slane %v894_v30, 1  ;;  %v939_v56 = vrot.slane %v894_v30, 2  ;;  %v940_v22 = vrot.slane %v894_v30, 3  ;;  %v841_v58 = vadd.f32 %v805_v10, %v741_v35 }
  0xc3   : > { %1164 = vst.msk [vmem:[%s4531_s23 + $0x1e] sm:$0x1] %vm1148_vm8, %v937_v26  ;;  %3639 = vmatmul.msk.bf16.gmra.mxu0 %vm482_vm1, %v4533_v16  ;;  %v941_v59 = vrot.slane %v894_v30, 4  ;;  %v942_v61 = vrot.slane %v894_v30, 5  ;;  %v943_v62 = vrot.slane %v894_v30, 6  ;;  %v742_v46 = vadd.f32 %v708_v21, %v647_v53 }
  0xc4   : > { %1165 = vst.msk [vmem:[%s4531_s23 + $0x40] sm:$0x1] %vm1148_vm8, %v894_v30  ;;  %v651_v60 = vpop.f32.mrf.mxu1  ;;  %v860_v42 = vmul.f32 %v4515_v44, %v841_v58  ;;  %v944_v0 = vrot.slane %v894_v30, 7  ;;  %v1324_v25 = vsel %vm4478_vm7, %v1322_v5, %v1323_v11  ;;  %v1356_v10 = vunpack.c.l.b16 %v1321_v20 }
  0xc5   : > { %1166 = vst.msk [vmem:[%s4531_s23 + $0x42] sm:$0x1] %vm1148_vm8, %v938_v52  ;;  %v1357_v52 = vunpack.c.l.b16 %v1324_v25  ;;  %v1330_v20 = vrot.slane %v4357_v33, 5 }
  0xc6   : > { %1167 = vst.msk [vmem:[%s4531_s23 + $0x44] sm:$0x1] %vm1148_vm8, %v939_v56  ;;  %3666 = vmatmul.msk.bf16.gmra.mxu3 %vm482_vm1, %v4586_v57  ;;  %3657 = vmatmul.msk.bf16.gmra.mxu2 %vm482_vm1, %v4360_v41  ;;  %v879_v9 = vadd.f32 %v4520_v38, %v860_v42 }
  0xc7   : > { %1168 = vst.msk [vmem:[%s4531_s23 + $0x46] sm:$0x1] %vm1148_vm8, %v940_v22  ;;  %3648 = vmatmul.msk.bf16.gmra.mxu1 %vm482_vm1, %v4332_v1 }
  0xc8   : > { %1169 = vst.msk [vmem:[%s4531_s23 + $0x48] sm:$0x1] %vm1148_vm8, %v941_v59  ;;  %v532_v21 = vpop.f32.mrf.mxu0  ;;  %v895_v37 = vmax.f32 %v879_v9, 0.0 }
  0xc9   : > { %1170 = vst.msk [vmem:[%s4531_s23 + $0x4a] sm:$0x1] %vm1148_vm8, %v942_v61  ;;  %v808_v49 = vpop.f32.mrf.mxu3  ;;  %v713_v13 = vpop.f32.mrf.mxu2  ;;  %v649_v30 = vadd.f32 %v4571_v18, %v532_v21 }
  0xca   : > { %1171 = vst.msk [vmem:[%s4531_s23 + $0x4c] sm:$0x1] %vm1148_vm8, %v943_v62  ;;  %v842_v19 = vadd.f32 %v808_v49, %v742_v46  ;;  %v945_v63 = vrot.slane %v895_v37, 1  ;;  %v946_v29 = vrot.slane %v895_v37, 2  ;;  %v947_v23 = vrot.slane %v895_v37, 3 }
  0xcb   : > { %1172 = vst.msk [vmem:[%s4531_s23 + $0x4e] sm:$0x1] %vm1148_vm8, %v944_v0  ;;  %v948_v31 = vrot.slane %v895_v37, 4  ;;  %v949_v26 = vrot.slane %v895_v37, 5  ;;  %v950_v34 = vrot.slane %v895_v37, 6  ;;  %v951_v56 = vrot.slane %v895_v37, 7 }
  0xcc   : > { %1173 = vst.msk [vmem:[%s4531_s23 + $0x50] sm:$0x1] %vm1148_vm8, %v895_v37  ;;  %v861_v32 = vmul.f32 %v4515_v44, %v842_v19  ;;  %v4626_v3 = vpop.f32.mrf.mxu1  ;;  %v743_v58 = vadd.f32 %v710_v36, %v649_v30  ;;  %v4642_v62 = vpack.c.b16 %v1357_v52, %v1356_v10  ;;  %v1327_v36 = vrot.slane %v4345_v8, 5 }
  0xcd   : > { %1174 = vst.msk [vmem:[%s4531_s23 + $0x52] sm:$0x1] %vm1148_vm8, %v945_v63  ;;  %v3633_v8 = vrot.slane %v4342_v7, 9 }
  0xce   : > { %1175 = vst.msk [vmem:[%s4531_s23 + $0x54] sm:$0x1] %vm1148_vm8, %v946_v29  ;;  %v880_v35 = vadd.f32 %v4520_v38, %v861_v32  ;;  %v1329_v19 = vrot.slane %v1327_v36, 4 }
  0xcf   : > { %1176 = vst.msk [vmem:[%s4531_s23 + $0x56] sm:$0x1] %vm1148_vm8, %v947_v23  ;;  %v1328_v25 = vsel %vm4478_vm7, %v3633_v8, %v1327_v36 }
  0xd0   : > { %1177 = vst.msk [vmem:[%s4531_s23 + $0x58] sm:$0x1] %vm1148_vm8, %v948_v31  ;;  %v896_v53 = vmax.f32 %v880_v35, 0.0  ;;  %v535_v22 = vpop.f32.mrf.mxu0 }
  0xd1   : > { %1178 = vst.msk [vmem:[%s4531_s23 + $0x5a] sm:$0x1] %vm1148_vm8, %v949_v26  ;;  %v810_v18 = vpop.f32.mrf.mxu3  ;;  %v715_v27 = vpop.f32.mrf.mxu2  ;;  %v652_v42 = vadd.f32 %v651_v60, %v535_v22  ;;  %v1331_v26 = vsel %vm4478_vm7, %v1329_v19, %v1330_v20  ;;  %v1358_v22 = vunpack.c.l.b16 %v1328_v25 }
  0xd2   : > { %1179 = vst.msk [vmem:[%s4531_s23 + $0x5c] sm:$0x1] %vm1148_vm8, %v950_v34  ;;  %v952_v59 = vrot.slane %v896_v53, 1  ;;  %v953_v61 = vrot.slane %v896_v53, 2  ;;  %v954_v46 = vrot.slane %v896_v53, 3  ;;  %v843_v50 = vadd.f32 %v810_v18, %v743_v58 }
  0xd3   : > { %1180 = vst.msk [vmem:[%s4531_s23 + $0x5e] sm:$0x1] %vm1148_vm8, %v951_v56  ;;  %3640 = vmatmul.msk.bf16.gmra.mxu0 %vm482_vm1, %v4586_v57  ;;  %v955_v0 = vrot.slane %v896_v53, 4  ;;  %v956_v5 = vrot.slane %v896_v53, 5  ;;  %v957_v11 = vrot.slane %v896_v53, 6  ;;  %v744_v21 = vadd.f32 %v713_v13, %v652_v42 }
  0xd4   : > { %1181 = vst.msk [vmem:[%s4531_s23 + $0x80] sm:$0x1] %vm1148_vm8, %v896_v53  ;;  %v656_v9 = vpop.f32.mrf.mxu1  ;;  %v862_v60 = vmul.f32 %v4515_v44, %v843_v50  ;;  %v958_v37 = vrot.slane %v896_v53, 7  ;;  %v1359_v58 = vunpack.c.l.b16 %v1331_v26 }
  0xd5   : > { %1182 = vst.msk [vmem:[%s4531_s23 + $0x82] sm:$0x1] %vm1148_vm8, %v952_v59 }
  0xd6   : > { %1183 = vst.msk [vmem:[%s4531_s23 + $0x84] sm:$0x1] %vm1148_vm8, %v953_v61  ;;  %3667 = vmatmul.msk.bf16.gmra.mxu3 %vm482_vm1, %v4642_v62  ;;  %3658 = vmatmul.msk.bf16.gmra.mxu2 %vm482_vm1, %v4386_v4  ;;  %v881_v49 = vadd.f32 %v4520_v38, %v862_v60 }
  0xd7   : > { %1184 = vst.msk [vmem:[%s4531_s23 + $0x86] sm:$0x1] %vm1148_vm8, %v954_v46  ;;  %3649 = vmatmul.msk.bf16.gmra.mxu1 %vm482_vm1, %v4360_v41 }
  0xd8   : > { %1185 = vst.msk [vmem:[%s4531_s23 + $0x88] sm:$0x1] %vm1148_vm8, %v955_v0  ;;  %v537_v13 = vpop.f32.mrf.mxu0  ;;  %v897_v63 = vmax.f32 %v881_v49, 0.0 }
  0xd9   : > { %1186 = vst.msk [vmem:[%s4531_s23 + $0x8a] sm:$0x1] %vm1148_vm8, %v956_v5  ;;  %v813_v7 = vpop.f32.mrf.mxu3  ;;  %v718_v29 = vpop.f32.mrf.mxu2  ;;  %v654_v52 = vadd.f32 %v4626_v3, %v537_v13  ;;  %v4698_v5 = vpack.c.b16 %v1359_v58, %v1358_v22 }
  0xda   : > { %1187 = vst.msk [vmem:[%s4531_s23 + $0x8c] sm:$0x1] %vm1148_vm8, %v957_v11  ;;  %v844_v23 = vadd.f32 %v813_v7, %v744_v21  ;;  %v959_v33 = vrot.slane %v897_v63, 1  ;;  %v960_v31 = vrot.slane %v897_v63, 2  ;;  %v961_v32 = vrot.slane %v897_v63, 3 }
  0xdb   : > { %1188 = vst.msk [vmem:[%s4531_s23 + $0x8e] sm:$0x1] %vm1148_vm8, %v958_v37  ;;  %v962_v30 = vrot.slane %v897_v63, 4  ;;  %v963_v10 = vrot.slane %v897_v63, 5  ;;  %v964_v56 = vrot.slane %v897_v63, 6  ;;  %v965_v18 = vrot.slane %v897_v63, 7 }
  0xdc   : > { %1189 = vst.msk [vmem:[%s4531_s23 + $0x90] sm:$0x1] %vm1148_vm8, %v897_v63  ;;  %v863_v34 = vmul.f32 %v4515_v44, %v844_v23  ;;  %v4682_v35 = vpop.f32.mrf.mxu1  ;;  %v745_v42 = vadd.f32 %v715_v27, %v654_v52  ;;  %v1334_v27 = vrot.slane %v4373_v48, 5  ;;  %v3634_v48 = vrot.slane %v4370_v47, 9 }
  0xdd   : > { %1190 = vst.msk [vmem:[%s4531_s23 + $0x92] sm:$0x1] %vm1148_vm8, %v959_v33  ;;  %v1337_v7 = vrot.slane %v4384_v2, 5 }
  0xde   : > { %1191 = vst.msk [vmem:[%s4531_s23 + $0x94] sm:$0x1] %vm1148_vm8, %v960_v31  ;;  %v882_v53 = vadd.f32 %v4520_v38, %v863_v34  ;;  %v1336_v63 = vrot.slane %v1334_v27, 4  ;;  %v1335_v31 = vsel %vm4478_vm7, %v3634_v48, %v1334_v27 }
  0xdf   : > { %1192 = vst.msk [vmem:[%s4531_s23 + $0x96] sm:$0x1] %vm1148_vm8, %v961_v32 }
  0xe0   : > { %1193 = vst.msk [vmem:[%s4531_s23 + $0x98] sm:$0x1] %vm1148_vm8, %v962_v30  ;;  %v898_v59 = vmax.f32 %v882_v53, 0.0  ;;  %v540_v61 = vpop.f32.mrf.mxu0  ;;  %v1338_v30 = vsel %vm4478_vm7, %v1336_v63, %v1337_v7 }
  0xe1   : > { %1194 = vst.msk [vmem:[%s4531_s23 + $0x9a] sm:$0x1] %vm1148_vm8, %v963_v10  ;;  %v815_v3 = vpop.f32.mrf.mxu3  ;;  %v720_v46 = vpop.f32.mrf.mxu2  ;;  %v657_v0 = vadd.f32 %v656_v9, %v540_v61 }
  0xe2   : > { %1195 = vst.msk [vmem:[%s4531_s23 + $0x9c] sm:$0x1] %vm1148_vm8, %v964_v56  ;;  %v966_v50 = vrot.slane %v898_v59, 1  ;;  %v967_v36 = vrot.slane %v898_v59, 2  ;;  %v968_v60 = vrot.slane %v898_v59, 3  ;;  %v845_v11 = vadd.f32 %v815_v3, %v745_v42 }
  0xe3   : > { %1196 = vst.msk [vmem:[%s4531_s23 + $0x9e] sm:$0x1] %vm1148_vm8, %v965_v18  ;;  %3641 = vmatmul.msk.bf16.gmra.mxu0 %vm482_vm1, %v4642_v62  ;;  %v969_v21 = vrot.slane %v898_v59, 4  ;;  %v970_v37 = vrot.slane %v898_v59, 5  ;;  %v971_v49 = vrot.slane %v898_v59, 6  ;;  %v746_v19 = vadd.f32 %v718_v29, %v657_v0 }
  0xe4   : > { %1197 = vst.msk [vmem:[%s4531_s23 + $0xc0] sm:$0x1] %vm1148_vm8, %v898_v59  ;;  %v661_v8 = vpop.f32.mrf.mxu1  ;;  %v864_v9 = vmul.f32 %v4515_v44, %v845_v11  ;;  %v972_v20 = vrot.slane %v898_v59, 7  ;;  %v1360_v18 = vunpack.c.l.b16 %v1335_v31  ;;  %v1361_v59 = vunpack.c.l.b16 %v1338_v30 }
  0xe5   : > { %1198 = vst.msk [vmem:[%s4531_s23 + $0xc2] sm:$0x1] %vm1148_vm8, %v966_v50 }
  0xe6   : > { %1199 = vst.msk [vmem:[%s4531_s23 + $0xc4] sm:$0x1] %vm1148_vm8, %v967_v36  ;;  %3668 = vmatmul.msk.bf16.gmra.mxu3 %vm482_vm1, %v4698_v5  ;;  %3659 = vmatmul.msk.bf16.gmra.mxu2 %vm482_vm1, %v4413_v45  ;;  %v883_v13 = vadd.f32 %v4520_v38, %v864_v9  ;;  %v4754_v27 = vpack.c.b16 %v1361_v59, %v1360_v18 }
  0xe7   : > { %1200 = vst.msk [vmem:[%s4531_s23 + $0xc6] sm:$0x1] %vm1148_vm8, %v968_v60  ;;  %3650 = vmatmul.msk.bf16.gmra.mxu1 %vm482_vm1, %v4386_v4 }
  0xe8   : > { %1201 = vst.msk [vmem:[%s4531_s23 + $0xc8] sm:$0x1] %vm1148_vm8, %v969_v21  ;;  %v542_v29 = vpop.f32.mrf.mxu0  ;;  %v899_v23 = vmax.f32 %v883_v13, 0.0 }
  0xe9   : > { %1202 = vst.msk [vmem:[%s4531_s23 + $0xca] sm:$0x1] %vm1148_vm8, %v970_v37  ;;  %v818_v47 = vpop.f32.mrf.mxu3  ;;  %v723_v25 = vpop.f32.mrf.mxu2  ;;  %v659_v53 = vadd.f32 %v4682_v35, %v542_v29  ;;  %v1344_v29 = vrot.slane %v4411_v43, 5 }
  0xea   : > { %1203 = vst.msk [vmem:[%s4531_s23 + $0xcc] sm:$0x1] %vm1148_vm8, %v971_v49  ;;  %v846_v33 = vadd.f32 %v818_v47, %v746_v19  ;;  %v973_v2 = vrot.slane %v899_v23, 1  ;;  %v974_v32 = vrot.slane %v899_v23, 2  ;;  %v975_v26 = vrot.slane %v899_v23, 3 }
  0xeb   : > { %1204 = vst.msk [vmem:[%s4531_s23 + $0xce] sm:$0x1] %vm1148_vm8, %v972_v20  ;;  %v976_v34 = vrot.slane %v899_v23, 4  ;;  %v977_v56 = vrot.slane %v899_v23, 5  ;;  %v978_v22 = vrot.slane %v899_v23, 6  ;;  %v979_v61 = vrot.slane %v899_v23, 7 }
  0xec   : > { %1205 = vst.msk [vmem:[%s4531_s23 + $0xd0] sm:$0x1] %vm1148_vm8, %v899_v23  ;;  %v865_v10 = vmul.f32 %v4515_v44, %v846_v33  ;;  %v4738_v52 = vpop.f32.mrf.mxu1  ;;  %v747_v50 = vadd.f32 %v720_v46, %v659_v53  ;;  %v1341_v46 = vrot.slane %v4400_v17, 5  ;;  %v3635_v17 = vrot.slane %v4397_v15, 9 }
  0xed   : > { %1206 = vst.msk [vmem:[%s4531_s23 + $0xd2] sm:$0x1] %vm1148_vm8, %v973_v2 }
  0xee   : > { %1207 = vst.msk [vmem:[%s4531_s23 + $0xd4] sm:$0x1] %vm1148_vm8, %v974_v32  ;;  %v884_v58 = vadd.f32 %v4520_v38, %v865_v10  ;;  %v1343_v7 = vrot.slane %v1341_v46, 4  ;;  %v1342_v31 = vsel %vm4478_vm7, %v3635_v17, %v1341_v46 }
  0xef   : > { %1208 = vst.msk [vmem:[%s4531_s23 + $0xd6] sm:$0x1] %vm1148_vm8, %v975_v26  ;;  %v1362_v18 = vunpack.c.l.b16 %v1342_v31 }
  0xf0   : > { %1209 = vst.msk [vmem:[%s4531_s23 + $0xd8] sm:$0x1] %vm1148_vm8, %v976_v34  ;;  %v900_v42 = vmax.f32 %v884_v58, 0.0  ;;  %v545_v3 = vpop.f32.mrf.mxu0  ;;  %v1345_v26 = vsel %vm4478_vm7, %v1343_v7, %v1344_v29  ;;  %v1576_v7 = vrot.slane %v4438_v24, 5 }
  0xf1   : > { %1210 = vst.msk [vmem:[%s4531_s23 + $0xda] sm:$0x1] %vm1148_vm8, %v977_v56  ;;  %v820_v35 = vpop.f32.mrf.mxu3  ;;  %v725_v36 = vpop.f32.mrf.mxu2  ;;  %v662_v11 = vadd.f32 %v661_v8, %v545_v3  ;;  %v1363_v59 = vunpack.c.l.b16 %v1345_v26 }
  0xf2   : > { %1211 = vst.msk [vmem:[%s4531_s23 + $0xdc] sm:$0x1] %vm1148_vm8, %v978_v22  ;;  %v980_v0 = vrot.slane %v900_v42, 1  ;;  %v981_v60 = vrot.slane %v900_v42, 2  ;;  %v982_v21 = vrot.slane %v900_v42, 3  ;;  %v847_v37 = vadd.f32 %v820_v35, %v747_v50 }
  0xf3   : > { %1212 = vst.msk [vmem:[%s4531_s23 + $0xde] sm:$0x1] %vm1148_vm8, %v979_v61  ;;  %3642 = vmatmul.msk.bf16.gmra.mxu0 %vm482_vm1, %v4698_v5  ;;  %v983_v9 = vrot.slane %v900_v42, 4  ;;  %v984_v19 = vrot.slane %v900_v42, 5  ;;  %v985_v48 = vrot.slane %v900_v42, 6  ;;  %v748_v20 = vadd.f32 %v723_v25, %v662_v11 }
  0xf4   : > { %1213 = vst.msk [vmem:[%s4531_s23 + $0x100] sm:$0x1] %vm1148_vm8, %v900_v42  ;;  %v666_v49 = vpop.f32.mrf.mxu1  ;;  %v866_v8 = vmul.f32 %v4515_v44, %v847_v37  ;;  %v986_v13 = vrot.slane %v900_v42, 7 }
  0xf5   : > { %1214 = vst.msk [vmem:[%s4531_s23 + $0x102] sm:$0x1] %vm1148_vm8, %v980_v0 }
  0xf6   : > { %1215 = vst.msk [vmem:[%s4531_s23 + $0x104] sm:$0x1] %vm1148_vm8, %v981_v60  ;;  %3669 = vmatmul.msk.bf16.gmra.mxu3 %vm482_vm1, %v4754_v27  ;;  %3660 = vmatmul.msk.bf16.gmra.mxu2 %vm482_vm1, %v4443_v28  ;;  %v885_v63 = vadd.f32 %v4520_v38, %v866_v8 }
  0xf7   : > { %1216 = vst.msk [vmem:[%s4531_s23 + $0x106] sm:$0x1] %vm1148_vm8, %v982_v21  ;;  %3651 = vmatmul.msk.bf16.gmra.mxu1 %vm482_vm1, %v4413_v45  ;;  %v4810_v21 = vpack.c.b16 %v1363_v59, %v1362_v18 }
  0xf8   : > { %1217 = vst.msk [vmem:[%s4531_s23 + $0x108] sm:$0x1] %vm1148_vm8, %v983_v9  ;;  %v547_v23 = vpop.f32.mrf.mxu0  ;;  %v901_v47 = vmax.f32 %v885_v63, 0.0 }
  0xf9   : > { %1218 = vst.msk [vmem:[%s4531_s23 + $0x10a] sm:$0x1] %vm1148_vm8, %v984_v19  ;;  %v823_v15 = vpop.f32.mrf.mxu3  ;;  %v728_v25 = vpop.f32.mrf.mxu2  ;;  %v664_v53 = vadd.f32 %v4738_v52, %v547_v23 }
  0xfa   : > { %1219 = vst.msk [vmem:[%s4531_s23 + $0x10c] sm:$0x1] %vm1148_vm8, %v985_v48  ;;  %v848_v33 = vadd.f32 %v823_v15, %v748_v20  ;;  %v987_v43 = vrot.slane %v901_v47, 1  ;;  %v988_v2 = vrot.slane %v901_v47, 2  ;;  %v989_v32 = vrot.slane %v901_v47, 3 }
  0xfb   : > { %1220 = vst.msk [vmem:[%s4531_s23 + $0x10e] sm:$0x1] %vm1148_vm8, %v986_v13  ;;  %v990_v30 = vrot.slane %v901_v47, 4  ;;  %v991_v56 = vrot.slane %v901_v47, 5  ;;  %v992_v22 = vrot.slane %v901_v47, 6  ;;  %v993_v61 = vrot.slane %v901_v47, 7 }
  0xfc   : > { %1221 = vst.msk [vmem:[%s4531_s23 + $0x110] sm:$0x1] %vm1148_vm8, %v901_v47  ;;  %v867_v34 = vmul.f32 %v4515_v44, %v848_v33  ;;  %v4794_v10 = vpop.f32.mrf.mxu1  ;;  %v749_v50 = vadd.f32 %v725_v36, %v664_v53  ;;  %v1573_v36 = vrot.slane %v4426_v55, 5  ;;  %v3662_v55 = vrot.slane %v4423_v54, 9 }
  0xfd   : > { %1222 = vst.msk [vmem:[%s4531_s23 + $0x112] sm:$0x1] %vm1148_vm8, %v987_v43 }
  0xfe   : > { %1223 = vst.msk [vmem:[%s4531_s23 + $0x114] sm:$0x1] %vm1148_vm8, %v988_v2  ;;  %v886_v58 = vadd.f32 %v4520_v38, %v867_v34  ;;  %v1575_v63 = vrot.slane %v1573_v36, 4 }
  0xff   : > { %1224 = vst.msk [vmem:[%s4531_s23 + $0x116] sm:$0x1] %vm1148_vm8, %v989_v32 }
 0x100   : > { %1225 = vst.msk [vmem:[%s4531_s23 + $0x118] sm:$0x1] %vm1148_vm8, %v990_v30  ;;  %v902_v42 = vmax.f32 %v886_v58, 0.0  ;;  %v550_v3 = vpop.f32.mrf.mxu0  ;;  %v1577_v43 = vsel %vm4478_vm7, %v1575_v63, %v1576_v7  ;;  %v3840_v7 = vld [vmem:[%s6048_s1 + $0x18] sm:$0x3] }
 0x101   : > { %1226 = vst.msk [vmem:[%s4531_s23 + $0x11a] sm:$0x1] %vm1148_vm8, %v991_v56  ;;  %v825_v52 = vpop.f32.mrf.mxu3  ;;  %v730_v35 = vpop.f32.mrf.mxu2  ;;  %v667_v11 = vadd.f32 %v666_v49, %v550_v3  ;;  %v1581_v58 = vunpack.c.l.b16 %v1577_v43 }
 0x102   : > { %1227 = vst.msk [vmem:[%s4531_s23 + $0x11c] sm:$0x1] %vm1148_vm8, %v992_v22  ;;  %v994_v0 = vrot.slane %v902_v42, 1  ;;  %v995_v60 = vrot.slane %v902_v42, 2  ;;  %v996_v37 = vrot.slane %v902_v42, 3  ;;  %v849_v46 = vadd.f32 %v825_v52, %v749_v50 }
 0x103   : > { %1228 = vst.msk [vmem:[%s4531_s23 + $0x11e] sm:$0x1] %vm1148_vm8, %v993_v61  ;;  %3643 = vmatmul.msk.bf16.gmra.mxu0 %vm482_vm1, %v4754_v27  ;;  %v997_v9 = vrot.slane %v902_v42, 4  ;;  %v998_v8 = vrot.slane %v902_v42, 5  ;;  %v999_v48 = vrot.slane %v902_v42, 6  ;;  %v750_v20 = vadd.f32 %v728_v25, %v667_v11 }
 0x104   : > { %1229 = vst.msk [vmem:[%s4531_s23 + $0x140] sm:$0x1] %vm1148_vm8, %v902_v42  ;;  %v671_v19 = vpop.f32.mrf.mxu1  ;;  %v868_v49 = vmul.f32 %v4515_v44, %v849_v46  ;;  %v1000_v17 = vrot.slane %v902_v42, 7  ;;  %v1574_v25 = vsel %vm4478_vm7, %v3662_v55, %v1573_v36 }
 0x105   : > { %1230 = vst.msk [vmem:[%s4531_s23 + $0x142] sm:$0x1] %vm1148_vm8, %v994_v0  ;;  %v1580_v22 = vunpack.c.l.b16 %v1574_v25 }
 0x106   : > { %1231 = vst.msk [vmem:[%s4531_s23 + $0x144] sm:$0x1] %vm1148_vm8, %v995_v60  ;;  %3670 = vmatmul.msk.bf16.gmra.mxu3 %vm482_vm1, %v4810_v21  ;;  %3661 = vmatmul.msk.bf16.gmra.mxu2 %vm482_vm1, %v4471_v6  ;;  %v887_v13 = vadd.f32 %v4520_v38, %v868_v49 }
 0x107   : > { %1232 = vst.msk [vmem:[%s4531_s23 + $0x146] sm:$0x1] %vm1148_vm8, %v996_v37  ;;  %3652 = vmatmul.msk.bf16.gmra.mxu1 %vm482_vm1, %v4443_v28  ;;  %v4868_v60 = vpack.c.b16 %v1581_v58, %v1580_v22 }
 0x108   : > { %1233 = vst.msk [vmem:[%s4531_s23 + $0x148] sm:$0x1] %vm1148_vm8, %v997_v9  ;;  %v552_v29 = vpop.f32.mrf.mxu0  ;;  %v903_v23 = vmax.f32 %v887_v13, 0.0  ;;  %v3858_v9 = vld [vmem:[%s6048_s1 + $0x1c] sm:$0x3] }
 0x109   : > { %1234 = vst.msk [vmem:[%s4531_s23 + $0x14a] sm:$0x1] %vm1148_vm8, %v998_v8  ;;  %v828_v54 = vpop.f32.mrf.mxu3  ;;  %v733_v47 = vpop.f32.mrf.mxu2  ;;  %v669_v34 = vadd.f32 %v4794_v10, %v552_v29  ;;  %v2884_v49 = vsel %vm507_vm0, %v3858_v9, 0  ;;  %v4895_v13 = vld [vmem:[%s4211_s24 + $0x18] sm:$0xff] }
 0x10a   : > { %1235 = vst.msk [vmem:[%s4531_s23 + $0x14c] sm:$0x1] %vm1148_vm8, %v999_v48  ;;  %v850_v15 = vadd.f32 %v828_v54, %v750_v20  ;;  %v1001_v24 = vrot.slane %v903_v23, 1  ;;  %v1002_v33 = vrot.slane %v903_v23, 2  ;;  %v1003_v31 = vrot.slane %v903_v23, 3  ;;  %v4062_v54 = vld [vmem:[%s4211_s24 + $0xc] sm:$0xff]  ;;  %2893 = vmatpush.bf16.msrb.mxu2 %v2884_v49 }
 0x10b   : > { %1236 = vst.msk [vmem:[%s4531_s23 + $0x14e] sm:$0x1] %vm1148_vm8, %v1000_v17  ;;  %v1004_v2 = vrot.slane %v903_v23, 4  ;;  %v1005_v30 = vrot.slane %v903_v23, 5  ;;  %v1006_v56 = vrot.slane %v903_v23, 6  ;;  %v1007_v18 = vrot.slane %v903_v23, 7 }
 0x10c   : > { %1237 = vst.msk [vmem:[%s4531_s23 + $0x150] sm:$0x1] %vm1148_vm8, %v903_v23  ;;  %v869_v32 = vmul.f32 %v4515_v44, %v850_v15  ;;  %v4850_v26 = vpop.f32.mrf.mxu1  ;;  %v751_v42 = vadd.f32 %v730_v35, %v669_v34  ;;  %v3841_v20 = vld [vmem:[%s6048_s1 + $0x1a] sm:$0x3]  ;;  %v4063_v49 = vld [vmem:[%s4211_s24 + $0x24] sm:$0xff] }
 0x10d   : > { %1238 = vst.msk [vmem:[%s4531_s23 + $0x152] sm:$0x1] %vm1148_vm8, %v1001_v24  ;;  %v2778_v63 = vsel %vm507_vm0, %v3841_v20, 0 }
 0x10e   : > { %1239 = vst.msk [vmem:[%s4531_s23 + $0x154] sm:$0x1] %vm1148_vm8, %v1002_v33  ;;  %v888_v53 = vadd.f32 %v4520_v38, %v869_v32  ;;  %2787 = vmatpush.bf16.msrb.mxu0 %v2778_v63 }
 0x10f   : > { %1240 = vst.msk [vmem:[%s4531_s23 + $0x156] sm:$0x1] %vm1148_vm8, %v1003_v31 }
 0x110   : > { %1241 = vst.msk [vmem:[%s4531_s23 + $0x158] sm:$0x1] %vm1148_vm8, %v1004_v2  ;;  %v904_v59 = vmax.f32 %v888_v53, 0.0  ;;  %v555_v61 = vpop.f32.mrf.mxu0 }
 0x111   : > { %1242 = vst.msk [vmem:[%s4531_s23 + $0x15a] sm:$0x1] %vm1148_vm8, %v1005_v30  ;;  %v830_v10 = vpop.f32.mrf.mxu3  ;;  %v4864_v3 = vpop.f32.mrf.mxu2  ;;  %v672_v0 = vadd.f32 %v671_v19, %v555_v61  ;;  %v3868_v19 = vld [vmem:[%s6048_s1 + $0x1e] sm:$0x3] }
 0x112   : > { %1243 = vst.msk [vmem:[%s4531_s23 + $0x15c] sm:$0x1] %vm1148_vm8, %v1006_v56  ;;  %v1008_v50 = vrot.slane %v904_v59, 1  ;;  %v1009_v52 = vrot.slane %v904_v59, 2  ;;  %v1010_v11 = vrot.slane %v904_v59, 3  ;;  %v1011_v37 = vrot.slane %v904_v59, 4 }
 0x113   : > { %1244 = vst.msk [vmem:[%s4531_s23 + $0x15e] sm:$0x1] %vm1148_vm8, %v1007_v18  ;;  %v1012_v46 = vrot.slane %v904_v59, 5  ;;  %v851_v36 = vadd.f32 %v830_v10, %v751_v42  ;;  %3644 = vmatmul.msk.bf16.gmra.mxu0 %vm482_vm1, %v4810_v21  ;;  %v2968_v48 = vsel %vm507_vm0, %v3868_v19, 0  ;;  %v1013_v55 = vrot.slane %v904_v59, 6 }
 0x114   : > { %1245 = vst.msk [vmem:[%s4531_s23 + $0x180] sm:$0x1] %vm1148_vm8, %v904_v59  ;;  %v1460_v35 = vpop.f32.mrf.mxu1  ;;  %v752_v17 = vadd.f32 %v733_v47, %v672_v0  ;;  %v1014_v29 = vrot.slane %v904_v59, 7  ;;  %v2830_v47 = vsel %vm507_vm0, %v3840_v7, 0  ;;  %2977 = vmatpush.bf16.msrb.mxu3 %v2968_v48 }
 0x115   : > { %1246 = vst.msk [vmem:[%s4531_s23 + $0x182] sm:$0x1] %vm1148_vm8, %v1008_v50  ;;  %v870_v8 = vmul.f32 %v4515_v44, %v851_v36  ;;  %2839 = vmatpush.bf16.msrb.mxu1 %v2830_v47 }
 0x116   : > { %1247 = vst.msk [vmem:[%s4531_s23 + $0x184] sm:$0x1] %vm1148_vm8, %v1009_v52  ;;  %3671 = vmatmul.msk.bf16.gmra.mxu3 %vm482_vm1, %v4868_v60  ;;  %3695 = vmatmul.msk.bf16.vlgmr.msra.gmra.mxu2 %vm482_vm1, %v4895_v13 }
 0x117   : > { %1248 = vst.msk [vmem:[%s4531_s23 + $0x186] sm:$0x1] %vm1148_vm8, %v1010_v11  ;;  %v889_v23 = vadd.f32 %v4520_v38, %v870_v8  ;;  %3682 = vmatmul.msk.bf16.vlgmr.msra.gmra.mxu1 %vm482_vm1, %v4062_v54 }
 0x118   : > { %1249 = vst.msk [vmem:[%s4531_s23 + $0x188] sm:$0x1] %vm1148_vm8, %v1011_v37  ;;  %v557_v15 = vpop.f32.mrf.mxu0 }
 0x119   : > { %1250 = vst.msk [vmem:[%s4531_s23 + $0x18a] sm:$0x1] %vm1148_vm8, %v1012_v46  ;;  %v905_v25 = vmax.f32 %v889_v23, 0.0  ;;  %v833_v24 = vpop.f32.mrf.mxu3  ;;  %v1514_v33 = vpop.f32.mrf.mxu2  ;;  %v674_v22 = vadd.f32 %v4850_v26, %v557_v15 }
 0x11a   : > { %1251 = vst.msk [vmem:[%s4531_s23 + $0x18c] sm:$0x1] %vm1148_vm8, %v1013_v55  ;;  %v852_v31 = vadd.f32 %v833_v24, %v752_v17 }
 0x11b   : > { %1252 = vst.msk [vmem:[%s4531_s23 + $0x18e] sm:$0x1] %vm1148_vm8, %v1014_v29  ;;  %v1015_v43 = vrot.slane %v905_v25, 1  ;;  %v1016_v2 = vrot.slane %v905_v25, 2  ;;  %v1017_v32 = vrot.slane %v905_v25, 3  ;;  %v1018_v30 = vrot.slane %v905_v25, 4 }
 0x11c   : > { %1253 = vst.msk [vmem:[%s4531_s23 + $0x190] sm:$0x1] %vm1148_vm8, %v905_v25  ;;  %v871_v34 = vmul.f32 %v4515_v44, %v852_v31  ;;  %v1462_v56 = vpop.f32.mrf.mxu1  ;;  %v1019_v53 = vrot.slane %v905_v25, 5  ;;  %v1020_v58 = vrot.slane %v905_v25, 6  ;;  %v1021_v59 = vrot.slane %v905_v25, 7 }
 0x11d   : > { %1254 = vst.msk [vmem:[%s4531_s23 + $0x192] sm:$0x1] %vm1148_vm8, %v1015_v43  ;;  %v753_v10 = vadd.f32 %v4864_v3, %v674_v22 }
 0x11e   : > { %1255 = vst.msk [vmem:[%s4531_s23 + $0x194] sm:$0x1] %vm1148_vm8, %v1016_v2  ;;  %v890_v18 = vadd.f32 %v4520_v38, %v871_v34 }
 0x11f   : > { %1256 = vst.msk [vmem:[%s4531_s23 + $0x196] sm:$0x1] %vm1148_vm8, %v1017_v32 }
 0x120   : > { %1257 = vst.msk [vmem:[%s4531_s23 + $0x198] sm:$0x1] %vm1148_vm8, %v1018_v30  ;;  %v906_v61 = vmax.f32 %v890_v18, 0.0  ;;  %v1408_v42 = vpop.f32.mrf.mxu0 }
 0x121   : > { %1258 = vst.msk [vmem:[%s4531_s23 + $0x19a] sm:$0x1] %vm1148_vm8, %v1019_v53  ;;  %v835_v26 = vpop.f32.mrf.mxu3  ;;  %v1516_v50 = vpop.f32.mrf.mxu2  ;;  %v1461_v11 = vadd.f32 %v1460_v35, %v1408_v42 }
 0x122   : > { %1259 = vst.msk [vmem:[%s4531_s23 + $0x19c] sm:$0x1] %vm1148_vm8, %v1020_v58  ;;  %v1022_v52 = vrot.slane %v906_v61, 1  ;;  %v1023_v0 = vrot.slane %v906_v61, 2  ;;  %v1024_v37 = vrot.slane %v906_v61, 3  ;;  %v853_v46 = vadd.f32 %v835_v26, %v753_v10 }
 0x123   : > { %1260 = vst.msk [vmem:[%s4531_s23 + $0x19e] sm:$0x1] %vm1148_vm8, %v1021_v59  ;;  %3674 = vmatmul.msk.bf16.vlgmr.msra.gmra.mxu0 %vm482_vm1, %v4281_v12  ;;  %v1025_v36 = vrot.slane %v906_v61, 4  ;;  %v1026_v9 = vrot.slane %v906_v61, 5  ;;  %v1027_v35 = vrot.slane %v906_v61, 6  ;;  %v1554_v8 = vadd.f32 %v1514_v33, %v1461_v11 }
 0x124   : > { %1261 = vst.msk [vmem:[%s4531_s23 + $0x1c0] sm:$0x1] %vm1148_vm8, %v906_v61  ;;  %v1465_v3 = vpop.f32.mrf.mxu1  ;;  %v872_v19 = vmul.f32 %v4515_v44, %v853_v46  ;;  %v1028_v48 = vrot.slane %v906_v61, 7  ;;  %v4990_v10 = vld [vmem:[%s6049_s2] ss:$0 sm:$0xff] }
 0x125   : > { %1262 = vst.msk [vmem:[%s4531_s23 + $0x1c2] sm:$0x1] %vm1148_vm8, %v1022_v52 }
 0x126   : > { %1263 = vst.msk [vmem:[%s4531_s23 + $0x1c4] sm:$0x1] %vm1148_vm8, %v1023_v0  ;;  %3704 = vmatmul.msk.bf16.vlgmr.msra.gmra.mxu3 %vm482_vm1, %v4305_v40  ;;  %3696 = vmatmul.msk.bf16.gmra.mxu2 %vm482_vm1, %v4063_v49  ;;  %v891_v20 = vadd.f32 %v4520_v38, %v872_v19  ;;  %v4065_v0 = vld [vmem:[%s4211_s24 + $0x30] sm:$0xff] }
 0x127   : > { %1264 = vst.msk [vmem:[%s4531_s23 + $0x1c6] sm:$0x1] %vm1148_vm8, %v1024_v37  ;;  %3683 = vmatmul.msk.bf16.gmra.mxu1 %vm482_vm1, %v4895_v13  ;;  %v5004_v37 = vld [vmem:[%s6050_s3] ss:$0 sm:$0xff] }
 0x128   : > { %1265 = vst.msk [vmem:[%s4531_s23 + $0x1c8] sm:$0x1] %vm1148_vm8, %v1025_v36  ;;  %v1410_v55 = vpop.f32.mrf.mxu0  ;;  %v907_v17 = vmax.f32 %v891_v20, 0.0 }
 0x129   : > { %1266 = vst.msk [vmem:[%s4531_s23 + $0x1ca] sm:$0x1] %vm1148_vm8, %v1026_v9  ;;  %v1598_v63 = vpop.f32.mrf.mxu3  ;;  %v1519_v7 = vpop.f32.mrf.mxu2  ;;  %v1463_v33 = vadd.f32 %v1462_v56, %v1410_v55 }
 0x12a   : > { %1267 = vst.msk [vmem:[%s4531_s23 + $0x1cc] sm:$0x1] %vm1148_vm8, %v1027_v35  ;;  %v1638_v29 = vadd.f32 %v1598_v63, %v1554_v8  ;;  %v1029_v23 = vrot.slane %v907_v17, 1  ;;  %v1030_v54 = vrot.slane %v907_v17, 2  ;;  %v1031_v13 = vrot.slane %v907_v17, 3 }
 0x12b   : > { %1268 = vst.msk [vmem:[%s4531_s23 + $0x1ce] sm:$0x1] %vm1148_vm8, %v1028_v48  ;;  %v1032_v47 = vrot.slane %v907_v17, 4  ;;  %v1033_v24 = vrot.slane %v907_v17, 5  ;;  %v1034_v31 = vrot.slane %v907_v17, 6  ;;  %v1035_v2 = vrot.slane %v907_v17, 7 }
 0x12c   : > { %1269 = vst.msk [vmem:[%s4531_s23 + $0x1d0] sm:$0x1] %vm1148_vm8, %v907_v17  ;;  %v1654_v15 = vmul.f32 %v4515_v44, %v1638_v29  ;;  %v1467_v25 = vpop.f32.mrf.mxu1  ;;  %v1555_v30 = vadd.f32 %v1516_v50, %v1463_v33 }
 0x12d   : > { %1270 = vst.msk [vmem:[%s4531_s23 + $0x1d2] sm:$0x1] %vm1148_vm8, %v1029_v23 }
 0x12e   : > { %1271 = vst.msk [vmem:[%s4531_s23 + $0x1d4] sm:$0x1] %vm1148_vm8, %v1030_v54  ;;  %v1670_v43 = vadd.f32 %v4520_v38, %v1654_v15 }
 0x12f   : > { %1272 = vst.msk [vmem:[%s4531_s23 + $0x1d6] sm:$0x1] %vm1148_vm8, %v1031_v13 }
 0x130   : > { %1273 = vst.msk [vmem:[%s4531_s23 + $0x1d8] sm:$0x1] %vm1148_vm8, %v1032_v47  ;;  %v1686_v32 = vmax.f32 %v1670_v43, 0.0  ;;  %v1413_v44 = vpop.f32.mrf.mxu0 }
 0x131   : > { %1274 = vst.msk [vmem:[%s4531_s23 + $0x1da] sm:$0x1] %vm1148_vm8, %v1033_v24  ;;  %v1600_v34 = vpop.f32.mrf.mxu3  ;;  %v1521_v56 = vpop.f32.mrf.mxu2  ;;  %v1466_v38 = vadd.f32 %v1465_v3, %v1413_v44 }
 0x132   : > { %1275 = vst.msk [vmem:[%s4531_s23 + $0x1dc] sm:$0x1] %vm1148_vm8, %v1034_v31  ;;  %v1718_v53 = vrot.slane %v1686_v32, 1  ;;  %v1719_v22 = vrot.slane %v1686_v32, 2  ;;  %v1720_v58 = vrot.slane %v1686_v32, 3  ;;  %v1639_v18 = vadd.f32 %v1600_v34, %v1555_v30 }
 0x133   : > { %1276 = vst.msk [vmem:[%s4531_s23 + $0x1de] sm:$0x1] %vm1148_vm8, %v1035_v2  ;;  %3675 = vmatmul.msk.bf16.gmra.mxu0 %vm482_vm1, %v4305_v40  ;;  %v1721_v59 = vrot.slane %v1686_v32, 4  ;;  %v1722_v42 = vrot.slane %v1686_v32, 5  ;;  %v1723_v50 = vrot.slane %v1686_v32, 6  ;;  %v1556_v52 = vadd.f32 %v1519_v7, %v1466_v38  ;;  %v4067_v38 = vld [vmem:[%s4211_s24 + $0x3c] sm:$0xff] }
 0x134   : > { %1942 = vst.msk [vmem:[%s4531_s23 + $0x1] sm:$0x1] %vm1148_vm8, %v1686_v32  ;;  %v1470_v61 = vpop.f32.mrf.mxu1  ;;  %v1655_v26 = vmul.f32 %v4990_v10, %v1639_v18  ;;  %v1724_v11 = vrot.slane %v1686_v32, 7 }
 0x135   : > { %1943 = vst.msk [vmem:[%s4531_s23 + $0x3] sm:$0x1] %vm1148_vm8, %v1718_v53 }
 0x136   : > { %1944 = vst.msk [vmem:[%s4531_s23 + $0x5] sm:$0x1] %vm1148_vm8, %v1719_v22  ;;  %3705 = vmatmul.msk.bf16.gmra.mxu3 %vm482_vm1, %v4332_v1  ;;  %3697 = vmatmul.msk.bf16.gmra.mxu2 %vm482_vm1, %v4065_v0  ;;  %v1671_v46 = vadd.f32 %v5004_v37, %v1655_v26 }
 0x137   : > { %1945 = vst.msk [vmem:[%s4531_s23 + $0x7] sm:$0x1] %vm1148_vm8, %v1720_v58  ;;  %3684 = vmatmul.msk.bf16.gmra.mxu1 %vm482_vm1, %v4063_v49 }
 0x138   : > { %1946 = vst.msk [vmem:[%s4531_s23 + $0x9] sm:$0x1] %vm1148_vm8, %v1721_v59  ;;  %v1415_v36 = vpop.f32.mrf.mxu0  ;;  %v1687_v3 = vmax.f32 %v1671_v46, 0.0 }
 0x139   : > { %1947 = vst.msk [vmem:[%s4531_s23 + $0xb] sm:$0x1] %vm1148_vm8, %v1722_v42  ;;  %v1603_v9 = vpop.f32.mrf.mxu3  ;;  %v1524_v19 = vpop.f32.mrf.mxu2  ;;  %v1468_v7 = vadd.f32 %v1467_v25, %v1415_v36 }
 0x13a   : > { %1948 = vst.msk [vmem:[%s4531_s23 + $0xd] sm:$0x1] %vm1148_vm8, %v1723_v50  ;;  %v1640_v35 = vadd.f32 %v1603_v9, %v1556_v52  ;;  %v1725_v8 = vrot.slane %v1687_v3, 1  ;;  %v1726_v48 = vrot.slane %v1687_v3, 2  ;;  %v1727_v49 = vrot.slane %v1687_v3, 3 }
 0x13b   : > { %1949 = vst.msk [vmem:[%s4531_s23 + $0xf] sm:$0x1] %vm1148_vm8, %v1724_v11  ;;  %v1728_v20 = vrot.slane %v1687_v3, 4  ;;  %v1729_v63 = vrot.slane %v1687_v3, 5  ;;  %v1730_v29 = vrot.slane %v1687_v3, 6  ;;  %v1731_v54 = vrot.slane %v1687_v3, 7 }
 0x13c   : > { %1950 = vst.msk [vmem:[%s4531_s23 + $0x11] sm:$0x1] %vm1148_vm8, %v1687_v3  ;;  %v1656_v55 = vmul.f32 %v4990_v10, %v1640_v35  ;;  %v1472_v17 = vpop.f32.mrf.mxu1  ;;  %v1557_v15 = vadd.f32 %v1521_v56, %v1468_v7 }
 0x13d   : > { %1951 = vst.msk [vmem:[%s4531_s23 + $0x13] sm:$0x1] %vm1148_vm8, %v1725_v8 }
 0x13e   : > { %1952 = vst.msk [vmem:[%s4531_s23 + $0x15] sm:$0x1] %vm1148_vm8, %v1726_v48  ;;  %v1672_v23 = vadd.f32 %v5004_v37, %v1656_v55 }
 0x13f   : > { %1953 = vst.msk [vmem:[%s4531_s23 + $0x17] sm:$0x1] %vm1148_vm8, %v1727_v49 }
 0x140   : > { %1954 = vst.msk [vmem:[%s4531_s23 + $0x19] sm:$0x1] %vm1148_vm8, %v1728_v20  ;;  %v1688_v13 = vmax.f32 %v1672_v23, 0.0  ;;  %v1418_v47 = vpop.f32.mrf.mxu0 }
 0x141   : > { %1955 = vst.msk [vmem:[%s4531_s23 + $0x1b] sm:$0x1] %vm1148_vm8, %v1729_v63  ;;  %v1605_v24 = vpop.f32.mrf.mxu3  ;;  %v1526_v25 = vpop.f32.mrf.mxu2  ;;  %v1471_v43 = vadd.f32 %v1470_v61, %v1418_v47 }
 0x142   : > { %1956 = vst.msk [vmem:[%s4531_s23 + $0x1d] sm:$0x1] %vm1148_vm8, %v1730_v29  ;;  %v1732_v33 = vrot.slane %v1688_v13, 1  ;;  %v1733_v31 = vrot.slane %v1688_v13, 2  ;;  %v1734_v2 = vrot.slane %v1688_v13, 3  ;;  %v1641_v32 = vadd.f32 %v1605_v24, %v1557_v15 }
 0x143   : > { %1957 = vst.msk [vmem:[%s4531_s23 + $0x1f] sm:$0x1] %vm1148_vm8, %v1731_v54  ;;  %3676 = vmatmul.msk.bf16.gmra.mxu0 %vm482_vm1, %v4332_v1  ;;  %v1735_v44 = vrot.slane %v1688_v13, 4  ;;  %v1736_v34 = vrot.slane %v1688_v13, 5  ;;  %v1737_v53 = vrot.slane %v1688_v13, 6  ;;  %v1558_v22 = vadd.f32 %v1524_v19, %v1471_v43  ;;  %v4068_v43 = vld [vmem:[%s4211_s24 + $0x48] sm:$0xff] }
 0x144   : > { %1958 = vst.msk [vmem:[%s4531_s23 + $0x41] sm:$0x1] %vm1148_vm8, %v1688_v13  ;;  %v1475_v30 = vpop.f32.mrf.mxu1  ;;  %v1657_v56 = vmul.f32 %v4990_v10, %v1641_v32  ;;  %v1738_v58 = vrot.slane %v1688_v13, 7 }
 0x145   : > { %1959 = vst.msk [vmem:[%s4531_s23 + $0x43] sm:$0x1] %vm1148_vm8, %v1732_v33 }
 0x146   : > { %1960 = vst.msk [vmem:[%s4531_s23 + $0x45] sm:$0x1] %vm1148_vm8, %v1733_v31  ;;  %3706 = vmatmul.msk.bf16.gmra.mxu3 %vm482_vm1, %v4360_v41  ;;  %3698 = vmatmul.msk.bf16.gmra.mxu2 %vm482_vm1, %v4067_v38  ;;  %v1673_v18 = vadd.f32 %v5004_v37, %v1657_v56 }
 0x147   : > { %1961 = vst.msk [vmem:[%s4531_s23 + $0x47] sm:$0x1] %vm1148_vm8, %v1734_v2  ;;  %3685 = vmatmul.msk.bf16.gmra.mxu1 %vm482_vm1, %v4065_v0 }
 0x148   : > { %1962 = vst.msk [vmem:[%s4531_s23 + $0x49] sm:$0x1] %vm1148_vm8, %v1735_v44  ;;  %v1420_v59 = vpop.f32.mrf.mxu0  ;;  %v1689_v61 = vmax.f32 %v1673_v18, 0.0 }
 0x149   : > { %1963 = vst.msk [vmem:[%s4531_s23 + $0x4b] sm:$0x1] %vm1148_vm8, %v1736_v34  ;;  %v1608_v42 = vpop.f32.mrf.mxu3  ;;  %v1529_v26 = vpop.f32.mrf.mxu2  ;;  %v1473_v19 = vadd.f32 %v1472_v17, %v1420_v59 }
 0x14a   : > { %1964 = vst.msk [vmem:[%s4531_s23 + $0x4d] sm:$0x1] %vm1148_vm8, %v1737_v53  ;;  %v1642_v50 = vadd.f32 %v1608_v42, %v1558_v22  ;;  %v1739_v52 = vrot.slane %v1689_v61, 1  ;;  %v1740_v11 = vrot.slane %v1689_v61, 2  ;;  %v1741_v0 = vrot.slane %v1689_v61, 3 }
 0x14b   : > { %1965 = vst.msk [vmem:[%s4531_s23 + $0x4f] sm:$0x1] %vm1148_vm8, %v1738_v58  ;;  %v1742_v46 = vrot.slane %v1689_v61, 4  ;;  %v1743_v9 = vrot.slane %v1689_v61, 5  ;;  %v1744_v35 = vrot.slane %v1689_v61, 6  ;;  %v1745_v48 = vrot.slane %v1689_v61, 7 }
 0x14c   : > { %1966 = vst.msk [vmem:[%s4531_s23 + $0x51] sm:$0x1] %vm1148_vm8, %v1689_v61  ;;  %v1658_v36 = vmul.f32 %v4990_v10, %v1642_v50  ;;  %v1477_v3 = vpop.f32.mrf.mxu1  ;;  %v1559_v55 = vadd.f32 %v1526_v25, %v1473_v19 }
 0x14d   : > { %1967 = vst.msk [vmem:[%s4531_s23 + $0x53] sm:$0x1] %vm1148_vm8, %v1739_v52 }
 0x14e   : > { %1968 = vst.msk [vmem:[%s4531_s23 + $0x55] sm:$0x1] %vm1148_vm8, %v1740_v11  ;;  %v1674_v8 = vadd.f32 %v5004_v37, %v1658_v36 }
 0x14f   : > { %1969 = vst.msk [vmem:[%s4531_s23 + $0x57] sm:$0x1] %vm1148_vm8, %v1741_v0 }
 0x150   : > { %1970 = vst.msk [vmem:[%s4531_s23 + $0x59] sm:$0x1] %vm1148_vm8, %v1742_v46  ;;  %v1690_v49 = vmax.f32 %v1674_v8, 0.0  ;;  %v1423_v20 = vpop.f32.mrf.mxu0 }
 0x151   : > { %1971 = vst.msk [vmem:[%s4531_s23 + $0x5b] sm:$0x1] %vm1148_vm8, %v1743_v9  ;;  %v1610_v63 = vpop.f32.mrf.mxu3  ;;  %v1531_v17 = vpop.f32.mrf.mxu2  ;;  %v1476_v23 = vadd.f32 %v1475_v30, %v1423_v20 }
 0x152   : > { %1972 = vst.msk [vmem:[%s4531_s23 + $0x5d] sm:$0x1] %vm1148_vm8, %v1744_v35  ;;  %v1746_v7 = vrot.slane %v1690_v49, 1  ;;  %v1747_v29 = vrot.slane %v1690_v49, 2  ;;  %v1748_v54 = vrot.slane %v1690_v49, 3  ;;  %v1643_v13 = vadd.f32 %v1610_v63, %v1559_v55 }
 0x153   : > { %1973 = vst.msk [vmem:[%s4531_s23 + $0x5f] sm:$0x1] %vm1148_vm8, %v1745_v48  ;;  %3677 = vmatmul.msk.bf16.gmra.mxu0 %vm482_vm1, %v4360_v41  ;;  %v1749_v47 = vrot.slane %v1690_v49, 4  ;;  %v1750_v24 = vrot.slane %v1690_v49, 5  ;;  %v1751_v33 = vrot.slane %v1690_v49, 6  ;;  %v1560_v31 = vadd.f32 %v1529_v26, %v1476_v23  ;;  %v4069_v23 = vld [vmem:[%s4211_s24 + $0x54] sm:$0xff] }
 0x154   : > { %1974 = vst.msk [vmem:[%s4531_s23 + $0x81] sm:$0x1] %vm1148_vm8, %v1690_v49  ;;  %v1480_v15 = vpop.f32.mrf.mxu1  ;;  %v1659_v25 = vmul.f32 %v4990_v10, %v1643_v13  ;;  %v1752_v2 = vrot.slane %v1690_v49, 7 }
 0x155   : > { %1975 = vst.msk [vmem:[%s4531_s23 + $0x83] sm:$0x1] %vm1148_vm8, %v1746_v7 }
 0x156   : > { %1976 = vst.msk [vmem:[%s4531_s23 + $0x85] sm:$0x1] %vm1148_vm8, %v1747_v29  ;;  %3707 = vmatmul.msk.bf16.gmra.mxu3 %vm482_vm1, %v4386_v4  ;;  %3699 = vmatmul.msk.bf16.gmra.mxu2 %vm482_vm1, %v4068_v43  ;;  %v1675_v32 = vadd.f32 %v5004_v37, %v1659_v25 }
 0x157   : > { %1977 = vst.msk [vmem:[%s4531_s23 + $0x87] sm:$0x1] %vm1148_vm8, %v1748_v54  ;;  %3686 = vmatmul.msk.bf16.gmra.mxu1 %vm482_vm1, %v4067_v38 }
 0x158   : > { %1978 = vst.msk [vmem:[%s4531_s23 + $0x89] sm:$0x1] %vm1148_vm8, %v1749_v47  ;;  %v1425_v44 = vpop.f32.mrf.mxu0  ;;  %v1691_v30 = vmax.f32 %v1675_v32, 0.0 }
 0x159   : > { %1979 = vst.msk [vmem:[%s4531_s23 + $0x8b] sm:$0x1] %vm1148_vm8, %v1750_v24  ;;  %v1613_v34 = vpop.f32.mrf.mxu3  ;;  %v1534_v56 = vpop.f32.mrf.mxu2  ;;  %v1478_v26 = vadd.f32 %v1477_v3, %v1425_v44 }
 0x15a   : > { %1980 = vst.msk [vmem:[%s4531_s23 + $0x8d] sm:$0x1] %vm1148_vm8, %v1751_v33  ;;  %v1644_v53 = vadd.f32 %v1613_v34, %v1560_v31  ;;  %v1753_v22 = vrot.slane %v1691_v30, 1  ;;  %v1754_v58 = vrot.slane %v1691_v30, 2  ;;  %v1755_v38 = vrot.slane %v1691_v30, 3 }
 0x15b   : > { %1981 = vst.msk [vmem:[%s4531_s23 + $0x8f] sm:$0x1] %vm1148_vm8, %v1752_v2  ;;  %v1756_v18 = vrot.slane %v1691_v30, 4  ;;  %v1757_v42 = vrot.slane %v1691_v30, 5  ;;  %v1758_v50 = vrot.slane %v1691_v30, 6  ;;  %v1759_v11 = vrot.slane %v1691_v30, 7 }
 0x15c   : > { %1982 = vst.msk [vmem:[%s4531_s23 + $0x91] sm:$0x1] %vm1148_vm8, %v1691_v30  ;;  %v1660_v59 = vmul.f32 %v4990_v10, %v1644_v53  ;;  %v1482_v61 = vpop.f32.mrf.mxu1  ;;  %v1561_v36 = vadd.f32 %v1531_v17, %v1478_v26 }
 0x15d   : > { %1983 = vst.msk [vmem:[%s4531_s23 + $0x93] sm:$0x1] %vm1148_vm8, %v1753_v22 }
 0x15e   : > { %1984 = vst.msk [vmem:[%s4531_s23 + $0x95] sm:$0x1] %vm1148_vm8, %v1754_v58  ;;  %v1676_v52 = vadd.f32 %v5004_v37, %v1660_v59 }
 0x15f   : > { %1985 = vst.msk [vmem:[%s4531_s23 + $0x97] sm:$0x1] %vm1148_vm8, %v1755_v38 }
 0x160   : > { %1986 = vst.msk [vmem:[%s4531_s23 + $0x99] sm:$0x1] %vm1148_vm8, %v1756_v18  ;;  %v1692_v0 = vmax.f32 %v1676_v52, 0.0  ;;  %v1428_v46 = vpop.f32.mrf.mxu0 }
 0x161   : > { %1987 = vst.msk [vmem:[%s4531_s23 + $0x9b] sm:$0x1] %vm1148_vm8, %v1757_v42  ;;  %v1615_v9 = vpop.f32.mrf.mxu3  ;;  %v1536_v3 = vpop.f32.mrf.mxu2  ;;  %v1481_v8 = vadd.f32 %v1480_v15, %v1428_v46 }
 0x162   : > { %1988 = vst.msk [vmem:[%s4531_s23 + $0x9d] sm:$0x1] %vm1148_vm8, %v1758_v50  ;;  %v1760_v19 = vrot.slane %v1692_v0, 1  ;;  %v1761_v35 = vrot.slane %v1692_v0, 2  ;;  %v1762_v48 = vrot.slane %v1692_v0, 3  ;;  %v1645_v49 = vadd.f32 %v1615_v9, %v1561_v36 }
 0x163   : > { %1989 = vst.msk [vmem:[%s4531_s23 + $0x9f] sm:$0x1] %vm1148_vm8, %v1759_v11  ;;  %3678 = vmatmul.msk.bf16.gmra.mxu0 %vm482_vm1, %v4386_v4  ;;  %v1763_v20 = vrot.slane %v1692_v0, 4  ;;  %v1764_v63 = vrot.slane %v1692_v0, 5  ;;  %v1765_v7 = vrot.slane %v1692_v0, 6  ;;  %v1562_v29 = vadd.f32 %v1534_v56, %v1481_v8  ;;  %v5179_v8 = vld [vmem:[%s4211_s24 + $0x60] sm:$0xff] }
 0x164   : > { %1990 = vst.msk [vmem:[%s4531_s23 + $0xc1] sm:$0x1] %vm1148_vm8, %v1692_v0  ;;  %v1485_v55 = vpop.f32.mrf.mxu1  ;;  %v1661_v17 = vmul.f32 %v4990_v10, %v1645_v49  ;;  %v1766_v54 = vrot.slane %v1692_v0, 7 }
 0x165   : > { %1991 = vst.msk [vmem:[%s4531_s23 + $0xc3] sm:$0x1] %vm1148_vm8, %v1760_v19 }
 0x166   : > { %1992 = vst.msk [vmem:[%s4531_s23 + $0xc5] sm:$0x1] %vm1148_vm8, %v1761_v35  ;;  %3708 = vmatmul.msk.bf16.gmra.mxu3 %vm482_vm1, %v4413_v45  ;;  %3700 = vmatmul.msk.bf16.gmra.mxu2 %vm482_vm1, %v4069_v23  ;;  %v1677_v13 = vadd.f32 %v5004_v37, %v1661_v17 }
 0x167   : > { %1993 = vst.msk [vmem:[%s4531_s23 + $0xc7] sm:$0x1] %vm1148_vm8, %v1762_v48  ;;  %3687 = vmatmul.msk.bf16.gmra.mxu1 %vm482_vm1, %v4068_v43  ;;  %v5184_v48 = vld [vmem:[%s4211_s24 + $0x6c] sm:$0xf] }
 0x168   : > { %1994 = vst.msk [vmem:[%s4531_s23 + $0xc9] sm:$0x1] %vm1148_vm8, %v1763_v20  ;;  %v1430_v47 = vpop.f32.mrf.mxu0  ;;  %v1693_v15 = vmax.f32 %v1677_v13, 0.0  ;;  %v2257_v13 = vshrl.u32 %v5184_v48, 16 }
 0x169   : > { %1995 = vst.msk [vmem:[%s4531_s23 + $0xcb] sm:$0x1] %vm1148_vm8, %v1764_v63  ;;  %v1618_v24 = vpop.f32.mrf.mxu3  ;;  %v1539_v25 = vpop.f32.mrf.mxu2  ;;  %v1483_v56 = vadd.f32 %v1482_v61, %v1430_v47 }
 0x16a   : > { %1996 = vst.msk [vmem:[%s4531_s23 + $0xcd] sm:$0x1] %vm1148_vm8, %v1765_v7  ;;  %v1646_v33 = vadd.f32 %v1618_v24, %v1562_v29  ;;  %v1767_v31 = vrot.slane %v1693_v15, 1  ;;  %v1768_v2 = vrot.slane %v1693_v15, 2  ;;  %v1769_v43 = vrot.slane %v1693_v15, 3 }
 0x16b   : > { %1997 = vst.msk [vmem:[%s4531_s23 + $0xcf] sm:$0x1] %vm1148_vm8, %v1766_v54  ;;  %v1770_v32 = vrot.slane %v1693_v15, 4  ;;  %v1771_v34 = vrot.slane %v1693_v15, 5  ;;  %v1772_v53 = vrot.slane %v1693_v15, 6  ;;  %v1773_v58 = vrot.slane %v1693_v15, 7 }
 0x16c   : > { %1998 = vst.msk [vmem:[%s4531_s23 + $0xd1] sm:$0x1] %vm1148_vm8, %v1693_v15  ;;  %v1662_v44 = vmul.f32 %v4990_v10, %v1646_v33  ;;  %v5148_v30 = vpop.f32.mrf.mxu1  ;;  %v1563_v59 = vadd.f32 %v1536_v3, %v1483_v56 }
 0x16d   : > { %1999 = vst.msk [vmem:[%s4531_s23 + $0xd3] sm:$0x1] %vm1148_vm8, %v1767_v31 }
 0x16e   : > { %2000 = vst.msk [vmem:[%s4531_s23 + $0xd5] sm:$0x1] %vm1148_vm8, %v1768_v2  ;;  %v1678_v22 = vadd.f32 %v5004_v37, %v1662_v44 }
 0x16f   : > { %2001 = vst.msk [vmem:[%s4531_s23 + $0xd7] sm:$0x1] %vm1148_vm8, %v1769_v43 }
 0x170   : > { %2002 = vst.msk [vmem:[%s4531_s23 + $0xd9] sm:$0x1] %vm1148_vm8, %v1770_v32  ;;  %v1694_v38 = vmax.f32 %v1678_v22, 0.0  ;;  %v1433_v18 = vpop.f32.mrf.mxu0 }
 0x171   : > { %2003 = vst.msk [vmem:[%s4531_s23 + $0xdb] sm:$0x1] %vm1148_vm8, %v1771_v34  ;;  %v1620_v42 = vpop.f32.mrf.mxu3  ;;  %v5161_v61 = vpop.f32.mrf.mxu2  ;;  %v1486_v52 = vadd.f32 %v1485_v55, %v1433_v18  ;;  %v5191_v55 = vld [vmem:[%s4211_s24 + $0x70] sm:$0xf] }
 0x172   : > { %2004 = vst.msk [vmem:[%s4531_s23 + $0xdd] sm:$0x1] %vm1148_vm8, %v1772_v53  ;;  %v1774_v26 = vrot.slane %v1694_v38, 1  ;;  %v1775_v50 = vrot.slane %v1694_v38, 2  ;;  %v1776_v11 = vrot.slane %v1694_v38, 3  ;;  %v1647_v0 = vadd.f32 %v1620_v42, %v1563_v59 }
 0x173   : > { %2005 = vst.msk [vmem:[%s4531_s23 + $0xdf] sm:$0x1] %vm1148_vm8, %v1773_v58  ;;  %3679 = vmatmul.msk.bf16.gmra.mxu0 %vm482_vm1, %v4413_v45  ;;  %v1777_v46 = vrot.slane %v1694_v38, 4  ;;  %v1778_v9 = vrot.slane %v1694_v38, 5  ;;  %v1779_v19 = vrot.slane %v1694_v38, 6  ;;  %v1564_v35 = vadd.f32 %v1539_v25, %v1486_v52 }
 0x174   : > { %2006 = vst.msk [vmem:[%s4531_s23 + $0x101] sm:$0x1] %vm1148_vm8, %v1694_v38  ;;  %v1490_v36 = vpop.f32.mrf.mxu1  ;;  %v1663_v3 = vmul.f32 %v4990_v10, %v1647_v0  ;;  %v1780_v49 = vrot.slane %v1694_v38, 7  ;;  %v2266_v47 = vshll.u32 %v5191_v55, 16  ;;  %v2270_v33 = vshrl.u32 %v5191_v55, 16 }
 0x175   : > { %2007 = vst.msk [vmem:[%s4531_s23 + $0x103] sm:$0x1] %vm1148_vm8, %v1774_v26  ;;  %v2259_v53 = vrot.slane %v2257_v13, 4  ;;  %v5223_v42 = vld [vmem:[%s4211_s24 + $0x74] sm:$0x1] }
 0x176   : > { %2008 = vst.msk [vmem:[%s4531_s23 + $0x105] sm:$0x1] %vm1148_vm8, %v1775_v50  ;;  %3709 = vmatmul.msk.bf16.gmra.mxu3 %vm482_vm1, %v4443_v28  ;;  %3701 = vmatmul.msk.bf16.gmra.mxu2 %vm482_vm1, %v5179_v8  ;;  %v1679_v20 = vadd.f32 %v5004_v37, %v1663_v3  ;;  %v5218_v38 = vrot.slane %v2266_v47, 5  ;;  %v2272_v18 = vrot.slane %v2270_v33, 4 }
 0x177   : > { %2009 = vst.msk [vmem:[%s4531_s23 + $0x107] sm:$0x1] %vm1148_vm8, %v1776_v11  ;;  %3688 = vmatmul.msk.bf16.gmra.mxu1 %vm482_vm1, %v4069_v23  ;;  %v2260_v23 = vshll.u32 %v5184_v48, 16 }
 0x178   : > { %2010 = vst.msk [vmem:[%s4531_s23 + $0x109] sm:$0x1] %vm1148_vm8, %v1777_v46  ;;  %v1435_v63 = vpop.f32.mrf.mxu0  ;;  %v1695_v17 = vmax.f32 %v1679_v20, 0.0 }
 0x179   : > { %2011 = vst.msk [vmem:[%s4531_s23 + $0x10b] sm:$0x1] %vm1148_vm8, %v1778_v9  ;;  %v1623_v7 = vpop.f32.mrf.mxu3  ;;  %v1544_v29 = vpop.f32.mrf.mxu2  ;;  %v1488_v44 = vadd.f32 %v5148_v30, %v1435_v63  ;;  %v2262_v22 = vrot.slane %v2260_v23, 5  ;;  %v4017_v9 = vld [vmem:[%s4211_s24 + $0x6c] sm:$0xff] }
 0x17a   : > { %2012 = vst.msk [vmem:[%s4531_s23 + $0x10d] sm:$0x1] %vm1148_vm8, %v1779_v19  ;;  %v1648_v54 = vadd.f32 %v1623_v7, %v1564_v35  ;;  %v1781_v15 = vrot.slane %v1695_v17, 1  ;;  %v1782_v24 = vrot.slane %v1695_v17, 2  ;;  %v1783_v25 = vrot.slane %v1695_v17, 3 }
 0x17b   : > { %2013 = vst.msk [vmem:[%s4531_s23 + $0x10f] sm:$0x1] %vm1148_vm8, %v1780_v49  ;;  %v1784_v31 = vrot.slane %v1695_v17, 4  ;;  %v1785_v32 = vrot.slane %v1695_v17, 5  ;;  %v1786_v34 = vrot.slane %v1695_v17, 6  ;;  %v1787_v58 = vrot.slane %v1695_v17, 7 }
 0x17c   : > { %2014 = vst.msk [vmem:[%s4531_s23 + $0x111] sm:$0x1] %vm1148_vm8, %v1695_v17  ;;  %v1664_v2 = vmul.f32 %v4990_v10, %v1648_v54  ;;  %v5208_v43 = vpop.f32.mrf.mxu1  ;;  %v1565_v26 = vadd.f32 %v5161_v61, %v1488_v44  ;;  %v2263_v3 = vor.u32 %v2262_v22, %v2259_v53  ;;  %v2273_v61 = vor.u32 %v2272_v18, %v5218_v38 }
 0x17d   : > { %2015 = vst.msk [vmem:[%s4531_s23 + $0x113] sm:$0x1] %vm1148_vm8, %v1781_v15  ;;  %v2276_v49 = vshll.u32 %v5223_v42, 16 }
 0x17e   : > { %2016 = vst.msk [vmem:[%s4531_s23 + $0x115] sm:$0x1] %vm1148_vm8, %v1782_v24  ;;  %v1680_v56 = vadd.f32 %v5004_v37, %v1664_v2  ;;  %v2264_v13 = vrot.slane %v2263_v3, 4  ;;  %v2274_v15 = vrot.slane %v2273_v61, 4 }
 0x17f   : > { %2017 = vst.msk [vmem:[%s4531_s23 + $0x117] sm:$0x1] %vm1148_vm8, %v1783_v25  ;;  %v2278_v24 = vrot.slane %v2276_v49, 5 }
 0x180   : > { %2018 = vst.msk [vmem:[%s4531_s23 + $0x119] sm:$0x1] %vm1148_vm8, %v1784_v31  ;;  %v1696_v59 = vmax.f32 %v1680_v56, 0.0  ;;  %v1438_v30 = vpop.f32.mrf.mxu0 }
 0x181   : > { %2019 = vst.msk [vmem:[%s4531_s23 + $0x11b] sm:$0x1] %vm1148_vm8, %v1785_v32  ;;  %v1625_v50 = vpop.f32.mrf.mxu3  ;;  %v5228_v52 = vpop.f32.mrf.mxu2  ;;  %v1491_v46 = vadd.f32 %v1490_v36, %v1438_v30  ;;  %v2279_v56 = vsel %vm4252_vm4, %v2274_v15, %v2278_v24 }
 0x182   : > { %2020 = vst.msk [vmem:[%s4531_s23 + $0x11d] sm:$0x1] %vm1148_vm8, %v1786_v34  ;;  %v1788_v11 = vrot.slane %v1696_v59, 1  ;;  %v1789_v0 = vrot.slane %v1696_v59, 2  ;;  %v1790_v19 = vrot.slane %v1696_v59, 3  ;;  %v1649_v35 = vadd.f32 %v1625_v50, %v1565_v26 }
 0x183   : > { %2021 = vst.msk [vmem:[%s4531_s23 + $0x11f] sm:$0x1] %vm1148_vm8, %v1787_v58  ;;  %3680 = vmatmul.msk.bf16.gmra.mxu0 %vm482_vm1, %v4443_v28  ;;  %v1791_v20 = vrot.slane %v1696_v59, 4  ;;  %v1792_v36 = vrot.slane %v1696_v59, 5  ;;  %v1793_v7 = vrot.slane %v1696_v59, 6  ;;  %v1566_v54 = vadd.f32 %v1544_v29, %v1491_v46 }
 0x184   : > { %2022 = vst.msk [vmem:[%s4531_s23 + $0x141] sm:$0x1] %vm1148_vm8, %v1696_v59  ;;  %v1495_v63 = vpop.f32.mrf.mxu1  ;;  %v1665_v17 = vmul.f32 %v4990_v10, %v1649_v35  ;;  %v1794_v23 = vrot.slane %v1696_v59, 7  ;;  %v2283_v26 = vunpack.c.l.b16 %v2279_v56 }
 0x185   : > { %2023 = vst.msk [vmem:[%s4531_s23 + $0x143] sm:$0x1] %vm1148_vm8, %v1788_v11 }
 0x186   : > { %2024 = vst.msk [vmem:[%s4531_s23 + $0x145] sm:$0x1] %vm1148_vm8, %v1789_v0  ;;  %3710 = vmatmul.msk.bf16.gmra.mxu3 %vm482_vm1, %v4471_v6  ;;  %3702 = vmatmul.msk.bf16.gmra.mxu2 %vm482_vm1, %v4017_v9  ;;  %v1681_v47 = vadd.f32 %v5004_v37, %v1665_v17 }
 0x187   : > { %2025 = vst.msk [vmem:[%s4531_s23 + $0x147] sm:$0x1] %vm1148_vm8, %v1790_v19  ;;  %3689 = vmatmul.msk.bf16.gmra.mxu1 %vm482_vm1, %v5179_v8  ;;  %v2269_v8 = vsel %vm4252_vm4, %v2264_v13, %v5218_v38 }
 0x188   : > { %2026 = vst.msk [vmem:[%s4531_s23 + $0x149] sm:$0x1] %vm1148_vm8, %v1791_v20  ;;  %v1440_v25 = vpop.f32.mrf.mxu0  ;;  %v1697_v29 = vmax.f32 %v1681_v47, 0.0  ;;  %v2282_v30 = vunpack.c.l.b16 %v2269_v8 }
 0x189   : > { %2027 = vst.msk [vmem:[%s4531_s23 + $0x14b] sm:$0x1] %vm1148_vm8, %v1792_v36  ;;  %v1628_v33 = vpop.f32.mrf.mxu3  ;;  %v1549_v31 = vpop.f32.mrf.mxu2  ;;  %v1493_v38 = vadd.f32 %v5208_v43, %v1440_v25 }
 0x18a   : > { %2028 = vst.msk [vmem:[%s4531_s23 + $0x14d] sm:$0x1] %vm1148_vm8, %v1793_v7  ;;  %v1650_v2 = vadd.f32 %v1628_v33, %v1566_v54  ;;  %v1795_v32 = vrot.slane %v1697_v29, 1  ;;  %v1796_v44 = vrot.slane %v1697_v29, 2  ;;  %v1797_v34 = vrot.slane %v1697_v29, 3 }
 0x18b   : > { %2029 = vst.msk [vmem:[%s4531_s23 + $0x14f] sm:$0x1] %vm1148_vm8, %v1794_v23  ;;  %v1798_v53 = vrot.slane %v1697_v29, 4  ;;  %v1799_v18 = vrot.slane %v1697_v29, 5  ;;  %v1800_v59 = vrot.slane %v1697_v29, 6  ;;  %v1801_v50 = vrot.slane %v1697_v29, 7 }
 0x18c   : > { %2030 = vst.msk [vmem:[%s4531_s23 + $0x151] sm:$0x1] %vm1148_vm8, %v1697_v29  ;;  %v1666_v22 = vmul.f32 %v4990_v10, %v1650_v2  ;;  %v1497_v58 = vpop.f32.mrf.mxu1  ;;  %v1567_v43 = vadd.f32 %v5228_v52, %v1493_v38  ;;  %v5285_v61 = vpack.c.b16 %v2283_v26, %v2282_v30 }
 0x18d   : > { %2031 = vst.msk [vmem:[%s4531_s23 + $0x153] sm:$0x1] %vm1148_vm8, %v1795_v32 }
 0x18e   : > { %2032 = vst.msk [vmem:[%s4531_s23 + $0x155] sm:$0x1] %vm1148_vm8, %v1796_v44  ;;  %v1682_v39 = vadd.f32 %v5004_v37, %v1666_v22 }
 0x18f   : > { %2033 = vst.msk [vmem:[%s4531_s23 + $0x157] sm:$0x1] %vm1148_vm8, %v1797_v34 }
 0x190   : > { %2034 = vst.msk [vmem:[%s4531_s23 + $0x159] sm:$0x1] %vm1148_vm8, %v1798_v53  ;;  %v1698_v11 = vmax.f32 %v1682_v39, 0.0  ;;  %v1443_v0 = vpop.f32.mrf.mxu0 }
 0x191   : > { %2035 = vst.msk [vmem:[%s4531_s23 + $0x15b] sm:$0x1] %vm1148_vm8, %v1799_v18  ;;  %v1630_v46 = vpop.f32.mrf.mxu3  ;;  %v1551_v9 = vpop.f32.mrf.mxu2  ;;  %v1496_v35 = vadd.f32 %v1495_v63, %v1443_v0 }
 0x192   : > { %2036 = vst.msk [vmem:[%s4531_s23 + $0x15d] sm:$0x1] %vm1148_vm8, %v1800_v59  ;;  %v1802_v3 = vrot.slane %v1698_v11, 1  ;;  %v1803_v19 = vrot.slane %v1698_v11, 2  ;;  %v1804_v49 = vrot.slane %v1698_v11, 3  ;;  %v1651_v20 = vadd.f32 %v1630_v46, %v1567_v43 }
 0x193   : > { %2037 = vst.msk [vmem:[%s4531_s23 + $0x15f] sm:$0x1] %vm1148_vm8, %v1801_v50  ;;  %3681 = vmatmul.msk.bf16.gmra.mxu0 %vm482_vm1, %v4471_v6  ;;  %v1805_v52 = vrot.slane %v1698_v11, 4  ;;  %v1806_v17 = vrot.slane %v1698_v11, 5  ;;  %v1807_v7 = vrot.slane %v1698_v11, 6  ;;  %v1568_v54 = vadd.f32 %v1549_v31, %v1496_v35 }
 0x194   : > { %2038 = vst.msk [vmem:[%s4531_s23 + $0x181] sm:$0x1] %vm1148_vm8, %v1698_v11  ;;  %v2138_v36 = vpop.f32.mrf.mxu1  ;;  %v1667_v63 = vmul.f32 %v4990_v10, %v1651_v20  ;;  %v1808_v13 = vrot.slane %v1698_v11, 7 }
 0x195   : > { %2039 = vst.msk [vmem:[%s4531_s23 + $0x183] sm:$0x1] %vm1148_vm8, %v1802_v3 }
 0x196   : > { %2040 = vst.msk [vmem:[%s4531_s23 + $0x185] sm:$0x1] %vm1148_vm8, %v1803_v19  ;;  %3711 = vmatmul.msk.bf16.gmra.mxu3 %vm482_vm1, %v5285_v61  ;;  %3859 = vmatmul.msk.bf16.vlgmr.msrb.gmra.mxu2 %vm482_vm1, %v4305_v40  ;;  %v1683_v23 = vadd.f32 %v5004_v37, %v1667_v63 }
 0x197   : > { %2041 = vst.msk [vmem:[%s4531_s23 + $0x187] sm:$0x1] %vm1148_vm8, %v1804_v49  ;;  %3850 = vmatmul.msk.bf16.vlgmr.msrb.gmra.mxu1 %vm482_vm1, %v4281_v12 }
 0x198   : > { %2042 = vst.msk [vmem:[%s4531_s23 + $0x189] sm:$0x1] %vm1148_vm8, %v1805_v52  ;;  %v1445_v47 = vpop.f32.mrf.mxu0  ;;  %v1699_v15 = vmax.f32 %v1683_v23, 0.0 }
 0x199   : > { %2043 = vst.msk [vmem:[%s4531_s23 + $0x18b] sm:$0x1] %vm1148_vm8, %v1806_v17  ;;  %v1633_v24 = vpop.f32.mrf.mxu3  ;;  %v2200_v25 = vpop.f32.mrf.mxu2  ;;  %v1498_v34 = vadd.f32 %v1497_v58, %v1445_v47 }
 0x19a   : > { %2044 = vst.msk [vmem:[%s4531_s23 + $0x18d] sm:$0x1] %vm1148_vm8, %v1807_v7  ;;  %v1652_v29 = vadd.f32 %v1633_v24, %v1568_v54  ;;  %v1809_v33 = vrot.slane %v1699_v15, 1  ;;  %v1810_v31 = vrot.slane %v1699_v15, 2  ;;  %v1811_v12 = vrot.slane %v1699_v15, 3 }
 0x19b   : > { %2045 = vst.msk [vmem:[%s4531_s23 + $0x18f] sm:$0x1] %vm1148_vm8, %v1808_v13  ;;  %v1812_v2 = vrot.slane %v1699_v15, 4  ;;  %v1813_v44 = vrot.slane %v1699_v15, 5  ;;  %v1814_v56 = vrot.slane %v1699_v15, 6  ;;  %v1815_v22 = vrot.slane %v1699_v15, 7 }
 0x19c   : > { %2046 = vst.msk [vmem:[%s4531_s23 + $0x191] sm:$0x1] %vm1148_vm8, %v1699_v15  ;;  %v1668_v8 = vmul.f32 %v4990_v10, %v1652_v29  ;;  %v2140_v32 = vpop.f32.mrf.mxu1  ;;  %v1569_v59 = vadd.f32 %v1551_v9, %v1498_v34 }
 0x19d   : > { %2047 = vst.msk [vmem:[%s4531_s23 + $0x193] sm:$0x1] %vm1148_vm8, %v1809_v33 }
 0x19e   : > { %2048 = vst.msk [vmem:[%s4531_s23 + $0x195] sm:$0x1] %vm1148_vm8, %v1810_v31  ;;  %v1684_v53 = vadd.f32 %v5004_v37, %v1668_v8 }
 0x19f   : > { %2049 = vst.msk [vmem:[%s4531_s23 + $0x197] sm:$0x1] %vm1148_vm8, %v1811_v12 }
 0x1a0   : > { %2050 = vst.msk [vmem:[%s4531_s23 + $0x199] sm:$0x1] %vm1148_vm8, %v1812_v2  ;;  %v1700_v18 = vmax.f32 %v1684_v53, 0.0  ;;  %v2086_v38 = vpop.f32.mrf.mxu0 }
 0x1a1   : > { %2051 = vst.msk [vmem:[%s4531_s23 + $0x19b] sm:$0x1] %vm1148_vm8, %v1813_v44  ;;  %v1635_v39 = vpop.f32.mrf.mxu3  ;;  %v2202_v58 = vpop.f32.mrf.mxu2  ;;  %v2139_v50 = vadd.f32 %v2138_v36, %v2086_v38 }
 0x1a2   : > { %2052 = vst.msk [vmem:[%s4531_s23 + $0x19d] sm:$0x1] %vm1148_vm8, %v1814_v56  ;;  %v1816_v30 = vrot.slane %v1700_v18, 1  ;;  %v1817_v26 = vrot.slane %v1700_v18, 2  ;;  %v1818_v11 = vrot.slane %v1700_v18, 3  ;;  %v1653_v0 = vadd.f32 %v1635_v39, %v1569_v59 }
 0x1a3   : > { %2053 = vst.msk [vmem:[%s4531_s23 + $0x19f] sm:$0x1] %vm1148_vm8, %v1815_v22  ;;  %3842 = vmatmul.msk.bf16.vlgmr.msrb.gmra.mxu0 %vm482_vm1, %v4499_v51  ;;  %v1819_v43 = vrot.slane %v1700_v18, 4  ;;  %v1820_v9 = vrot.slane %v1700_v18, 5  ;;  %v1821_v19 = vrot.slane %v1700_v18, 6  ;;  %v2240_v51 = vadd.f32 %v2200_v25, %v2139_v50 }
 0x1a4   : > { %2054 = vst.msk [vmem:[%s4531_s23 + $0x1c1] sm:$0x1] %vm1148_vm8, %v1700_v18  ;;  %v2143_v46 = vpop.f32.mrf.mxu1  ;;  %v1669_v3 = vmul.f32 %v4990_v10, %v1653_v0  ;;  %v1822_v35 = vrot.slane %v1700_v18, 7 }
 0x1a5   : > { %2055 = vst.msk [vmem:[%s4531_s23 + $0x1c3] sm:$0x1] %vm1148_vm8, %v1816_v30 }
 0x1a6   : > { %2056 = vst.msk [vmem:[%s4531_s23 + $0x1c5] sm:$0x1] %vm1148_vm8, %v1817_v26  ;;  %3869 = vmatmul.msk.bf16.vlgmr.msrb.gmra.mxu3 %vm482_vm1, %v4533_v16  ;;  %3860 = vmatmul.msk.bf16.gmra.mxu2 %vm482_vm1, %v4332_v1  ;;  %v1685_v49 = vadd.f32 %v5004_v37, %v1669_v3 }
 0x1a7   : > { %2057 = vst.msk [vmem:[%s4531_s23 + $0x1c7] sm:$0x1] %vm1148_vm8, %v1818_v11  ;;  %3851 = vmatmul.msk.bf16.gmra.mxu1 %vm482_vm1, %v4305_v40 }
 0x1a8   : > { %2058 = vst.msk [vmem:[%s4531_s23 + $0x1c9] sm:$0x1] %vm1148_vm8, %v1819_v43  ;;  %v2088_v20 = vpop.f32.mrf.mxu0  ;;  %v1701_v52 = vmax.f32 %v1685_v49, 0.0 }
 0x1a9   : > { %2059 = vst.msk [vmem:[%s4531_s23 + $0x1cb] sm:$0x1] %vm1148_vm8, %v1820_v9  ;;  %v2300_v36 = vpop.f32.mrf.mxu3  ;;  %v2205_v17 = vpop.f32.mrf.mxu2  ;;  %v2141_v24 = vadd.f32 %v2140_v32, %v2088_v20 }
 0x1aa   : > { %2060 = vst.msk [vmem:[%s4531_s23 + $0x1cd] sm:$0x1] %vm1148_vm8, %v1821_v19  ;;  %v2340_v63 = vadd.f32 %v2300_v36, %v2240_v51  ;;  %v1823_v7 = vrot.slane %v1701_v52, 1  ;;  %v1824_v54 = vrot.slane %v1701_v52, 2  ;;  %v1825_v40 = vrot.slane %v1701_v52, 3 }
 0x1ab   : > { %2061 = vst.msk [vmem:[%s4531_s23 + $0x1cf] sm:$0x1] %vm1148_vm8, %v1822_v35  ;;  %v1826_v13 = vrot.slane %v1701_v52, 4  ;;  %v1827_v15 = vrot.slane %v1701_v52, 5  ;;  %v1828_v25 = vrot.slane %v1701_v52, 6  ;;  %v1829_v33 = vrot.slane %v1701_v52, 7 }
 0x1ac   : > { %2062 = vst.msk [vmem:[%s4531_s23 + $0x1d1] sm:$0x1] %vm1148_vm8, %v1701_v52  ;;  %v2356_v23 = vmul.f32 %v4990_v10, %v2340_v63  ;;  %v2145_v47 = vpop.f32.mrf.mxu1  ;;  %v2241_v2 = vadd.f32 %v2202_v58, %v2141_v24 }
 0x1ad   : > { %2063 = vst.msk [vmem:[%s4531_s23 + $0x1d3] sm:$0x1] %vm1148_vm8, %v1823_v7 }
 0x1ae   : > { %2064 = vst.msk [vmem:[%s4531_s23 + $0x1d5] sm:$0x1] %vm1148_vm8, %v1824_v54  ;;  %v2372_v29 = vadd.f32 %v5004_v37, %v2356_v23 }
 0x1af   : > { %2065 = vst.msk [vmem:[%s4531_s23 + $0x1d7] sm:$0x1] %vm1148_vm8, %v1825_v40 }
 0x1b0   : > { %2066 = vst.msk [vmem:[%s4531_s23 + $0x1d9] sm:$0x1] %vm1148_vm8, %v1826_v13  ;;  %v2388_v31 = vmax.f32 %v2372_v29, 0.0  ;;  %v2091_v12 = vpop.f32.mrf.mxu0 }
 0x1b1   : > { %2067 = vst.msk [vmem:[%s4531_s23 + $0x1db] sm:$0x1] %vm1148_vm8, %v1827_v15  ;;  %v2302_v8 = vpop.f32.mrf.mxu3  ;;  %v2207_v32 = vpop.f32.mrf.mxu2  ;;  %v2144_v56 = vadd.f32 %v2143_v46, %v2091_v12 }
 0x1b2   : > { %2068 = vst.msk [vmem:[%s4531_s23 + $0x1dd] sm:$0x1] %vm1148_vm8, %v1828_v25  ;;  %v2420_v44 = vrot.slane %v2388_v31, 1  ;;  %v2421_v34 = vrot.slane %v2388_v31, 2  ;;  %v2422_v53 = vrot.slane %v2388_v31, 3  ;;  %v2341_v22 = vadd.f32 %v2302_v8, %v2241_v2 }
 0x1b3   : > { %2069 = vst.msk [vmem:[%s4531_s23 + $0x1df] sm:$0x1] %vm1148_vm8, %v1829_v33  ;;  %3843 = vmatmul.msk.bf16.gmra.mxu0 %vm482_vm1, %v4533_v16  ;;  %v2423_v18 = vrot.slane %v2388_v31, 4  ;;  %v2424_v59 = vrot.slane %v2388_v31, 5  ;;  %v2425_v58 = vrot.slane %v2388_v31, 6  ;;  %v2242_v16 = vadd.f32 %v2205_v17, %v2144_v56 }
 0x1b4   : > { %3712 = vst.msk [vmem:[%s4531_s23 + $0x20] sm:$0x1] %vm1148_vm8, %v2388_v31  ;;  %v2148_v38 = vpop.f32.mrf.mxu1  ;;  %v2357_v39 = vmul.f32 %v4990_v10, %v2341_v22  ;;  %v2426_v30 = vrot.slane %v2388_v31, 7 }
 0x1b5   : > { %3713 = vst.msk [vmem:[%s4531_s23 + $0x22] sm:$0x1] %vm1148_vm8, %v2420_v44 }
 0x1b6   : > { %3714 = vst.msk [vmem:[%s4531_s23 + $0x24] sm:$0x1] %vm1148_vm8, %v2421_v34  ;;  %3870 = vmatmul.msk.bf16.gmra.mxu3 %vm482_vm1, %v4586_v57  ;;  %3861 = vmatmul.msk.bf16.gmra.mxu2 %vm482_vm1, %v4360_v41  ;;  %v2373_v26 = vadd.f32 %v5004_v37, %v2357_v39 }
 0x1b7   : > { %3715 = vst.msk [vmem:[%s4531_s23 + $0x26] sm:$0x1] %vm1148_vm8, %v2422_v53  ;;  %3852 = vmatmul.msk.bf16.gmra.mxu1 %vm482_vm1, %v4332_v1 }
 0x1b8   : > { %3716 = vst.msk [vmem:[%s4531_s23 + $0x28] sm:$0x1] %vm1148_vm8, %v2423_v18  ;;  %v2093_v50 = vpop.f32.mrf.mxu0  ;;  %v2389_v11 = vmax.f32 %v2373_v26, 0.0  ;;  %v5462_v26 = vld [vmem:[%s6050_s3] ss:$0 sm:$0xff] }
 0x1b9   : > { %3717 = vst.msk [vmem:[%s4531_s23 + $0x2a] sm:$0x1] %vm1148_vm8, %v2424_v59  ;;  %v2305_v0 = vpop.f32.mrf.mxu3  ;;  %v2210_v43 = vpop.f32.mrf.mxu2  ;;  %v2146_v20 = vadd.f32 %v2145_v47, %v2093_v50 }
 0x1ba   : > { %3718 = vst.msk [vmem:[%s4531_s23 + $0x2c] sm:$0x1] %vm1148_vm8, %v2425_v58  ;;  %v2342_v46 = vadd.f32 %v2305_v0, %v2242_v16  ;;  %v2427_v9 = vrot.slane %v2389_v11, 1  ;;  %v2428_v3 = vrot.slane %v2389_v11, 2  ;;  %v2429_v1 = vrot.slane %v2389_v11, 3 }
 0x1bb   : > { %3719 = vst.msk [vmem:[%s4531_s23 + $0x2e] sm:$0x1] %vm1148_vm8, %v2426_v30  ;;  %v2430_v19 = vrot.slane %v2389_v11, 4  ;;  %v2431_v49 = vrot.slane %v2389_v11, 5  ;;  %v2432_v52 = vrot.slane %v2389_v11, 6  ;;  %v2433_v17 = vrot.slane %v2389_v11, 7 }
 0x1bc   : > { %3720 = vst.msk [vmem:[%s4531_s23 + $0x30] sm:$0x1] %vm1148_vm8, %v2389_v11  ;;  %v2358_v51 = vmul.f32 %v4990_v10, %v2342_v46  ;;  %v2150_v35 = vpop.f32.mrf.mxu1  ;;  %v2243_v54 = vadd.f32 %v2207_v32, %v2146_v20 }
 0x1bd   : > { %3721 = vst.msk [vmem:[%s4531_s23 + $0x32] sm:$0x1] %vm1148_vm8, %v2427_v9 }
 0x1be   : > { %3722 = vst.msk [vmem:[%s4531_s23 + $0x34] sm:$0x1] %vm1148_vm8, %v2428_v3  ;;  %v2374_v36 = vadd.f32 %v5004_v37, %v2358_v51 }
 0x1bf   : > { %3723 = vst.msk [vmem:[%s4531_s23 + $0x36] sm:$0x1] %vm1148_vm8, %v2429_v1 }
 0x1c0   : > { %3724 = vst.msk [vmem:[%s4531_s23 + $0x38] sm:$0x1] %vm1148_vm8, %v2430_v19  ;;  %v2390_v63 = vmax.f32 %v2374_v36, 0.0  ;;  %v2096_v7 = vpop.f32.mrf.mxu0 }
 0x1c1   : > { %3725 = vst.msk [vmem:[%s4531_s23 + $0x3a] sm:$0x1] %vm1148_vm8, %v2431_v49  ;;  %v2307_v40 = vpop.f32.mrf.mxu3  ;;  %v2212_v13 = vpop.f32.mrf.mxu2  ;;  %v2149_v15 = vadd.f32 %v2148_v38, %v2096_v7  ;;  %v5452_v38 = vld [vmem:[%s6049_s2] ss:$0 sm:$0xff] }
 0x1c2   : > { %3726 = vst.msk [vmem:[%s4531_s23 + $0x3c] sm:$0x1] %vm1148_vm8, %v2432_v52  ;;  %v2434_v23 = vrot.slane %v2390_v63, 1  ;;  %v2435_v47 = vrot.slane %v2390_v63, 2  ;;  %v2436_v24 = vrot.slane %v2390_v63, 3  ;;  %v2343_v25 = vadd.f32 %v2307_v40, %v2243_v54 }
 0x1c3   : > { %3727 = vst.msk [vmem:[%s4531_s23 + $0x3e] sm:$0x1] %vm1148_vm8, %v2433_v17  ;;  %3844 = vmatmul.msk.bf16.gmra.mxu0 %vm482_vm1, %v4586_v57  ;;  %v2437_v29 = vrot.slane %v2390_v63, 4  ;;  %v2438_v31 = vrot.slane %v2390_v63, 5  ;;  %v2439_v2 = vrot.slane %v2390_v63, 6  ;;  %v2244_v57 = vadd.f32 %v2210_v43, %v2149_v15 }
 0x1c4   : > { %3728 = vst.msk [vmem:[%s4531_s23 + $0x60] sm:$0x1] %vm1148_vm8, %v2390_v63  ;;  %v2153_v33 = vpop.f32.mrf.mxu1  ;;  %v2359_v12 = vmul.f32 %v4990_v10, %v2343_v25  ;;  %v2440_v8 = vrot.slane %v2390_v63, 7 }
 0x1c5   : > { %3729 = vst.msk [vmem:[%s4531_s23 + $0x62] sm:$0x1] %vm1148_vm8, %v2434_v23 }
 0x1c6   : > { %3730 = vst.msk [vmem:[%s4531_s23 + $0x64] sm:$0x1] %vm1148_vm8, %v2435_v47  ;;  %3871 = vmatmul.msk.bf16.gmra.mxu3 %vm482_vm1, %v4642_v62  ;;  %3862 = vmatmul.msk.bf16.gmra.mxu2 %vm482_vm1, %v4386_v4  ;;  %v2375_v32 = vadd.f32 %v5004_v37, %v2359_v12 }
 0x1c7   : > { %3731 = vst.msk [vmem:[%s4531_s23 + $0x66] sm:$0x1] %vm1148_vm8, %v2436_v24  ;;  %3853 = vmatmul.msk.bf16.gmra.mxu1 %vm482_vm1, %v4360_v41 }
 0x1c8   : > { %3732 = vst.msk [vmem:[%s4531_s23 + $0x68] sm:$0x1] %vm1148_vm8, %v2437_v29  ;;  %v2098_v10 = vpop.f32.mrf.mxu0  ;;  %v2391_v44 = vmax.f32 %v2375_v32, 0.0 }
 0x1c9   : > { %3733 = vst.msk [vmem:[%s4531_s23 + $0x6a] sm:$0x1] %vm1148_vm8, %v2438_v31  ;;  %v2310_v34 = vpop.f32.mrf.mxu3  ;;  %v2215_v56 = vpop.f32.mrf.mxu2  ;;  %v2151_v16 = vadd.f32 %v2150_v35, %v2098_v10 }
 0x1ca   : > { %3734 = vst.msk [vmem:[%s4531_s23 + $0x6c] sm:$0x1] %vm1148_vm8, %v2439_v2  ;;  %v2344_v53 = vadd.f32 %v2310_v34, %v2244_v57  ;;  %v2441_v22 = vrot.slane %v2391_v44, 1  ;;  %v2442_v37 = vrot.slane %v2391_v44, 2  ;;  %v2443_v41 = vrot.slane %v2391_v44, 3 }
 0x1cb   : > { %3735 = vst.msk [vmem:[%s4531_s23 + $0x6e] sm:$0x1] %vm1148_vm8, %v2440_v8  ;;  %v2444_v18 = vrot.slane %v2391_v44, 4  ;;  %v2445_v58 = vrot.slane %v2391_v44, 5  ;;  %v2446_v30 = vrot.slane %v2391_v44, 6  ;;  %v2447_v11 = vrot.slane %v2391_v44, 7 }
 0x1cc   : > { %3736 = vst.msk [vmem:[%s4531_s23 + $0x70] sm:$0x1] %vm1148_vm8, %v2391_v44  ;;  %v2360_v59 = vmul.f32 %v5452_v38, %v2344_v53  ;;  %v2155_v39 = vpop.f32.mrf.mxu1  ;;  %v2245_v46 = vadd.f32 %v2212_v13, %v2151_v16 }
 0x1cd   : > { %3737 = vst.msk [vmem:[%s4531_s23 + $0x72] sm:$0x1] %vm1148_vm8, %v2441_v22 }
 0x1ce   : > { %3738 = vst.msk [vmem:[%s4531_s23 + $0x74] sm:$0x1] %vm1148_vm8, %v2442_v37  ;;  %v2376_v50 = vadd.f32 %v5462_v26, %v2360_v59 }
 0x1cf   : > { %3739 = vst.msk [vmem:[%s4531_s23 + $0x76] sm:$0x1] %vm1148_vm8, %v2443_v41 }
 0x1d0   : > { %3740 = vst.msk [vmem:[%s4531_s23 + $0x78] sm:$0x1] %vm1148_vm8, %v2444_v18  ;;  %v2392_v0 = vmax.f32 %v2376_v50, 0.0  ;;  %v2101_v43 = vpop.f32.mrf.mxu0 }
 0x1d1   : > { %3741 = vst.msk [vmem:[%s4531_s23 + $0x7a] sm:$0x1] %vm1148_vm8, %v2445_v58  ;;  %v2312_v9 = vpop.f32.mrf.mxu3  ;;  %v2217_v3 = vpop.f32.mrf.mxu2  ;;  %v2154_v51 = vadd.f32 %v2153_v33, %v2101_v43 }
 0x1d2   : > { %3742 = vst.msk [vmem:[%s4531_s23 + $0x7c] sm:$0x1] %vm1148_vm8, %v2446_v30  ;;  %v2448_v1 = vrot.slane %v2392_v0, 1  ;;  %v2449_v19 = vrot.slane %v2392_v0, 2  ;;  %v2450_v35 = vrot.slane %v2392_v0, 3  ;;  %v2345_v49 = vadd.f32 %v2312_v9, %v2245_v46 }
 0x1d3   : > { %3743 = vst.msk [vmem:[%s4531_s23 + $0x7e] sm:$0x1] %vm1148_vm8, %v2447_v11  ;;  %3845 = vmatmul.msk.bf16.gmra.mxu0 %vm482_vm1, %v4642_v62  ;;  %v2451_v20 = vrot.slane %v2392_v0, 4  ;;  %v2452_v36 = vrot.slane %v2392_v0, 5  ;;  %v2453_v63 = vrot.slane %v2392_v0, 6  ;;  %v2246_v62 = vadd.f32 %v2215_v56, %v2154_v51 }
 0x1d4   : > { %3744 = vst.msk [vmem:[%s4531_s23 + $0xa0] sm:$0x1] %vm1148_vm8, %v2392_v0  ;;  %v2158_v52 = vpop.f32.mrf.mxu1  ;;  %v2361_v17 = vmul.f32 %v5452_v38, %v2345_v49  ;;  %v2454_v7 = vrot.slane %v2392_v0, 7 }
 0x1d5   : > { %3745 = vst.msk [vmem:[%s4531_s23 + $0xa2] sm:$0x1] %vm1148_vm8, %v2448_v1 }
 0x1d6   : > { %3746 = vst.msk [vmem:[%s4531_s23 + $0xa4] sm:$0x1] %vm1148_vm8, %v2449_v19  ;;  %3872 = vmatmul.msk.bf16.gmra.mxu3 %vm482_vm1, %v4698_v5  ;;  %3863 = vmatmul.msk.bf16.gmra.mxu2 %vm482_vm1, %v4413_v45  ;;  %v2377_v54 = vadd.f32 %v5462_v26, %v2361_v17 }
 0x1d7   : > { %3747 = vst.msk [vmem:[%s4531_s23 + $0xa6] sm:$0x1] %vm1148_vm8, %v2450_v35  ;;  %3854 = vmatmul.msk.bf16.gmra.mxu1 %vm482_vm1, %v4386_v4 }
 0x1d8   : > { %3748 = vst.msk [vmem:[%s4531_s23 + $0xa8] sm:$0x1] %vm1148_vm8, %v2451_v20  ;;  %v2103_v40 = vpop.f32.mrf.mxu0  ;;  %v2393_v13 = vmax.f32 %v2377_v54, 0.0 }
 0x1d9   : > { %3749 = vst.msk [vmem:[%s4531_s23 + $0xaa] sm:$0x1] %vm1148_vm8, %v2452_v36  ;;  %v2315_v23 = vpop.f32.mrf.mxu3  ;;  %v2220_v47 = vpop.f32.mrf.mxu2  ;;  %v2156_v2 = vadd.f32 %v2155_v39, %v2103_v40 }
 0x1da   : > { %3750 = vst.msk [vmem:[%s4531_s23 + $0xac] sm:$0x1] %vm1148_vm8, %v2453_v63  ;;  %v2346_v15 = vadd.f32 %v2315_v23, %v2246_v62  ;;  %v2455_v24 = vrot.slane %v2393_v13, 1  ;;  %v2456_v25 = vrot.slane %v2393_v13, 2  ;;  %v2457_v4 = vrot.slane %v2393_v13, 3 }
 0x1db   : > { %3751 = vst.msk [vmem:[%s4531_s23 + $0xae] sm:$0x1] %vm1148_vm8, %v2454_v7  ;;  %v2458_v29 = vrot.slane %v2393_v13, 4  ;;  %v2459_v12 = vrot.slane %v2393_v13, 5  ;;  %v2460_v57 = vrot.slane %v2393_v13, 6  ;;  %v2461_v32 = vrot.slane %v2393_v13, 7 }
 0x1dc   : > { %3752 = vst.msk [vmem:[%s4531_s23 + $0xb0] sm:$0x1] %vm1148_vm8, %v2393_v13  ;;  %v2362_v33 = vmul.f32 %v5452_v38, %v2346_v15  ;;  %v2160_v31 = vpop.f32.mrf.mxu1  ;;  %v2247_v34 = vadd.f32 %v2217_v3, %v2156_v2 }
 0x1dd   : > { %3753 = vst.msk [vmem:[%s4531_s23 + $0xb2] sm:$0x1] %vm1148_vm8, %v2455_v24 }
 0x1de   : > { %3754 = vst.msk [vmem:[%s4531_s23 + $0xb4] sm:$0x1] %vm1148_vm8, %v2456_v25  ;;  %v2378_v8 = vadd.f32 %v5462_v26, %v2362_v33 }
 0x1df   : > { %3755 = vst.msk [vmem:[%s4531_s23 + $0xb6] sm:$0x1] %vm1148_vm8, %v2457_v4 }
 0x1e0   : > { %3756 = vst.msk [vmem:[%s4531_s23 + $0xb8] sm:$0x1] %vm1148_vm8, %v2458_v29  ;;  %v2394_v10 = vmax.f32 %v2378_v8, 0.0  ;;  %v2106_v44 = vpop.f32.mrf.mxu0 }
 0x1e1   : > { %3757 = vst.msk [vmem:[%s4531_s23 + $0xba] sm:$0x1] %vm1148_vm8, %v2459_v12  ;;  %v2317_v56 = vpop.f32.mrf.mxu3  ;;  %v2222_v53 = vpop.f32.mrf.mxu2  ;;  %v2159_v41 = vadd.f32 %v2158_v52, %v2106_v44 }
 0x1e2   : > { %3758 = vst.msk [vmem:[%s4531_s23 + $0xbc] sm:$0x1] %vm1148_vm8, %v2460_v57  ;;  %v2462_v22 = vrot.slane %v2394_v10, 1  ;;  %v2463_v37 = vrot.slane %v2394_v10, 2  ;;  %v2464_v18 = vrot.slane %v2394_v10, 3  ;;  %v2347_v59 = vadd.f32 %v2317_v56, %v2247_v34 }
 0x1e3   : > { %3759 = vst.msk [vmem:[%s4531_s23 + $0xbe] sm:$0x1] %vm1148_vm8, %v2461_v32  ;;  %3846 = vmatmul.msk.bf16.gmra.mxu0 %vm482_vm1, %v4698_v5  ;;  %v2465_v39 = vrot.slane %v2394_v10, 4  ;;  %v2466_v16 = vrot.slane %v2394_v10, 5  ;;  %v2467_v50 = vrot.slane %v2394_v10, 6  ;;  %v2248_v5 = vadd.f32 %v2220_v47, %v2159_v41 }
 0x1e4   : > { %3760 = vst.msk [vmem:[%s4531_s23 + $0xe0] sm:$0x1] %vm1148_vm8, %v2394_v10  ;;  %v2163_v58 = vpop.f32.mrf.mxu1  ;;  %v2363_v30 = vmul.f32 %v5452_v38, %v2347_v59  ;;  %v2468_v11 = vrot.slane %v2394_v10, 7 }
 0x1e5   : > { %3761 = vst.msk [vmem:[%s4531_s23 + $0xe2] sm:$0x1] %vm1148_vm8, %v2462_v22 }
 0x1e6   : > { %3762 = vst.msk [vmem:[%s4531_s23 + $0xe4] sm:$0x1] %vm1148_vm8, %v2463_v37  ;;  %3873 = vmatmul.msk.bf16.gmra.mxu3 %vm482_vm1, %v4754_v27  ;;  %3864 = vmatmul.msk.bf16.gmra.mxu2 %vm482_vm1, %v4443_v28  ;;  %v2379_v0 = vadd.f32 %v5462_v26, %v2363_v30 }
 0x1e7   : > { %3763 = vst.msk [vmem:[%s4531_s23 + $0xe6] sm:$0x1] %vm1148_vm8, %v2464_v18  ;;  %3855 = vmatmul.msk.bf16.gmra.mxu1 %vm482_vm1, %v4413_v45 }
 0x1e8   : > { %3764 = vst.msk [vmem:[%s4531_s23 + $0xe8] sm:$0x1] %vm1148_vm8, %v2465_v39  ;;  %v2108_v43 = vpop.f32.mrf.mxu0  ;;  %v2395_v46 = vmax.f32 %v2379_v0, 0.0 }
 0x1e9   : > { %3765 = vst.msk [vmem:[%s4531_s23 + $0xea] sm:$0x1] %vm1148_vm8, %v2466_v16  ;;  %v2320_v9 = vpop.f32.mrf.mxu3  ;;  %v2225_v3 = vpop.f32.mrf.mxu2  ;;  %v2161_v36 = vadd.f32 %v2160_v31, %v2108_v43 }
 0x1ea   : > { %3766 = vst.msk [vmem:[%s4531_s23 + $0xec] sm:$0x1] %vm1148_vm8, %v2467_v50  ;;  %v2348_v1 = vadd.f32 %v2320_v9, %v2248_v5  ;;  %v2469_v19 = vrot.slane %v2395_v46, 1  ;;  %v2470_v51 = vrot.slane %v2395_v46, 2  ;;  %v2471_v45 = vrot.slane %v2395_v46, 3 }
 0x1eb   : > { %3767 = vst.msk [vmem:[%s4531_s23 + $0xee] sm:$0x1] %vm1148_vm8, %v2468_v11  ;;  %v2472_v35 = vrot.slane %v2395_v46, 4  ;;  %v2473_v52 = vrot.slane %v2395_v46, 5  ;;  %v2474_v17 = vrot.slane %v2395_v46, 6  ;;  %v2475_v62 = vrot.slane %v2395_v46, 7 }
 0x1ec   : > { %3768 = vst.msk [vmem:[%s4531_s23 + $0xf0] sm:$0x1] %vm1148_vm8, %v2395_v46  ;;  %v2364_v49 = vmul.f32 %v5452_v38, %v2348_v1  ;;  %v2165_v20 = vpop.f32.mrf.mxu1  ;;  %v2249_v40 = vadd.f32 %v2222_v53, %v2161_v36 }
 0x1ed   : > { %3769 = vst.msk [vmem:[%s4531_s23 + $0xf2] sm:$0x1] %vm1148_vm8, %v2469_v19 }
 0x1ee   : > { %3770 = vst.msk [vmem:[%s4531_s23 + $0xf4] sm:$0x1] %vm1148_vm8, %v2470_v51  ;;  %v2380_v63 = vadd.f32 %v5462_v26, %v2364_v49  ;;  %v2954_v51 = vrot.slane %v5191_v55, 5  ;;  %v3867_v55 = vrot.slane %v5184_v48, 9 }
 0x1ef   : > { %3771 = vst.msk [vmem:[%s4531_s23 + $0xf6] sm:$0x1] %vm1148_vm8, %v2471_v45 }
 0x1f0   : > { %3772 = vst.msk [vmem:[%s4531_s23 + $0xf8] sm:$0x1] %vm1148_vm8, %v2472_v35  ;;  %v2396_v7 = vmax.f32 %v2380_v63, 0.0  ;;  %v2111_v54 = vpop.f32.mrf.mxu0  ;;  %v2956_v63 = vrot.slane %v2954_v51, 4 }
 0x1f1   : > { %3773 = vst.msk [vmem:[%s4531_s23 + $0xfa] sm:$0x1] %vm1148_vm8, %v2473_v52  ;;  %v2322_v13 = vpop.f32.mrf.mxu3  ;;  %v2227_v23 = vpop.f32.mrf.mxu2  ;;  %v2164_v24 = vadd.f32 %v2163_v58, %v2111_v54 }
 0x1f2   : > { %3774 = vst.msk [vmem:[%s4531_s23 + $0xfc] sm:$0x1] %vm1148_vm8, %v2474_v17  ;;  %v2476_v47 = vrot.slane %v2396_v7, 1  ;;  %v2477_v15 = vrot.slane %v2396_v7, 2  ;;  %v2478_v25 = vrot.slane %v2396_v7, 3  ;;  %v2349_v4 = vadd.f32 %v2322_v13, %v2249_v40 }
 0x1f3   : > { %3775 = vst.msk [vmem:[%s4531_s23 + $0xfe] sm:$0x1] %vm1148_vm8, %v2475_v62  ;;  %3847 = vmatmul.msk.bf16.gmra.mxu0 %vm482_vm1, %v4754_v27  ;;  %v2479_v29 = vrot.slane %v2396_v7, 4  ;;  %v2480_v31 = vrot.slane %v2396_v7, 5  ;;  %v2481_v2 = vrot.slane %v2396_v7, 6  ;;  %v2250_v27 = vadd.f32 %v2225_v3, %v2164_v24 }
 0x1f4   : > { %3776 = vst.msk [vmem:[%s4531_s23 + $0x120] sm:$0x1] %vm1148_vm8, %v2396_v7  ;;  %v2168_v33 = vpop.f32.mrf.mxu1  ;;  %v2365_v12 = vmul.f32 %v5452_v38, %v2349_v4  ;;  %v2482_v57 = vrot.slane %v2396_v7, 7  ;;  %v2957_v62 = vrot.slane %v5223_v42, 5 }
 0x1f5   : > { %3777 = vst.msk [vmem:[%s4531_s23 + $0x122] sm:$0x1] %vm1148_vm8, %v2476_v47 }
 0x1f6   : > { %3778 = vst.msk [vmem:[%s4531_s23 + $0x124] sm:$0x1] %vm1148_vm8, %v2477_v15  ;;  %3874 = vmatmul.msk.bf16.gmra.mxu3 %vm482_vm1, %v4810_v21  ;;  %3865 = vmatmul.msk.bf16.gmra.mxu2 %vm482_vm1, %v4471_v6  ;;  %v2381_v8 = vadd.f32 %v5462_v26, %v2365_v12  ;;  %v2958_v47 = vsel %vm4478_vm7, %v2956_v63, %v2957_v62 }
 0x1f7   : > { %3779 = vst.msk [vmem:[%s4531_s23 + $0x126] sm:$0x1] %vm1148_vm8, %v2478_v25  ;;  %3856 = vmatmul.msk.bf16.gmra.mxu1 %vm482_vm1, %v4443_v28  ;;  %v2962_v12 = vunpack.c.l.b16 %v2958_v47 }
 0x1f8   : > { %3780 = vst.msk [vmem:[%s4531_s23 + $0x128] sm:$0x1] %vm1148_vm8, %v2479_v29  ;;  %v2113_v32 = vpop.f32.mrf.mxu0  ;;  %v2397_v10 = vmax.f32 %v2381_v8, 0.0 }
 0x1f9   : > { %3781 = vst.msk [vmem:[%s4531_s23 + $0x12a] sm:$0x1] %vm1148_vm8, %v2480_v31  ;;  %v2325_v44 = vpop.f32.mrf.mxu3  ;;  %v2230_v34 = vpop.f32.mrf.mxu2  ;;  %v2166_v39 = vadd.f32 %v2165_v20, %v2113_v32 }
 0x1fa   : > { %3782 = vst.msk [vmem:[%s4531_s23 + $0x12c] sm:$0x1] %vm1148_vm8, %v2481_v2  ;;  %v2350_v56 = vadd.f32 %v2325_v44, %v2250_v27  ;;  %v2483_v53 = vrot.slane %v2397_v10, 1  ;;  %v2484_v22 = vrot.slane %v2397_v10, 2  ;;  %v2485_v28 = vrot.slane %v2397_v10, 3 }
 0x1fb   : > { %3783 = vst.msk [vmem:[%s4531_s23 + $0x12e] sm:$0x1] %vm1148_vm8, %v2482_v57  ;;  %v2486_v37 = vrot.slane %v2397_v10, 4  ;;  %v2487_v59 = vrot.slane %v2397_v10, 5  ;;  %v2488_v58 = vrot.slane %v2397_v10, 6  ;;  %v2489_v30 = vrot.slane %v2397_v10, 7 }
 0x1fc   : > { %3784 = vst.msk [vmem:[%s4531_s23 + $0x130] sm:$0x1] %vm1148_vm8, %v2397_v10  ;;  %v2366_v41 = vmul.f32 %v5452_v38, %v2350_v56  ;;  %v5592_v18 = vpop.f32.mrf.mxu1  ;;  %v2251_v11 = vadd.f32 %v2227_v23, %v2166_v39 }
 0x1fd   : > { %3785 = vst.msk [vmem:[%s4531_s23 + $0x132] sm:$0x1] %vm1148_vm8, %v2483_v53 }
 0x1fe   : > { %3786 = vst.msk [vmem:[%s4531_s23 + $0x134] sm:$0x1] %vm1148_vm8, %v2484_v22  ;;  %v2382_v16 = vadd.f32 %v5462_v26, %v2366_v41 }
 0x1ff   : > { %3787 = vst.msk [vmem:[%s4531_s23 + $0x136] sm:$0x1] %vm1148_vm8, %v2485_v28 }
 0x200   : > { %3788 = vst.msk [vmem:[%s4531_s23 + $0x138] sm:$0x1] %vm1148_vm8, %v2486_v37  ;;  %v2398_v50 = vmax.f32 %v2382_v16, 0.0  ;;  %v2116_v5 = vpop.f32.mrf.mxu0 }
 0x201   : > { %3789 = vst.msk [vmem:[%s4531_s23 + $0x13a] sm:$0x1] %vm1148_vm8, %v2487_v59  ;;  %v2327_v0 = vpop.f32.mrf.mxu3  ;;  %v2232_v43 = vpop.f32.mrf.mxu2  ;;  %v2169_v3 = vadd.f32 %v2168_v33, %v2116_v5 }
 0x202   : > { %3790 = vst.msk [vmem:[%s4531_s23 + $0x13c] sm:$0x1] %vm1148_vm8, %v2488_v58  ;;  %v2490_v46 = vrot.slane %v2398_v50, 1  ;;  %v2491_v9 = vrot.slane %v2398_v50, 2  ;;  %v2492_v1 = vrot.slane %v2398_v50, 3  ;;  %v2351_v19 = vadd.f32 %v2327_v0, %v2251_v11 }
 0x203   : > { %3791 = vst.msk [vmem:[%s4531_s23 + $0x13e] sm:$0x1] %vm1148_vm8, %v2489_v30  ;;  %3848 = vmatmul.msk.bf16.gmra.mxu0 %vm482_vm1, %v4810_v21  ;;  %v2493_v45 = vrot.slane %v2398_v50, 4  ;;  %v2494_v49 = vrot.slane %v2398_v50, 5  ;;  %v2495_v52 = vrot.slane %v2398_v50, 6  ;;  %v2252_v21 = vadd.f32 %v2230_v34, %v2169_v3 }
 0x204   : > { %3792 = vst.msk [vmem:[%s4531_s23 + $0x160] sm:$0x1] %vm1148_vm8, %v2398_v50  ;;  %v2173_v35 = vpop.f32.mrf.mxu1  ;;  %v2367_v20 = vmul.f32 %v5452_v38, %v2351_v19  ;;  %v2496_v36 = vrot.slane %v2398_v50, 7 }
 0x205   : > { %3793 = vst.msk [vmem:[%s4531_s23 + $0x162] sm:$0x1] %vm1148_vm8, %v2490_v46 }
 0x206   : > { %3794 = vst.msk [vmem:[%s4531_s23 + $0x164] sm:$0x1] %vm1148_vm8, %v2491_v9  ;;  %3875 = vmatmul.msk.bf16.gmra.mxu3 %vm482_vm1, %v4868_v60  ;;  %3866 = vmatmul.msk.bf16.gmra.mxu2 %vm482_vm1, %v5285_v61  ;;  %v2383_v17 = vadd.f32 %v5462_v26, %v2367_v20 }
 0x207   : > { %3795 = vst.msk [vmem:[%s4531_s23 + $0x166] sm:$0x1] %vm1148_vm8, %v2492_v1  ;;  %3857 = vmatmul.msk.bf16.gmra.mxu1 %vm482_vm1, %v4471_v6  ;;  %v2955_v6 = vsel %vm4478_vm7, %v3867_v55, %v2954_v51 }
 0x208   : > { %3796 = vst.msk [vmem:[%s4531_s23 + $0x168] sm:$0x1] %vm1148_vm8, %v2493_v45  ;;  %v2118_v7 = vpop.f32.mrf.mxu0  ;;  %v2399_v61 = vmax.f32 %v2383_v17, 0.0  ;;  %v2961_v31 = vunpack.c.l.b16 %v2955_v6 }
 0x209   : > { %3797 = vst.msk [vmem:[%s4531_s23 + $0x16a] sm:$0x1] %vm1148_vm8, %v2494_v49  ;;  %v2330_v48 = vpop.f32.mrf.mxu3  ;;  %v2235_v54 = vpop.f32.mrf.mxu2  ;;  %v2171_v29 = vadd.f32 %v5592_v18, %v2118_v7 }
 0x20a   : > { %3798 = vst.msk [vmem:[%s4531_s23 + $0x16c] sm:$0x1] %vm1148_vm8, %v2495_v52  ;;  %v2352_v40 = vadd.f32 %v2330_v48, %v2252_v21  ;;  %v2497_v42 = vrot.slane %v2399_v61, 1  ;;  %v2498_v13 = vrot.slane %v2399_v61, 2  ;;  %v2499_v23 = vrot.slane %v2399_v61, 3 }
 0x20b   : > { %3799 = vst.msk [vmem:[%s4531_s23 + $0x16e] sm:$0x1] %vm1148_vm8, %v2496_v36  ;;  %v2500_v15 = vrot.slane %v2399_v61, 4  ;;  %v2501_v4 = vrot.slane %v2399_v61, 5  ;;  %v2502_v33 = vrot.slane %v2399_v61, 6  ;;  %v2503_v2 = vrot.slane %v2399_v61, 7 }
 0x20c   : > { %3800 = vst.msk [vmem:[%s4531_s23 + $0x170] sm:$0x1] %vm1148_vm8, %v2399_v61  ;;  %v2368_v24 = vmul.f32 %v5452_v38, %v2352_v40  ;;  %v2175_v25 = vpop.f32.mrf.mxu1  ;;  %v2253_v8 = vadd.f32 %v2232_v43, %v2171_v29  ;;  %v2963_v53 = vpack.c.b16 %v2962_v12, %v2961_v31 }
 0x20d   : > { %3801 = vst.msk [vmem:[%s4531_s23 + $0x172] sm:$0x1] %vm1148_vm8, %v2497_v42 }
 0x20e   : > { %3802 = vst.msk [vmem:[%s4531_s23 + $0x174] sm:$0x1] %vm1148_vm8, %v2498_v13  ;;  %v2384_v14 = vadd.f32 %v5462_v26, %v2368_v24 }
 0x20f   : > { %3803 = vst.msk [vmem:[%s4531_s23 + $0x176] sm:$0x1] %vm1148_vm8, %v2499_v23 }
 0x210   : > { %3804 = vst.msk [vmem:[%s4531_s23 + $0x178] sm:$0x1] %vm1148_vm8, %v2500_v15  ;;  %v2400_v27 = vmax.f32 %v2384_v14, 0.0  ;;  %v2121_v57 = vpop.f32.mrf.mxu0 }
 0x211   : > { %3805 = vst.msk [vmem:[%s4531_s23 + $0x17a] sm:$0x1] %vm1148_vm8, %v2501_v4  ;;  %v2332_v32 = vpop.f32.mrf.mxu3  ;;  %v2237_v10 = vpop.f32.mrf.mxu2  ;;  %v2174_v56 = vadd.f32 %v2173_v35, %v2121_v57 }
 0x212   : > { %3806 = vst.msk [vmem:[%s4531_s23 + $0x17c] sm:$0x1] %vm1148_vm8, %v2502_v33  ;;  %v2504_v44 = vrot.slane %v2400_v27, 1  ;;  %v2505_v34 = vrot.slane %v2400_v27, 2  ;;  %v2506_v22 = vrot.slane %v2400_v27, 3  ;;  %v2353_v28 = vadd.f32 %v2332_v32, %v2253_v8 }
 0x213   : > { %3807 = vst.msk [vmem:[%s4531_s23 + $0x17e] sm:$0x1] %vm1148_vm8, %v2503_v2  ;;  %3849 = vmatmul.msk.bf16.gmra.mxu0 %vm482_vm1, %v4868_v60  ;;  %v2507_v37 = vrot.slane %v2400_v27, 4  ;;  %v2508_v18 = vrot.slane %v2400_v27, 5  ;;  %v2509_v39 = vrot.slane %v2400_v27, 6  ;;  %v2254_v58 = vadd.f32 %v2235_v54, %v2174_v56 }
 0x214   : > { %3808 = vst.msk [vmem:[%s4531_s23 + $0x1a0] sm:$0x1] %vm1148_vm8, %v2400_v27  ;;  %v2841_v41 = vpop.f32.mrf.mxu1  ;;  %v2369_v59 = vmul.f32 %v5452_v38, %v2353_v28  ;;  %v2510_v16 = vrot.slane %v2400_v27, 7 }
 0x215   : > { %3809 = vst.msk [vmem:[%s4531_s23 + $0x1a2] sm:$0x1] %vm1148_vm8, %v2504_v44 }
 0x216   : > { %3810 = vst.msk [vmem:[%s4531_s23 + $0x1a4] sm:$0x1] %vm1148_vm8, %v2505_v34  ;;  %3876 = vmatmul.msk.bf16.gmra.mxu3 %vm482_vm1, %v2963_v53  ;;  %v2385_v60 = vadd.f32 %v5462_v26, %v2369_v59 }
 0x217   : > { %3811 = vst.msk [vmem:[%s4531_s23 + $0x1a6] sm:$0x1] %vm1148_vm8, %v2506_v22 }
 0x218   : > { %3812 = vst.msk [vmem:[%s4531_s23 + $0x1a8] sm:$0x1] %vm1148_vm8, %v2507_v37  ;;  %v2123_v30 = vpop.f32.mrf.mxu0  ;;  %v2401_v50 = vmax.f32 %v2385_v60, 0.0 }
 0x219   : > { %3813 = vst.msk [vmem:[%s4531_s23 + $0x1aa] sm:$0x1] %vm1148_vm8, %v2508_v18  ;;  %v2335_v5 = vpop.f32.mrf.mxu3  ;;  %v2895_v11 = vpop.f32.mrf.mxu2  ;;  %v2176_v45 = vadd.f32 %v2175_v25, %v2123_v30 }
 0x21a   : > { %3814 = vst.msk [vmem:[%s4531_s23 + $0x1ac] sm:$0x1] %vm1148_vm8, %v2509_v39  ;;  %v2354_v0 = vadd.f32 %v2335_v5, %v2254_v58  ;;  %v2511_v43 = vrot.slane %v2401_v50, 1  ;;  %v2512_v46 = vrot.slane %v2401_v50, 2  ;;  %v2513_v9 = vrot.slane %v2401_v50, 3 }
 0x21b   : > { %3815 = vst.msk [vmem:[%s4531_s23 + $0x1ae] sm:$0x1] %vm1148_vm8, %v2510_v16  ;;  %v2514_v3 = vrot.slane %v2401_v50, 4  ;;  %v2515_v51 = vrot.slane %v2401_v50, 5  ;;  %v2516_v35 = vrot.slane %v2401_v50, 6  ;;  %v2517_v20 = vrot.slane %v2401_v50, 7 }
 0x21c   : > { %3816 = vst.msk [vmem:[%s4531_s23 + $0x1b0] sm:$0x1] %vm1148_vm8, %v2401_v50  ;;  %v2370_v1 = vmul.f32 %v5452_v38, %v2354_v0  ;;  %v2843_v19 = vpop.f32.mrf.mxu1  ;;  %v2255_v55 = vadd.f32 %v2237_v10, %v2176_v45 }
 0x21d   : > { %3817 = vst.msk [vmem:[%s4531_s23 + $0x1b2] sm:$0x1] %vm1148_vm8, %v2511_v43 }
 0x21e   : > { %3818 = vst.msk [vmem:[%s4531_s23 + $0x1b4] sm:$0x1] %vm1148_vm8, %v2512_v46  ;;  %v2386_v49 = vadd.f32 %v5462_v26, %v2370_v1 }
 0x21f   : > { %3819 = vst.msk [vmem:[%s4531_s23 + $0x1b6] sm:$0x1] %vm1148_vm8, %v2513_v9 }
 0x220   : > { %3820 = vst.msk [vmem:[%s4531_s23 + $0x1b8] sm:$0x1] %vm1148_vm8, %v2514_v3  ;;  %v2402_v52 = vmax.f32 %v2386_v49, 0.0  ;;  %v2789_v21 = vpop.f32.mrf.mxu0 }
 0x221   : > { %3821 = vst.msk [vmem:[%s4531_s23 + $0x1ba] sm:$0x1] %vm1148_vm8, %v2515_v51  ;;  %v2337_v36 = vpop.f32.mrf.mxu3  ;;  %v2897_v17 = vpop.f32.mrf.mxu2  ;;  %v2842_v7 = vadd.f32 %v2841_v41, %v2789_v21 }
 0x222   : > { %3822 = vst.msk [vmem:[%s4531_s23 + $0x1bc] sm:$0x1] %vm1148_vm8, %v2516_v35  ;;  %v2518_v63 = vrot.slane %v2402_v52, 1  ;;  %v2519_v62 = vrot.slane %v2402_v52, 2  ;;  %v2520_v61 = vrot.slane %v2402_v52, 3  ;;  %v2355_v48 = vadd.f32 %v2337_v36, %v2255_v55 }
 0x223   : > { %3823 = vst.msk [vmem:[%s4531_s23 + $0x1be] sm:$0x1] %vm1148_vm8, %v2517_v20  ;;  %v2521_v54 = vrot.slane %v2402_v52, 4  ;;  %v2522_v6 = vrot.slane %v2402_v52, 5  ;;  %v2523_v13 = vrot.slane %v2402_v52, 6  ;;  %v2935_v23 = vadd.f32 %v2895_v11, %v2842_v7 }
 0x224   : > { %3824 = vst.msk [vmem:[%s4531_s23 + $0x1e0] sm:$0x1] %vm1148_vm8, %v2402_v52  ;;  %v2846_v40 = vpop.f32.mrf.mxu1  ;;  %v2371_v42 = vmul.f32 %v5452_v38, %v2355_v48  ;;  %v2524_v47 = vrot.slane %v2402_v52, 7 }
 0x225   : > { %3825 = vst.msk [vmem:[%s4531_s23 + $0x1e2] sm:$0x1] %vm1148_vm8, %v2518_v63 }
 0x226   : > { %3826 = vst.msk [vmem:[%s4531_s23 + $0x1e4] sm:$0x1] %vm1148_vm8, %v2519_v62  ;;  %v2387_v15 = vadd.f32 %v5462_v26, %v2371_v42 }
 0x227   : > { %3827 = vst.msk [vmem:[%s4531_s23 + $0x1e6] sm:$0x1] %vm1148_vm8, %v2520_v61 }
 0x228   : > { %3828 = vst.msk [vmem:[%s4531_s23 + $0x1e8] sm:$0x1] %vm1148_vm8, %v2521_v54  ;;  %v2791_v24 = vpop.f32.mrf.mxu0  ;;  %v2403_v25 = vmax.f32 %v2387_v15, 0.0 }
 0x229   : > { %3829 = vst.msk [vmem:[%s4531_s23 + $0x1ea] sm:$0x1] %vm1148_vm8, %v2522_v6  ;;  %v2979_v4 = vpop.f32.mrf.mxu3  ;;  %v2900_v29 = vpop.f32.mrf.mxu2  ;;  %v2844_v32 = vadd.f32 %v2843_v19, %v2791_v24 }
 0x22a   : > { %3830 = vst.msk [vmem:[%s4531_s23 + $0x1ec] sm:$0x1] %vm1148_vm8, %v2523_v13  ;;  %v3019_v33 = vadd.f32 %v2979_v4, %v2935_v23  ;;  %v2525_v14 = vrot.slane %v2403_v25, 1  ;;  %v2526_v31 = vrot.slane %v2403_v25, 2  ;;  %v2527_v12 = vrot.slane %v2403_v25, 3 }
 0x22b   : > { %3831 = vst.msk [vmem:[%s4531_s23 + $0x1ee] sm:$0x1] %vm1148_vm8, %v2524_v47  ;;  %v2528_v2 = vrot.slane %v2403_v25, 4  ;;  %v2529_v8 = vrot.slane %v2403_v25, 5  ;;  %v2530_v10 = vrot.slane %v2403_v25, 6  ;;  %v2531_v34 = vrot.slane %v2403_v25, 7 }
 0x22c   : > { %3832 = vst.msk [vmem:[%s4531_s23 + $0x1f0] sm:$0x1] %vm1148_vm8, %v2403_v25  ;;  %v3035_v27 = vmul.f32 %v5452_v38, %v3019_v33  ;;  %v2848_v57 = vpop.f32.mrf.mxu1  ;;  %v2936_v22 = vadd.f32 %v2897_v17, %v2844_v32 }
 0x22d   : > { %3833 = vst.msk [vmem:[%s4531_s23 + $0x1f2] sm:$0x1] %vm1148_vm8, %v2525_v14 }
 0x22e   : > { %3834 = vst.msk [vmem:[%s4531_s23 + $0x1f4] sm:$0x1] %vm1148_vm8, %v2526_v31  ;;  %v3051_v44 = vadd.f32 %v5462_v26, %v3035_v27 }
 0x22f   : > { %3835 = vst.msk [vmem:[%s4531_s23 + $0x1f6] sm:$0x1] %vm1148_vm8, %v2527_v12 }
 0x230   : > { %3836 = vst.msk [vmem:[%s4531_s23 + $0x1f8] sm:$0x1] %vm1148_vm8, %v2528_v2  ;;  %v3067_v56 = vmax.f32 %v3051_v44, 0.0  ;;  %v2794_v53 = vpop.f32.mrf.mxu0 }
 0x231   : > { %3837 = vst.msk [vmem:[%s4531_s23 + $0x1fa] sm:$0x1] %vm1148_vm8, %v2529_v8  ;;  %v2981_v28 = vpop.f32.mrf.mxu3  ;;  %v2902_v37 = vpop.f32.mrf.mxu2  ;;  %v2847_v59 = vadd.f32 %v2846_v40, %v2794_v53 }
 0x232   : > { %3838 = vst.msk [vmem:[%s4531_s23 + $0x1fc] sm:$0x1] %vm1148_vm8, %v2530_v10  ;;  %v3099_v41 = vrot.slane %v3067_v56, 1  ;;  %v3100_v18 = vrot.slane %v3067_v56, 2  ;;  %v3101_v39 = vrot.slane %v3067_v56, 3  ;;  %v3020_v58 = vadd.f32 %v2981_v28, %v2936_v22 }
 0x233   : > { %3839 = vst.msk [vmem:[%s4531_s23 + $0x1fe] sm:$0x1] %vm1148_vm8, %v2531_v34  ;;  %v3102_v16 = vrot.slane %v3067_v56, 4  ;;  %v3103_v30 = vrot.slane %v3067_v56, 5  ;;  %v3104_v5 = vrot.slane %v3067_v56, 6  ;;  %v2937_v11 = vadd.f32 %v2900_v29, %v2847_v59 }
 0x234   : > { %3877 = vst.msk [vmem:[%s4531_s23 + $0x21] sm:$0x1] %vm1148_vm8, %v3067_v56  ;;  %v2851_v60 = vpop.f32.mrf.mxu1  ;;  %v3036_v50 = vmul.f32 %v5452_v38, %v3020_v58  ;;  %v3105_v0 = vrot.slane %v3067_v56, 7 }
 0x235   : > { %3878 = vst.msk [vmem:[%s4531_s23 + $0x23] sm:$0x1] %vm1148_vm8, %v3099_v41 }
 0x236   : > { %3879 = vst.msk [vmem:[%s4531_s23 + $0x25] sm:$0x1] %vm1148_vm8, %v3100_v18  ;;  %v3052_v43 = vadd.f32 %v5462_v26, %v3036_v50 }
 0x237   : > { %3880 = vst.msk [vmem:[%s4531_s23 + $0x27] sm:$0x1] %vm1148_vm8, %v3101_v39 }
 0x238   : > { %3881 = vst.msk [vmem:[%s4531_s23 + $0x29] sm:$0x1] %vm1148_vm8, %v3102_v16  ;;  %v2796_v46 = vpop.f32.mrf.mxu0  ;;  %v3068_v9 = vmax.f32 %v3052_v43, 0.0 }
 0x239   : > { %3882 = vst.msk [vmem:[%s4531_s23 + $0x2b] sm:$0x1] %vm1148_vm8, %v3103_v30  ;;  %v2984_v3 = vpop.f32.mrf.mxu3  ;;  %v2905_v1 = vpop.f32.mrf.mxu2  ;;  %v2849_v55 = vadd.f32 %v2848_v57, %v2796_v46 }
 0x23a   : > { %3883 = vst.msk [vmem:[%s4531_s23 + $0x2d] sm:$0x1] %vm1148_vm8, %v3104_v5  ;;  %v3021_v19 = vadd.f32 %v2984_v3, %v2937_v11  ;;  %v3106_v51 = vrot.slane %v3068_v9, 1  ;;  %v3107_v45 = vrot.slane %v3068_v9, 2  ;;  %v3108_v35 = vrot.slane %v3068_v9, 3 }
 0x23b   : > { %3884 = vst.msk [vmem:[%s4531_s23 + $0x2f] sm:$0x1] %vm1148_vm8, %v3105_v0  ;;  %v3109_v49 = vrot.slane %v3068_v9, 4  ;;  %v3110_v21 = vrot.slane %v3068_v9, 5  ;;  %v3111_v36 = vrot.slane %v3068_v9, 6  ;;  %v3112_v63 = vrot.slane %v3068_v9, 7 }
 0x23c   : > { %3885 = vst.msk [vmem:[%s4531_s23 + $0x31] sm:$0x1] %vm1148_vm8, %v3068_v9  ;;  %v3037_v20 = vmul.f32 %v5452_v38, %v3021_v19  ;;  %v2853_v52 = vpop.f32.mrf.mxu1  ;;  %v2938_v61 = vadd.f32 %v2902_v37, %v2849_v55 }
 0x23d   : > { %3886 = vst.msk [vmem:[%s4531_s23 + $0x33] sm:$0x1] %vm1148_vm8, %v3106_v51 }
 0x23e   : > { %3887 = vst.msk [vmem:[%s4531_s23 + $0x35] sm:$0x1] %vm1148_vm8, %v3107_v45  ;;  %v3053_v17 = vadd.f32 %v5462_v26, %v3037_v20 }
 0x23f   : > { %3888 = vst.msk [vmem:[%s4531_s23 + $0x37] sm:$0x1] %vm1148_vm8, %v3108_v35 }
 0x240   : > { %3889 = vst.msk [vmem:[%s4531_s23 + $0x39] sm:$0x1] %vm1148_vm8, %v3109_v49  ;;  %v3069_v62 = vmax.f32 %v3053_v17, 0.0  ;;  %v2799_v7 = vpop.f32.mrf.mxu0 }
 0x241   : > { %3890 = vst.msk [vmem:[%s4531_s23 + $0x3b] sm:$0x1] %vm1148_vm8, %v3110_v21  ;;  %v2986_v48 = vpop.f32.mrf.mxu3  ;;  %v2907_v54 = vpop.f32.mrf.mxu2  ;;  %v2852_v42 = vadd.f32 %v2851_v60, %v2799_v7 }
 0x242   : > { %3891 = vst.msk [vmem:[%s4531_s23 + $0x3d] sm:$0x1] %vm1148_vm8, %v3111_v36  ;;  %v3113_v40 = vrot.slane %v3069_v62, 1  ;;  %v3114_v6 = vrot.slane %v3069_v62, 2  ;;  %v3115_v13 = vrot.slane %v3069_v62, 3  ;;  %v3022_v23 = vadd.f32 %v2986_v48, %v2938_v61 }
 0x243   : > { %3892 = vst.msk [vmem:[%s4531_s23 + $0x3f] sm:$0x1] %vm1148_vm8, %v3112_v63  ;;  %v3116_v47 = vrot.slane %v3069_v62, 4  ;;  %v3117_v24 = vrot.slane %v3069_v62, 5  ;;  %v3118_v4 = vrot.slane %v3069_v62, 6  ;;  %v2939_v29 = vadd.f32 %v2905_v1, %v2852_v42 }
 0x244   : > { %3893 = vst.msk [vmem:[%s4531_s23 + $0x61] sm:$0x1] %vm1148_vm8, %v3069_v62  ;;  %v2856_v15 = vpop.f32.mrf.mxu1  ;;  %v3038_v25 = vmul.f32 %v5452_v38, %v3022_v23  ;;  %v3119_v33 = vrot.slane %v3069_v62, 7 }
 0x245   : > { %3894 = vst.msk [vmem:[%s4531_s23 + $0x63] sm:$0x1] %vm1148_vm8, %v3113_v40 }
 0x246   : > { %3895 = vst.msk [vmem:[%s4531_s23 + $0x65] sm:$0x1] %vm1148_vm8, %v3114_v6  ;;  %v3054_v14 = vadd.f32 %v5462_v26, %v3038_v25 }
 0x247   : > { %3896 = vst.msk [vmem:[%s4531_s23 + $0x67] sm:$0x1] %vm1148_vm8, %v3115_v13 }
 0x248   : > { %3897 = vst.msk [vmem:[%s4531_s23 + $0x69] sm:$0x1] %vm1148_vm8, %v3116_v47  ;;  %v2801_v31 = vpop.f32.mrf.mxu0  ;;  %v3070_v12 = vmax.f32 %v3054_v14, 0.0 }
 0x249   : > { %3898 = vst.msk [vmem:[%s4531_s23 + $0x6b] sm:$0x1] %vm1148_vm8, %v3117_v24  ;;  %v2989_v2 = vpop.f32.mrf.mxu3  ;;  %v2910_v27 = vpop.f32.mrf.mxu2  ;;  %v2854_v22 = vadd.f32 %v2853_v52, %v2801_v31 }
 0x24a   : > { %3899 = vst.msk [vmem:[%s4531_s23 + $0x6d] sm:$0x1] %vm1148_vm8, %v3118_v4  ;;  %v3023_v57 = vadd.f32 %v2989_v2, %v2939_v29  ;;  %v3120_v8 = vrot.slane %v3070_v12, 1  ;;  %v3121_v32 = vrot.slane %v3070_v12, 2  ;;  %v3122_v10 = vrot.slane %v3070_v12, 3 }
 0x24b   : > { %3900 = vst.msk [vmem:[%s4531_s23 + $0x6f] sm:$0x1] %vm1148_vm8, %v3119_v33  ;;  %v3123_v44 = vrot.slane %v3070_v12, 4  ;;  %v3124_v53 = vrot.slane %v3070_v12, 5  ;;  %v3125_v28 = vrot.slane %v3070_v12, 6  ;;  %v3126_v41 = vrot.slane %v3070_v12, 7 }
 0x24c   : > { %3901 = vst.msk [vmem:[%s4531_s23 + $0x71] sm:$0x1] %vm1148_vm8, %v3070_v12  ;;  %v3039_v34 = vmul.f32 %v5452_v38, %v3023_v57  ;;  %v2858_v56 = vpop.f32.mrf.mxu1  ;;  %v2940_v39 = vadd.f32 %v2907_v54, %v2854_v22  ;;  %v5867_v22 = vld [vmem:[%s6049_s2] ss:$0 sm:$0xff] }
 0x24d   : > { %3902 = vst.msk [vmem:[%s4531_s23 + $0x73] sm:$0x1] %vm1148_vm8, %v3120_v8 }
 0x24e   : > { %3903 = vst.msk [vmem:[%s4531_s23 + $0x75] sm:$0x1] %vm1148_vm8, %v3121_v32  ;;  %v3055_v37 = vadd.f32 %v5462_v26, %v3039_v34 }
 0x24f   : > { %3904 = vst.msk [vmem:[%s4531_s23 + $0x77] sm:$0x1] %vm1148_vm8, %v3122_v10 }
 0x250   : > { %3905 = vst.msk [vmem:[%s4531_s23 + $0x79] sm:$0x1] %vm1148_vm8, %v3123_v44  ;;  %v3071_v18 = vmax.f32 %v3055_v37, 0.0  ;;  %v2804_v59 = vpop.f32.mrf.mxu0 }
 0x251   : > { %3906 = vst.msk [vmem:[%s4531_s23 + $0x7b] sm:$0x1] %vm1148_vm8, %v3124_v53  ;;  %v2991_v58 = vpop.f32.mrf.mxu3  ;;  %v2912_v16 = vpop.f32.mrf.mxu2  ;;  %v2857_v50 = vadd.f32 %v2856_v15, %v2804_v59 }
 0x252   : > { %3907 = vst.msk [vmem:[%s4531_s23 + $0x7d] sm:$0x1] %vm1148_vm8, %v3125_v28  ;;  %v3127_v60 = vrot.slane %v3071_v18, 1  ;;  %v3128_v30 = vrot.slane %v3071_v18, 2  ;;  %v3129_v5 = vrot.slane %v3071_v18, 3  ;;  %v3024_v11 = vadd.f32 %v2991_v58, %v2940_v39 }
 0x253   : > { %3908 = vst.msk [vmem:[%s4531_s23 + $0x7f] sm:$0x1] %vm1148_vm8, %v3126_v41  ;;  %v3130_v0 = vrot.slane %v3071_v18, 4  ;;  %v3131_v43 = vrot.slane %v3071_v18, 5  ;;  %v3132_v3 = vrot.slane %v3071_v18, 6  ;;  %v2941_v1 = vadd.f32 %v2910_v27, %v2857_v50 }
 0x254   : > { %3909 = vst.msk [vmem:[%s4531_s23 + $0xa1] sm:$0x1] %vm1148_vm8, %v3071_v18  ;;  %v3040_v46 = vmul.f32 %v5452_v38, %v3024_v11  ;;  %v2861_v9 = vpop.f32.mrf.mxu1  ;;  %v3133_v19 = vrot.slane %v3071_v18, 7  ;;  %v5877_v39 = vld [vmem:[%s6050_s3] ss:$0 sm:$0xff] }
 0x255   : > { %3910 = vst.msk [vmem:[%s4531_s23 + $0xa3] sm:$0x1] %vm1148_vm8, %v3127_v60 }
 0x256   : > { %3911 = vst.msk [vmem:[%s4531_s23 + $0xa5] sm:$0x1] %vm1148_vm8, %v3128_v30  ;;  %v3056_v51 = vadd.f32 %v5462_v26, %v3040_v46 }
 0x257   : > { %3912 = vst.msk [vmem:[%s4531_s23 + $0xa7] sm:$0x1] %vm1148_vm8, %v3129_v5 }
 0x258   : > { %3913 = vst.msk [vmem:[%s4531_s23 + $0xa9] sm:$0x1] %vm1148_vm8, %v3130_v0  ;;  %v2806_v45 = vpop.f32.mrf.mxu0  ;;  %v3072_v35 = vmax.f32 %v3056_v51, 0.0 }
 0x259   : > { %3914 = vst.msk [vmem:[%s4531_s23 + $0xab] sm:$0x1] %vm1148_vm8, %v3131_v43  ;;  %v2994_v49 = vpop.f32.mrf.mxu3  ;;  %v2915_v20 = vpop.f32.mrf.mxu2  ;;  %v2859_v7 = vadd.f32 %v2858_v56, %v2806_v45 }
 0x25a   : > { %3915 = vst.msk [vmem:[%s4531_s23 + $0xad] sm:$0x1] %vm1148_vm8, %v3132_v3  ;;  %v3025_v52 = vadd.f32 %v2994_v49, %v2941_v1  ;;  %v3134_v21 = vrot.slane %v3072_v35, 1  ;;  %v3135_v55 = vrot.slane %v3072_v35, 2  ;;  %v3136_v36 = vrot.slane %v3072_v35, 3 }
 0x25b   : > { %3916 = vst.msk [vmem:[%s4531_s23 + $0xaf] sm:$0x1] %vm1148_vm8, %v3133_v19  ;;  %v3137_v17 = vrot.slane %v3072_v35, 4  ;;  %v3138_v62 = vrot.slane %v3072_v35, 5  ;;  %v3139_v61 = vrot.slane %v3072_v35, 6  ;;  %v3140_v54 = vrot.slane %v3072_v35, 7 }
 0x25c   : > { %3917 = vst.msk [vmem:[%s4531_s23 + $0xb1] sm:$0x1] %vm1148_vm8, %v3072_v35  ;;  %v3041_v63 = vmul.f32 %v5452_v38, %v3025_v52  ;;  %v2863_v40 = vpop.f32.mrf.mxu1  ;;  %v2942_v13 = vadd.f32 %v2912_v16, %v2859_v7 }
 0x25d   : > { %3918 = vst.msk [vmem:[%s4531_s23 + $0xb3] sm:$0x1] %vm1148_vm8, %v3134_v21 }
 0x25e   : > { %3919 = vst.msk [vmem:[%s4531_s23 + $0xb5] sm:$0x1] %vm1148_vm8, %v3135_v55  ;;  %v3057_v48 = vadd.f32 %v5462_v26, %v3041_v63 }
 0x25f   : > { %3920 = vst.msk [vmem:[%s4531_s23 + $0xb7] sm:$0x1] %vm1148_vm8, %v3136_v36 }
 0x260   : > { %3921 = vst.msk [vmem:[%s4531_s23 + $0xb9] sm:$0x1] %vm1148_vm8, %v3137_v17  ;;  %v3073_v6 = vmax.f32 %v3057_v48, 0.0  ;;  %v2809_v42 = vpop.f32.mrf.mxu0 }
 0x261   : > { %3922 = vst.msk [vmem:[%s4531_s23 + $0xbb] sm:$0x1] %vm1148_vm8, %v3138_v62  ;;  %v2996_v23 = vpop.f32.mrf.mxu3  ;;  %v2862_v24 = vadd.f32 %v2861_v9, %v2809_v42  ;;  %v2917_v29 = vpop.f32.mrf.mxu2 }
 0x262   : > { %3923 = vst.msk [vmem:[%s4531_s23 + $0xbd] sm:$0x1] %vm1148_vm8, %v3139_v61  ;;  %v3141_v47 = vrot.slane %v3073_v6, 1  ;;  %v3142_v15 = vrot.slane %v3073_v6, 2  ;;  %v3143_v25 = vrot.slane %v3073_v6, 3  ;;  %v3026_v4 = vadd.f32 %v2996_v23, %v2942_v13 }
 0x263   : > { %3924 = vst.msk [vmem:[%s4531_s23 + $0xbf] sm:$0x1] %vm1148_vm8, %v3140_v54  ;;  %v3144_v33 = vrot.slane %v3073_v6, 4  ;;  %v3145_v14 = vrot.slane %v3073_v6, 5  ;;  %v3146_v12 = vrot.slane %v3073_v6, 6  ;;  %v2943_v2 = vadd.f32 %v2915_v20, %v2862_v24 }
 0x264   : > { %3925 = vst.msk [vmem:[%s4531_s23 + $0xe1] sm:$0x1] %vm1148_vm8, %v3073_v6  ;;  %v3042_v31 = vmul.f32 %v5452_v38, %v3026_v4  ;;  %v3147_v27 = vrot.slane %v3073_v6, 7  ;;  %v2866_v44 = vpop.f32.mrf.mxu1 }
 0x265   : > { %3926 = vst.msk [vmem:[%s4531_s23 + $0xe3] sm:$0x1] %vm1148_vm8, %v3141_v47 }
 0x266   : > { %3927 = vst.msk [vmem:[%s4531_s23 + $0xe5] sm:$0x1] %vm1148_vm8, %v3142_v15  ;;  %v3058_v57 = vadd.f32 %v5462_v26, %v3042_v31 }
 0x267   : > { %3928 = vst.msk [vmem:[%s4531_s23 + $0xe7] sm:$0x1] %vm1148_vm8, %v3143_v25 }
 0x268   : > { %3929 = vst.msk [vmem:[%s4531_s23 + $0xe9] sm:$0x1] %vm1148_vm8, %v3144_v33  ;;  %v2811_v8 = vpop.f32.mrf.mxu0  ;;  %v3074_v32 = vmax.f32 %v3058_v57, 0.0 }
 0x269   : > { %3930 = vst.msk [vmem:[%s4531_s23 + $0xeb] sm:$0x1] %vm1148_vm8, %v3145_v14  ;;  %v2999_v10 = vpop.f32.mrf.mxu3  ;;  %v2864_v41 = vadd.f32 %v2863_v40, %v2811_v8  ;;  %v2920_v18 = vpop.f32.mrf.mxu2 }
 0x26a   : > { %3931 = vst.msk [vmem:[%s4531_s23 + $0xed] sm:$0x1] %vm1148_vm8, %v3146_v12  ;;  %v3027_v38 = vadd.f32 %v2999_v10, %v2943_v2  ;;  %v3148_v34 = vrot.slane %v3074_v32, 1  ;;  %v3149_v56 = vrot.slane %v3074_v32, 2  ;;  %v3150_v26 = vrot.slane %v3074_v32, 3 }
 0x26b   : > { %3932 = vst.msk [vmem:[%s4531_s23 + $0xef] sm:$0x1] %vm1148_vm8, %v3147_v27  ;;  %v3151_v53 = vrot.slane %v3074_v32, 4  ;;  %v3152_v37 = vrot.slane %v3074_v32, 5  ;;  %v3153_v59 = vrot.slane %v3074_v32, 6  ;;  %v3154_v16 = vrot.slane %v3074_v32, 7 }
 0x26c   : > { %3933 = vst.msk [vmem:[%s4531_s23 + $0xf1] sm:$0x1] %vm1148_vm8, %v3074_v32  ;;  %v3043_v28 = vmul.f32 %v5867_v22, %v3027_v38  ;;  %v2944_v50 = vadd.f32 %v2917_v29, %v2864_v41  ;;  %v2868_v3 = vpop.f32.mrf.mxu1 }
 0x26d   : > { %3934 = vst.msk [vmem:[%s4531_s23 + $0xf3] sm:$0x1] %vm1148_vm8, %v3148_v34 }
 0x26e   : > { %3935 = vst.msk [vmem:[%s4531_s23 + $0xf5] sm:$0x1] %vm1148_vm8, %v3149_v56  ;;  %v3059_v58 = vadd.f32 %v5877_v39, %v3043_v28 }
 0x26f   : > { %3936 = vst.msk [vmem:[%s4531_s23 + $0xf7] sm:$0x1] %vm1148_vm8, %v3150_v26 }
 0x270   : > { %3937 = vst.msk [vmem:[%s4531_s23 + $0xf9] sm:$0x1] %vm1148_vm8, %v3151_v53  ;;  %v3075_v60 = vmax.f32 %v3059_v58, 0.0  ;;  %v2814_v30 = vpop.f32.mrf.mxu0 }
 0x271   : > { %3938 = vst.msk [vmem:[%s4531_s23 + $0xfb] sm:$0x1] %vm1148_vm8, %v3152_v37  ;;  %v3001_v5 = vpop.f32.mrf.mxu3  ;;  %v2867_v43 = vadd.f32 %v2866_v44, %v2814_v30  ;;  %v2922_v52 = vpop.f32.mrf.mxu2 }
 0x272   : > { %3939 = vst.msk [vmem:[%s4531_s23 + $0xfd] sm:$0x1] %vm1148_vm8, %v3153_v59  ;;  %v3155_v11 = vrot.slane %v3075_v60, 1  ;;  %v3156_v0 = vrot.slane %v3075_v60, 2  ;;  %v3157_v46 = vrot.slane %v3075_v60, 3  ;;  %v3028_v9 = vadd.f32 %v3001_v5, %v2944_v50 }
 0x273   : > { %3940 = vst.msk [vmem:[%s4531_s23 + $0xff] sm:$0x1] %vm1148_vm8, %v3154_v16  ;;  %v3158_v1 = vrot.slane %v3075_v60, 4  ;;  %v3159_v19 = vrot.slane %v3075_v60, 5  ;;  %v3160_v45 = vrot.slane %v3075_v60, 6  ;;  %v2945_v35 = vadd.f32 %v2920_v18, %v2867_v43 }
 0x274   : > { %3941 = vst.msk [vmem:[%s4531_s23 + $0x121] sm:$0x1] %vm1148_vm8, %v3075_v60  ;;  %v3044_v51 = vmul.f32 %v5867_v22, %v3028_v9  ;;  %v3161_v49 = vrot.slane %v3075_v60, 7  ;;  %v2871_v6 = vpop.f32.mrf.mxu1 }
 0x275   : > { %3942 = vst.msk [vmem:[%s4531_s23 + $0x123] sm:$0x1] %vm1148_vm8, %v3155_v11 }
 0x276   : > { %3943 = vst.msk [vmem:[%s4531_s23 + $0x125] sm:$0x1] %vm1148_vm8, %v3156_v0  ;;  %v3060_v20 = vadd.f32 %v5877_v39, %v3044_v51 }
 0x277   : > { %3944 = vst.msk [vmem:[%s4531_s23 + $0x127] sm:$0x1] %vm1148_vm8, %v3157_v46 }
 0x278   : > { %3945 = vst.msk [vmem:[%s4531_s23 + $0x129] sm:$0x1] %vm1148_vm8, %v3158_v1  ;;  %v2816_v21 = vpop.f32.mrf.mxu0  ;;  %v3076_v55 = vmax.f32 %v3060_v20, 0.0 }
 0x279   : > { %3946 = vst.msk [vmem:[%s4531_s23 + $0x12b] sm:$0x1] %vm1148_vm8, %v3159_v19  ;;  %v3004_v36 = vpop.f32.mrf.mxu3  ;;  %v2869_v40 = vadd.f32 %v2868_v3, %v2816_v21  ;;  %v2925_v24 = vpop.f32.mrf.mxu2 }
 0x27a   : > { %3947 = vst.msk [vmem:[%s4531_s23 + $0x12d] sm:$0x1] %vm1148_vm8, %v3160_v45  ;;  %v3029_v17 = vadd.f32 %v3004_v36, %v2945_v35  ;;  %v3162_v63 = vrot.slane %v3076_v55, 1  ;;  %v3163_v62 = vrot.slane %v3076_v55, 2  ;;  %v3164_v7 = vrot.slane %v3076_v55, 3 }
 0x27b   : > { %3948 = vst.msk [vmem:[%s4531_s23 + $0x12f] sm:$0x1] %vm1148_vm8, %v3161_v49  ;;  %v3165_v61 = vrot.slane %v3076_v55, 4  ;;  %v3166_v54 = vrot.slane %v3076_v55, 5  ;;  %v3167_v42 = vrot.slane %v3076_v55, 6  ;;  %v3168_v23 = vrot.slane %v3076_v55, 7 }
 0x27c   : > { %3949 = vst.msk [vmem:[%s4531_s23 + $0x131] sm:$0x1] %vm1148_vm8, %v3076_v55  ;;  %v3045_v48 = vmul.f32 %v5867_v22, %v3029_v17  ;;  %v2946_v25 = vadd.f32 %v2922_v52, %v2869_v40  ;;  %v2873_v38 = vpop.f32.mrf.mxu1 }
 0x27d   : > { %3950 = vst.msk [vmem:[%s4531_s23 + $0x133] sm:$0x1] %vm1148_vm8, %v3162_v63 }
 0x27e   : > { %3951 = vst.msk [vmem:[%s4531_s23 + $0x135] sm:$0x1] %vm1148_vm8, %v3163_v62  ;;  %v3061_v13 = vadd.f32 %v5877_v39, %v3045_v48 }
 0x27f   : > { %3952 = vst.msk [vmem:[%s4531_s23 + $0x137] sm:$0x1] %vm1148_vm8, %v3164_v7 }
 0x280   : > { %3953 = vst.msk [vmem:[%s4531_s23 + $0x139] sm:$0x1] %vm1148_vm8, %v3165_v61  ;;  %v3077_v47 = vmax.f32 %v3061_v13, 0.0  ;;  %v2819_v15 = vpop.f32.mrf.mxu0 }
 0x281   : > { %3954 = vst.msk [vmem:[%s4531_s23 + $0x13b] sm:$0x1] %vm1148_vm8, %v3166_v54  ;;  %v3006_v4 = vpop.f32.mrf.mxu3  ;;  %v2872_v14 = vadd.f32 %v2871_v6, %v2819_v15  ;;  %v2927_v18 = vpop.f32.mrf.mxu2 }
 0x282   : > { %3955 = vst.msk [vmem:[%s4531_s23 + $0x13d] sm:$0x1] %vm1148_vm8, %v3167_v42  ;;  %v3169_v29 = vrot.slane %v3077_v47, 1  ;;  %v3170_v33 = vrot.slane %v3077_v47, 2  ;;  %v3171_v31 = vrot.slane %v3077_v47, 3  ;;  %v3030_v12 = vadd.f32 %v3006_v4, %v2946_v25 }
 0x283   : > { %3956 = vst.msk [vmem:[%s4531_s23 + $0x13f] sm:$0x1] %vm1148_vm8, %v3168_v23  ;;  %v3172_v2 = vrot.slane %v3077_v47, 4  ;;  %v3173_v27 = vrot.slane %v3077_v47, 5  ;;  %v3174_v8 = vrot.slane %v3077_v47, 6  ;;  %v2947_v32 = vadd.f32 %v2925_v24, %v2872_v14 }
 0x284   : > { %3957 = vst.msk [vmem:[%s4531_s23 + $0x161] sm:$0x1] %vm1148_vm8, %v3077_v47  ;;  %v3046_v57 = vmul.f32 %v5867_v22, %v3030_v12  ;;  %v3175_v10 = vrot.slane %v3077_v47, 7  ;;  %v2876_v43 = vpop.f32.mrf.mxu1 }
 0x285   : > { %3958 = vst.msk [vmem:[%s4531_s23 + $0x163] sm:$0x1] %vm1148_vm8, %v3169_v29 }
 0x286   : > { %3959 = vst.msk [vmem:[%s4531_s23 + $0x165] sm:$0x1] %vm1148_vm8, %v3170_v33  ;;  %v3062_v44 = vadd.f32 %v5877_v39, %v3046_v57 }
 0x287   : > { %3960 = vst.msk [vmem:[%s4531_s23 + $0x167] sm:$0x1] %vm1148_vm8, %v3171_v31 }
 0x288   : > { %3961 = vst.msk [vmem:[%s4531_s23 + $0x169] sm:$0x1] %vm1148_vm8, %v3172_v2  ;;  %v2821_v34 = vpop.f32.mrf.mxu0  ;;  %v3078_v56 = vmax.f32 %v3062_v44, 0.0 }
 0x289   : > { %3962 = vst.msk [vmem:[%s4531_s23 + $0x16b] sm:$0x1] %vm1148_vm8, %v3173_v27  ;;  %v3009_v26 = vpop.f32.mrf.mxu3  ;;  %v2874_v60 = vadd.f32 %v2873_v38, %v2821_v34  ;;  %v2930_v20 = vpop.f32.mrf.mxu2 }
 0x28a   : > { %3963 = vst.msk [vmem:[%s4531_s23 + $0x16d] sm:$0x1] %vm1148_vm8, %v3174_v8  ;;  %v3031_v53 = vadd.f32 %v3009_v26, %v2947_v32  ;;  %v3176_v28 = vrot.slane %v3078_v56, 1  ;;  %v3177_v37 = vrot.slane %v3078_v56, 2  ;;  %v3178_v41 = vrot.slane %v3078_v56, 3 }
 0x28b   : > { %3964 = vst.msk [vmem:[%s4531_s23 + $0x16f] sm:$0x1] %vm1148_vm8, %v3175_v10  ;;  %v3179_v59 = vrot.slane %v3078_v56, 4  ;;  %v3180_v16 = vrot.slane %v3078_v56, 5  ;;  %v3181_v30 = vrot.slane %v3078_v56, 6  ;;  %v3182_v5 = vrot.slane %v3078_v56, 7 }
 0x28c   : > { %3965 = vst.msk [vmem:[%s4531_s23 + $0x171] sm:$0x1] %vm1148_vm8, %v3078_v56  ;;  %v3047_v58 = vmul.f32 %v5867_v22, %v3031_v53  ;;  %v2948_v46 = vadd.f32 %v2927_v18, %v2874_v60  ;;  %v2878_v42 = vpop.f32.mrf.mxu1 }
 0x28d   : > { %3966 = vst.msk [vmem:[%s4531_s23 + $0x173] sm:$0x1] %vm1148_vm8, %v3176_v28 }
 0x28e   : > { %3967 = vst.msk [vmem:[%s4531_s23 + $0x175] sm:$0x1] %vm1148_vm8, %v3177_v37  ;;  %v3063_v50 = vadd.f32 %v5877_v39, %v3047_v58 }
 0x28f   : > { %3968 = vst.msk [vmem:[%s4531_s23 + $0x177] sm:$0x1] %vm1148_vm8, %v3178_v41 }
 0x290   : > { %3969 = vst.msk [vmem:[%s4531_s23 + $0x179] sm:$0x1] %vm1148_vm8, %v3179_v59  ;;  %v3079_v11 = vmax.f32 %v3063_v50, 0.0  ;;  %v2824_v0 = vpop.f32.mrf.mxu0 }
 0x291   : > { %3970 = vst.msk [vmem:[%s4531_s23 + $0x17b] sm:$0x1] %vm1148_vm8, %v3180_v16  ;;  %v3011_v9 = vpop.f32.mrf.mxu3  ;;  %v2877_v19 = vadd.f32 %v2876_v43, %v2824_v0  ;;  %v2932_v4 = vpop.f32.mrf.mxu2 }
 0x292   : > { %3971 = vst.msk [vmem:[%s4531_s23 + $0x17d] sm:$0x1] %vm1148_vm8, %v3181_v30  ;;  %v3183_v3 = vrot.slane %v3079_v11, 1  ;;  %v3184_v1 = vrot.slane %v3079_v11, 2  ;;  %v3185_v51 = vrot.slane %v3079_v11, 3  ;;  %v3032_v45 = vadd.f32 %v3011_v9, %v2948_v46 }
 0x293   : > { %3972 = vst.msk [vmem:[%s4531_s23 + $0x17f] sm:$0x1] %vm1148_vm8, %v3182_v5  ;;  %v3186_v35 = vrot.slane %v3079_v11, 4  ;;  %v3187_v49 = vrot.slane %v3079_v11, 5  ;;  %v3188_v21 = vrot.slane %v3079_v11, 6  ;;  %v2949_v55 = vadd.f32 %v2930_v20, %v2877_v19 }
 0x294   : > { %3973 = vst.msk [vmem:[%s4531_s23 + $0x1a1] sm:$0x1] %vm1148_vm8, %v3079_v11  ;;  %v3048_v52 = vmul.f32 %v5867_v22, %v3032_v45  ;;  %v3189_v36 = vrot.slane %v3079_v11, 7 }
 0x295   : > { %3974 = vst.msk [vmem:[%s4531_s23 + $0x1a3] sm:$0x1] %vm1148_vm8, %v3183_v3 }
 0x296   : > { %3975 = vst.msk [vmem:[%s4531_s23 + $0x1a5] sm:$0x1] %vm1148_vm8, %v3184_v1  ;;  %v3064_v17 = vadd.f32 %v5877_v39, %v3048_v52 }
 0x297   : > { %3976 = vst.msk [vmem:[%s4531_s23 + $0x1a7] sm:$0x1] %vm1148_vm8, %v3185_v51 }
 0x298   : > { %3977 = vst.msk [vmem:[%s4531_s23 + $0x1a9] sm:$0x1] %vm1148_vm8, %v3186_v35  ;;  %v3080_v63 = vmax.f32 %v3064_v17, 0.0  ;;  %v2826_v61 = vpop.f32.mrf.mxu0 }
 0x299   : > { %3978 = vst.msk [vmem:[%s4531_s23 + $0x1ab] sm:$0x1] %vm1148_vm8, %v3187_v49  ;;  %v3014_v62 = vpop.f32.mrf.mxu3  ;;  %v2879_v47 = vadd.f32 %v2878_v42, %v2826_v61 }
 0x29a   : > { %3979 = vst.msk [vmem:[%s4531_s23 + $0x1ad] sm:$0x1] %vm1148_vm8, %v3188_v21  ;;  %v3033_v7 = vadd.f32 %v3014_v62, %v2949_v55  ;;  %v3190_v48 = vrot.slane %v3080_v63, 1  ;;  %v3191_v54 = vrot.slane %v3080_v63, 2  ;;  %v3192_v40 = vrot.slane %v3080_v63, 3 }
 0x29b   : > { %3980 = vst.msk [vmem:[%s4531_s23 + $0x1af] sm:$0x1] %vm1148_vm8, %v3189_v36  ;;  %v3193_v6 = vrot.slane %v3080_v63, 4  ;;  %v3194_v23 = vrot.slane %v3080_v63, 5  ;;  %v3195_v15 = vrot.slane %v3080_v63, 6  ;;  %v3196_v25 = vrot.slane %v3080_v63, 7 }
 0x29c   : > { %3981 = vst.msk [vmem:[%s4531_s23 + $0x1b1] sm:$0x1] %vm1148_vm8, %v3080_v63  ;;  %v3049_v13 = vmul.f32 %v5867_v22, %v3033_v7  ;;  %v2950_v33 = vadd.f32 %v2932_v4, %v2879_v47 }
 0x29d   : > { %3982 = vst.msk [vmem:[%s4531_s23 + $0x1b3] sm:$0x1] %vm1148_vm8, %v3190_v48 }
 0x29e   : > { %3983 = vst.msk [vmem:[%s4531_s23 + $0x1b5] sm:$0x1] %vm1148_vm8, %v3191_v54  ;;  %v3065_v24 = vadd.f32 %v5877_v39, %v3049_v13 }
 0x29f   : > { %3984 = vst.msk [vmem:[%s4531_s23 + $0x1b7] sm:$0x1] %vm1148_vm8, %v3192_v40 }
 0x2a0   : > { %3985 = vst.msk [vmem:[%s4531_s23 + $0x1b9] sm:$0x1] %vm1148_vm8, %v3193_v6  ;;  %v3081_v29 = vmax.f32 %v3065_v24, 0.0 }
 0x2a1   : > { %3986 = vst.msk [vmem:[%s4531_s23 + $0x1bb] sm:$0x1] %vm1148_vm8, %v3194_v23  ;;  %v3016_v14 = vpop.f32.mrf.mxu3 }
 0x2a2   : > { %3987 = vst.msk [vmem:[%s4531_s23 + $0x1bd] sm:$0x1] %vm1148_vm8, %v3195_v15  ;;  %v3197_v31 = vrot.slane %v3081_v29, 1  ;;  %v3198_v12 = vrot.slane %v3081_v29, 2  ;;  %v3199_v2 = vrot.slane %v3081_v29, 3  ;;  %v3034_v27 = vadd.f32 %v3016_v14, %v2950_v33 }
 0x2a3   : > { %3988 = vst.msk [vmem:[%s4531_s23 + $0x1bf] sm:$0x1] %vm1148_vm8, %v3196_v25  ;;  %v3200_v57 = vrot.slane %v3081_v29, 4  ;;  %v3201_v8 = vrot.slane %v3081_v29, 5  ;;  %v3202_v10 = vrot.slane %v3081_v29, 6  ;;  %v3203_v44 = vrot.slane %v3081_v29, 7 }
 0x2a4   : > { %3989 = vst.msk [vmem:[%s4531_s23 + $0x1e1] sm:$0x1] %vm1148_vm8, %v3081_v29  ;;  %v3050_v32 = vmul.f32 %v5867_v22, %v3034_v27 }
 0x2a5   : > { %3990 = vst.msk [vmem:[%s4531_s23 + $0x1e3] sm:$0x1] %vm1148_vm8, %v3197_v31 }
 0x2a6   : > { %3991 = vst.msk [vmem:[%s4531_s23 + $0x1e5] sm:$0x1] %vm1148_vm8, %v3198_v12  ;;  %v3066_v38 = vadd.f32 %v5877_v39, %v3050_v32 }
 0x2a7   : > { %3992 = vst.msk [vmem:[%s4531_s23 + $0x1e7] sm:$0x1] %vm1148_vm8, %v3199_v2 }
 0x2a8   : > { %3993 = vst.msk [vmem:[%s4531_s23 + $0x1e9] sm:$0x1] %vm1148_vm8, %v3200_v57  ;;  %v3082_v34 = vmax.f32 %v3066_v38, 0.0 }
 0x2a9   : > { %3994 = vst.msk [vmem:[%s4531_s23 + $0x1eb] sm:$0x1] %vm1148_vm8, %v3201_v8 }
 0x2aa   : > { %3995 = vst.msk [vmem:[%s4531_s23 + $0x1ed] sm:$0x1] %vm1148_vm8, %v3202_v10  ;;  %v3204_v22 = vrot.slane %v3082_v34, 1  ;;  %v3205_v56 = vrot.slane %v3082_v34, 2  ;;  %v3206_v26 = vrot.slane %v3082_v34, 3  ;;  %v3207_v53 = vrot.slane %v3082_v34, 4 }
 0x2ab   : > { %3996 = vst.msk [vmem:[%s4531_s23 + $0x1ef] sm:$0x1] %vm1148_vm8, %v3203_v44  ;;  %v3208_v39 = vrot.slane %v3082_v34, 5  ;;  %v3209_v28 = vrot.slane %v3082_v34, 6  ;;  %v3210_v37 = vrot.slane %v3082_v34, 7 }
 0x2ac   : > { %3997 = vst.msk [vmem:[%s4531_s23 + $0x1f1] sm:$0x1] %vm1148_vm8, %v3082_v34 }
 0x2ad   : > { %3998 = vst.msk [vmem:[%s4531_s23 + $0x1f3] sm:$0x1] %vm1148_vm8, %v3204_v22 }
 0x2ae   : > { %3999 = vst.msk [vmem:[%s4531_s23 + $0x1f5] sm:$0x1] %vm1148_vm8, %v3205_v56 }
 0x2af   : > { %4000 = vst.msk [vmem:[%s4531_s23 + $0x1f7] sm:$0x1] %vm1148_vm8, %v3206_v26 }
 0x2b0   : > { %4001 = vst.msk [vmem:[%s4531_s23 + $0x1f9] sm:$0x1] %vm1148_vm8, %v3207_v53 }
 0x2b1   : > { %4002 = vst.msk [vmem:[%s4531_s23 + $0x1fb] sm:$0x1] %vm1148_vm8, %v3208_v39 }
 0x2b2   : > { %4003 = vst.msk [vmem:[%s4531_s23 + $0x1fd] sm:$0x1] %vm1148_vm8, %v3209_v28 }
 0x2b3   : > { %4004 = vst.msk [vmem:[%s4531_s23 + $0x1ff] sm:$0x1] %vm1148_vm8, %v3210_v37 }
 0x2b4 PF: > { %s14_s19 = sadd.s32 1, %s4113_s19   ;;  %s6056_s15 = smov %s4105_s17 }
 0x2b5   : > { %p11_p7 = scmp.ge.s32.totalorder %s14_s19, 6   ;;  %s6057_s16 = smov %s4109_s18 }
 0x2b6   : > { %s6058_s17 = smov %s6061_s20  ;;  %s6059_s18 = smov %s6065_s21 }
 0x2b7   :  { %13 = sbr.rel (!%p11_p7) target bundleno = 3 (0x3), region = 83 }

</bundles_post_ra>
